<compile_context>
chip_gen: v7x
topology: tpu7x:2x2x1
jax: 0.10.0
libtpu: 0.0.40
codegen_flags: <defaults>
</compile_context>

<pallas_src>
import functools

import jax
import jax.numpy as jnp
from jax.experimental import pallas as pl
from jax.experimental.pallas import tpu as pltpu


# ---------------------------------------------------------------------------
# Generation-aware budgets & tile picking
# ---------------------------------------------------------------------------
def _device_budgets():
    """(scoped vmem limit, spectral tile budget, feed-forward tile budget) bytes.

    v5e/v6e: 128 MiB physical VMEM -> larger scoped request + tile budgets.
    v7x / unknown: 64 MiB per core -> keep the conservative 32 MiB request.
    """
    try:
        kind = jax.devices()[0].device_kind.lower()
    except Exception:  # pragma: no cover - defensive, never expected on TPU
        kind = ""
    if ("v5" in kind) or ("v6" in kind):
        return 64 << 20, 16 << 20, 32 << 20
    return 32 << 20, 8 << 20, 16 << 20


def _pick_tile(rows, row_bytes, budget_bytes, align=8, max_tile=4096):
    """Largest align-multiple tile (<= max_tile) whose working set fits budget."""
    t = min(max_tile, max(align, budget_bytes // max(row_bytes, 1)))
    t = max(align, (t // align) * align)
    return rows if rows <= t else t


# ---------------------------------------------------------------------------
# Fused truncated-DFT + complex channel-mix operators (built once per call,
# tiny; XLA constant-ish work outside the kernels).
# ---------------------------------------------------------------------------
def _dft_mix_operators(fw, L):
    """Build (F_fwd, W_blockdiag, F_inv) for one spectral branch.

    fw: (I, O, K, 2) real/imag Fourier weight.  L: transform length.
    Lane orderings: input (pos, chan_in), spectrum (mode, {Re,Im}, chan),
    output (pos, chan_out) — i.e. the natural channels-last flattening.
    """
    I, O, K, _ = fw.shape
    scale = 1.0 / jnp.sqrt(jnp.asarray(L, jnp.float32))
    pos = jnp.arange(L, dtype=jnp.float32)
    mode = jnp.arange(K, dtype=jnp.float32)
    ang = 2.0 * jnp.pi * jnp.outer(pos, mode) / L                    # (L, K)

    # Forward rfft (norm='ortho'), truncated to K modes:  X = Xr + j*Xi
    fwd = jnp.stack([jnp.cos(ang), -jnp.sin(ang)], axis=-1) * scale  # (L, K, 2)
    f_fwd = jnp.einsum("lkc,ij->likcj", fwd, jnp.eye(I, dtype=jnp.float32))
    f_fwd = f_fwd.reshape(L * I, K * 2 * I)

    # Per-mode complex mix as a real (2I, 2O) block, block-diagonal over modes:
    #   [Xr | Xi] @ [[wr, wi], [-wi, wr]] = [Re(X.w) | Im(X.w)]
    wr, wi = fw[..., 0], fw[..., 1]                                  # (I, O, K)
    blk = jnp.concatenate(
        [jnp.concatenate([wr, wi], axis=1),
         jnp.concatenate([-wi, wr], axis=1)], axis=0)                # (2I, 2O, K)
    blk = jnp.transpose(blk, (2, 0, 1))                              # (K, 2I, 2O)
    w_bd = jnp.einsum("kab,kq->kaqb", blk, jnp.eye(K, dtype=jnp.float32))
    w_bd = w_bd.reshape(K * 2 * I, K * 2 * O)

    # Inverse: zero-padded irfft (norm='ortho') of the K-truncated spectrum:
    #   x_n = (1/sqrt(L)) * [Re Y_0 + 2*sum_{k>=1} (Re Y_k cos - Im Y_k sin)]
    # (sin term vanishes for k=0 / Nyquist, matching irfft's dropped imag part).
    factor = jnp.array(
        [1.0 if (k == 0 or (L % 2 == 0 and k == L // 2)) else 2.0
         for k in range(K)], dtype=jnp.float32)
    inv = (jnp.stack([jnp.cos(ang), -jnp.sin(ang)], axis=-1)
           * scale * factor[None, :, None])                          # (L, K, 2)
    f_inv = jnp.einsum("lkc,op->kcolp", inv, jnp.eye(O, dtype=jnp.float32))
    f_inv = f_inv.reshape(K * 2 * O, L * O)
    return f_fwd, w_bd, f_inv


# ---------------------------------------------------------------------------
# Pallas kernel 1: fused spectral branch (forward DFT -> mode mix -> inverse)
# One token tile = three chained lane-dense 2-D MXU matmuls. No FFT, no
# per-mode slicing, no pack/unpack round trips.
# ---------------------------------------------------------------------------
def _spectral_kernel(x_ref, fa_ref, wbd_ref, fc_ref, o_ref, *, matmul_dtype):
    x = x_ref[...].astype(matmul_dtype)
    z = jnp.dot(x, fa_ref[...].astype(matmul_dtype),
                preferred_element_type=jnp.float32)           # (t, K*2I)
    y = jnp.dot(z.astype(matmul_dtype), wbd_ref[...].astype(matmul_dtype),
                preferred_element_type=jnp.float32)           # (t, K*2O)
    o_ref[...] = jnp.dot(y.astype(matmul_dtype), fc_ref[...].astype(matmul_dtype),
                         preferred_element_type=jnp.float32)  # (t, L*O)


def spectral_mix(x2d, f_fwd, w_bd, f_inv, *, tile_rows=None,
                 matmul_dtype=jnp.float32, vmem_budget=8 << 20,
                 vmem_limit=32 << 20):
    """x2d: (T, L*I) tokens; returns (T, L*O) spatial-domain branch output."""
    T, LI = x2d.shape
    LO = f_inv.shape[1]
    if tile_rows is None:
        # in + out + spectral intermediates per row, double-buffered I/O.
        row_bytes = (2 * (LI + LO) + f_fwd.shape[1] + w_bd.shape[1]) * 4
        tile_rows = _pick_tile(T, row_bytes, budget_bytes=vmem_budget,
                               max_tile=4096)
    kernel = functools.partial(_spectral_kernel, matmul_dtype=matmul_dtype)
    return pl.pallas_call(
        kernel,
        out_shape=jax.ShapeDtypeStruct((T, LO), jnp.float32),
        grid=(pl.cdiv(T, tile_rows),),
        in_specs=[pl.BlockSpec((tile_rows, LI), lambda t: (t, 0)),
                  pl.BlockSpec(f_fwd.shape, lambda t: (0, 0)),   # resident
                  pl.BlockSpec(w_bd.shape, lambda t: (0, 0)),    # resident
                  pl.BlockSpec(f_inv.shape, lambda t: (0, 0))],  # resident
        out_specs=pl.BlockSpec((tile_rows, LO), lambda t: (t, 0)),
        compiler_params=pltpu.CompilerParams(
            dimension_semantics=("parallel",),
            vmem_limit_bytes=vmem_limit),
    )(x2d, f_fwd, w_bd, f_inv)


# ---------------------------------------------------------------------------
# Pallas kernel 2: fused (xx + xy) -> Linear -> ReLU -> Linear -> LayerNorm
# (backcast FeedForward, n_ff_layers=2, dropout identity in eval).
# ---------------------------------------------------------------------------
def _ff_kernel(xa_ref, xb_ref, w1_ref, b1_ref, w2_ref, b2_ref,
               g_ref, bt_ref, o_ref, *, matmul_dtype):
    x = xa_ref[...] + xb_ref[...]                     # fused spectral-branch add
    h = jnp.dot(x.astype(matmul_dtype), w1_ref[...].astype(matmul_dtype),
                preferred_element_type=jnp.float32) + b1_ref[...]
    h = jnp.maximum(h, 0.0)                           # ReLU
    y = jnp.dot(h.astype(matmul_dtype), w2_ref[...].astype(matmul_dtype),
                preferred_element_type=jnp.float32) + b2_ref[...]
    # LayerNorm (eps=1e-5). Padded tail rows (cdiv raggedness) may carry
    # garbage but are masked on store, so they never reach HBM.
    mu = jnp.mean(y, axis=-1, keepdims=True)
    var = jnp.mean(jnp.square(y - mu), axis=-1, keepdims=True)
    o_ref[...] = (y - mu) * jax.lax.rsqrt(var + 1e-5) * g_ref[...] + bt_ref[...]


def feed_forward(tokens_a, tokens_b, w1, b1, w2, b2, gamma, beta,
                 *, tile_tokens=None, matmul_dtype=jnp.float32,
                 vmem_budget=16 << 20, vmem_limit=32 << 20):
    T, D = tokens_a.shape
    H = w1.shape[1]
    if tile_tokens is None:
        row_bytes = (3 * D + H) * 4 * 2               # xa+xb+out, double-buffered
        tile_tokens = _pick_tile(T, row_bytes, budget_bytes=vmem_budget,
                                 max_tile=16384)      # raised cap (DMA-bound)
    tok_spec = pl.BlockSpec((tile_tokens, D), lambda t: (t, 0))
    kernel = functools.partial(_ff_kernel, matmul_dtype=matmul_dtype)
    return pl.pallas_call(
        kernel,
        out_shape=jax.ShapeDtypeStruct((T, D), jnp.float32),
        grid=(pl.cdiv(T, tile_tokens),),              # ragged tail via cdiv
        in_specs=[tok_spec, tok_spec,
                  pl.BlockSpec((D, H), lambda t: (0, 0)),
                  pl.BlockSpec((1, H), lambda t: (0, 0)),
                  pl.BlockSpec((H, D), lambda t: (0, 0)),
                  pl.BlockSpec((1, D), lambda t: (0, 0)),
                  pl.BlockSpec((1, D), lambda t: (0, 0)),
                  pl.BlockSpec((1, D), lambda t: (0, 0))],
        out_specs=tok_spec,
        compiler_params=pltpu.CompilerParams(
            dimension_semantics=("parallel",),
            vmem_limit_bytes=vmem_limit),
    )(tokens_a, tokens_b, w1, b1, w2, b2, gamma, beta)


# ---------------------------------------------------------------------------
# forward_fourier (mode == 'full'), channels-last end to end, no jnp.fft.
# ---------------------------------------------------------------------------
def forward_fourier(x, fw0, fw1, n_modes, *, matmul_dtype=jnp.float32):
    """x: (B, M, N, I). Returns (xx, xy), each (B, M, N, O); their sum equals
    the reference forward_fourier output (the add is fused into the FF kernel)."""
    del n_modes  # encoded in the weight shapes
    B, M, N, I = x.shape
    O = fw0.shape[1]
    vmem_limit, spec_budget, _ = _device_budgets()

    # ---- dimension Y: transform over N (axis 2); tokens = (b, m) rows ----
    fa_y, wbd_y, fc_y = _dft_mix_operators(fw0, N)
    xy = spectral_mix(x.reshape(B * M, N * I), fa_y, wbd_y, fc_y,
                      matmul_dtype=matmul_dtype, vmem_budget=spec_budget,
                      vmem_limit=vmem_limit)
    xy = xy.reshape(B, M, N, O)

    # ---- dimension X: transform over M (axis 1); tokens = (b, n) rows ----
    # Axis swap is wrapper-side layout plumbing so the kernel stays lane-dense
    # on (m, i) / (m, o) lanes; it replaces the (larger) rfft/irfft traffic.
    fa_x, wbd_x, fc_x = _dft_mix_operators(fw1, M)
    x_t = jnp.swapaxes(x, 1, 2)                                    # (B, N, M, I)
    xx = spectral_mix(x_t.reshape(B * N, M * I), fa_x, wbd_x, fc_x,
                      matmul_dtype=matmul_dtype, vmem_budget=spec_budget,
                      vmem_limit=vmem_limit)
    xx = jnp.swapaxes(xx.reshape(B, N, M, O), 1, 2)                # (B, M, N, O)
    return xx, xy


def spectral_conv2d_forward(x, params, n_modes, *, matmul_dtype=jnp.float32):
    """SpectralConv2d.forward for mode='full'. Returns (backcast, None)."""
    xx, xy = forward_fourier(x, params["fw0"], params["fw1"], n_modes,
                             matmul_dtype=matmul_dtype)
    B, M, N, O = xx.shape
    vmem_limit, _, ff_budget = _device_budgets()
    b = feed_forward(xx.reshape(B * M * N, O), xy.reshape(B * M * N, O),
                     params["w1"], params["b1"], params["w2"], params["b2"],
                     params["gamma"], params["beta"],
                     matmul_dtype=matmul_dtype, vmem_budget=ff_budget,
                     vmem_limit=vmem_limit)
    return b.reshape(B, M, N, O), None


# ---------------------------------------------------------------------------
# Pure-jnp reference (mirrors the PyTorch module, uses real FFTs) — validates
# the in-kernel truncated-DFT math in the self-check below.
# ---------------------------------------------------------------------------
def _complex_mode_einsum(xf, w, eq):
    xr_, xi_ = jnp.real(xf), jnp.imag(xf)
    wr_, wi_ = w[..., 0], w[..., 1]
    re = jnp.einsum(eq, xr_, wr_) - jnp.einsum(eq, xi_, wi_)
    im = jnp.einsum(eq, xr_, wi_) + jnp.einsum(eq, xi_, wr_)
    return jax.lax.complex(re, im)


def _reference_forward(x, params, n_modes):
    B, M, N, _ = x.shape
    O = params["fw0"].shape[1]
    xc = jnp.transpose(x, (0, 3, 1, 2))                          # b i m n

    x_fty = jnp.fft.rfft(xc, axis=-1, norm="ortho")
    out_ft = jnp.zeros((B, O, M, N // 2 + 1), jnp.complex64).at[..., :n_modes].set(
        _complex_mode_einsum(x_fty[..., :n_modes], params["fw0"], "bixy,ioy->boxy"))
    xy = jnp.fft.irfft(out_ft, n=N, axis=-1, norm="ortho")

    x_ftx = jnp.fft.rfft(xc, axis=-2, norm="ortho")
    out_ft = jnp.zeros((B, O, M // 2 + 1, N), jnp.complex64).at[:, :, :n_modes, :].set(
        _complex_mode_einsum(x_ftx[:, :, :n_modes, :], params["fw1"], "bixy,iox->boxy"))
    xx = jnp.fft.irfft(out_ft, n=M, axis=-2, norm="ortho")

    xf = jnp.transpose(xx + xy, (0, 2, 3, 1))                    # b m n o
    h = jnp.maximum(xf @ params["w1"] + params["b1"][0], 0.0)
    y = h @ params["w2"] + params["b2"][0]
    mu = y.mean(-1, keepdims=True)
    var = ((y - mu) ** 2).mean(-1, keepdims=True)
    return (y - mu) * jax.lax.rsqrt(var + 1e-5) * params["gamma"][0] + params["beta"][0]


# ---------------------------------------------------------------------------
if __name__ == "__main__":
    B, M, N = 2, 16, 16
    in_dim = out_dim = 4
    n_modes = 4
    factor = 2
    hidden = out_dim * factor

    key = jax.random.PRNGKey(0)
    ks = jax.random.split(key, 8)

    x = jax.random.normal(ks[0], (B, M, N, in_dim), jnp.float32)

    # Fourier weights: xavier_normal_ over (in_dim, out_dim, n_modes, 2)
    fan_in, fan_out = out_dim * n_modes * 2, in_dim * n_modes * 2
    std = (2.0 / (fan_in + fan_out)) ** 0.5
    fw0 = std * jax.random.normal(ks[1], (in_dim, out_dim, n_modes, 2), jnp.float32)
    fw1 = std * jax.random.normal(ks[2], (in_dim, out_dim, n_modes, 2), jnp.float32)

    # backcast FeedForward params (Linear stored as (in, out): y = x @ W + b)
    lim1 = 1.0 / (out_dim ** 0.5)
    w1 = jax.random.uniform(ks[3], (out_dim, hidden), jnp.float32, -lim1, lim1)
    b1 = jax.random.uniform(ks[4], (1, hidden), jnp.float32, -lim1, lim1)
    lim2 = 1.0 / (hidden ** 0.5)
    w2 = jax.random.uniform(ks[5], (hidden, out_dim), jnp.float32, -lim2, lim2)
    b2 = jax.random.uniform(ks[6], (1, out_dim), jnp.float32, -lim2, lim2)
    gamma = jnp.ones((1, out_dim), jnp.float32)     # LayerNorm default init
    beta = jnp.zeros((1, out_dim), jnp.float32)

    params = dict(fw0=fw0, fw1=fw1, w1=w1, b1=b1, w2=w2, b2=b2,
                  gamma=gamma, beta=beta)

    fwd = jax.jit(functools.partial(spectral_conv2d_forward, n_modes=n_modes))
    b_out, fc = fwd(x, params)
    jax.block_until_ready(b_out)
    assert b_out.shape == (B, M, N, out_dim) and fc is None

    ref = _reference_forward(x, params, n_modes)
    err = float(jnp.max(jnp.abs(b_out - ref)))
    assert err < 2e-3, f"mismatch vs reference: max abs err = {err}"
    print("KERNEL_OK")
</pallas_src>

<mosaic_0001>
module attributes {stable_mosaic.version = 11 : i64} {
  func.func @_spectral_kernel(%arg0: i32, %arg1: memref<32x64xf32, #tpu.memory_space<vmem>>, %arg2: memref<64x32xf32, #tpu.memory_space<vmem>>, %arg3: memref<32x32xf32, #tpu.memory_space<vmem>>, %arg4: memref<32x64xf32, #tpu.memory_space<vmem>>, %arg5: memref<32x64xf32, #tpu.memory_space<vmem>>) attributes {dimension_semantics = [#tpu.dimension_semantics<parallel>], iteration_bounds = array<i64: 1>, scalar_prefetch = 0 : i64, scratch_operands = 0 : i64, tpu.core_type = #tpu.core_type<tc>, window_params = [{transform_indices = @transform_0, window_bounds = array<i64: 32, 64>}, {pipeline_mode = #tpu.pipeline_mode<synchronous>, transform_indices = @transform_1, window_bounds = array<i64: 64, 32>}, {pipeline_mode = #tpu.pipeline_mode<synchronous>, transform_indices = @transform_2, window_bounds = array<i64: 32, 32>}, {pipeline_mode = #tpu.pipeline_mode<synchronous>, transform_indices = @transform_3, window_bounds = array<i64: 32, 64>}, {transform_indices = @transform_4, window_bounds = array<i64: 32, 64>}]} {
    %c0 = arith.constant 0 : index
    %c0_0 = arith.constant 0 : index
    %0 = vector.load %arg1[%c0, %c0_0] : memref<32x64xf32, #tpu.memory_space<vmem>>, vector<32x64xf32>
    %c0_1 = arith.constant 0 : index
    %c0_2 = arith.constant 0 : index
    %1 = vector.load %arg2[%c0_1, %c0_2] : memref<64x32xf32, #tpu.memory_space<vmem>>, vector<64x32xf32>
    %cst = arith.constant dense<0.000000e+00> : vector<32x32xf32>
    %2 = tpu.matmul %0, %1, %cst {dimension_numbers = #tpu.dot_dimension_numbers<[1], [0], [0], [1], [0, 0, 1, 1], [], []>} : vector<32x64xf32>, vector<64x32xf32>, vector<32x32xf32> -> vector<32x32xf32>
    %c0_3 = arith.constant 0 : index
    %c0_4 = arith.constant 0 : index
    %3 = vector.load %arg3[%c0_3, %c0_4] : memref<32x32xf32, #tpu.memory_space<vmem>>, vector<32x32xf32>
    %cst_5 = arith.constant dense<0.000000e+00> : vector<32x32xf32>
    %4 = tpu.matmul %2, %3, %cst_5 {dimension_numbers = #tpu.dot_dimension_numbers<[1], [0], [0], [1], [0, 0, 1, 1], [], []>} : vector<32x32xf32>, vector<32x32xf32>, vector<32x32xf32> -> vector<32x32xf32>
    %c0_6 = arith.constant 0 : index
    %c0_7 = arith.constant 0 : index
    %5 = vector.load %arg4[%c0_6, %c0_7] : memref<32x64xf32, #tpu.memory_space<vmem>>, vector<32x64xf32>
    %cst_8 = arith.constant dense<0.000000e+00> : vector<32x64xf32>
    %6 = tpu.matmul %4, %5, %cst_8 {dimension_numbers = #tpu.dot_dimension_numbers<[1], [0], [0], [1], [0, 0, 1, 1], [], []>} : vector<32x32xf32>, vector<32x64xf32>, vector<32x64xf32> -> vector<32x64xf32>
    %c0_9 = arith.constant 0 : index
    %c0_10 = arith.constant 0 : index
    %7 = vector.load %arg5[%c0_9, %c0_10] : memref<32x64xf32, #tpu.memory_space<vmem>>, vector<32x64xf32>
    tpu.vector_store %arg5[%c0_9, %c0_10], %6 {strides = array<i32>} : memref<32x64xf32, #tpu.memory_space<vmem>>, vector<32x64xf32>,
    return
  }
  func.func @transform_0(%arg0: i32) -> (i32, i32) {
    %c0_i32 = arith.constant 0 : i32
    %c0_i32_0 = arith.constant 0 : i32
    return %arg0, %c0_i32 : i32, i32
  }
  func.func @transform_1(%arg0: i32) -> (i32, i32) {
    %c0_i32 = arith.constant 0 : i32
    %c0_i32_0 = arith.constant 0 : i32
    %c0_i32_1 = arith.constant 0 : i32
    return %c0_i32, %c0_i32_0 : i32, i32
  }
  func.func @transform_2(%arg0: i32) -> (i32, i32) {
    %c0_i32 = arith.constant 0 : i32
    %c0_i32_0 = arith.constant 0 : i32
    %c0_i32_1 = arith.constant 0 : i32
    return %c0_i32, %c0_i32_0 : i32, i32
  }
  func.func @transform_3(%arg0: i32) -> (i32, i32) {
    %c0_i32 = arith.constant 0 : i32
    %c0_i32_0 = arith.constant 0 : i32
    %c0_i32_1 = arith.constant 0 : i32
    return %c0_i32, %c0_i32_0 : i32, i32
  }
  func.func @transform_4(%arg0: i32) -> (i32, i32) {
    %c0_i32 = arith.constant 0 : i32
    %c0_i32_0 = arith.constant 0 : i32
    return %arg0, %c0_i32 : i32, i32
  }
}

module attributes {stable_mosaic.version = 11 : i64} {
  func.func @_ff_kernel(%arg0: i32, %arg1: memref<512x4xf32, #tpu.memory_space<vmem>>, %arg2: memref<512x4xf32, #tpu.memory_space<vmem>>, %arg3: memref<4x8xf32, #tpu.memory_space<vmem>>, %arg4: memref<1x8xf32, #tpu.memory_space<vmem>>, %arg5: memref<8x4xf32, #tpu.memory_space<vmem>>, %arg6: memref<1x4xf32, #tpu.memory_space<vmem>>, %arg7: memref<1x4xf32, #tpu.memory_space<vmem>>, %arg8: memref<1x4xf32, #tpu.memory_space<vmem>>, %arg9: memref<512x4xf32, #tpu.memory_space<vmem>>) attributes {dimension_semantics = [#tpu.dimension_semantics<parallel>], iteration_bounds = array<i64: 1>, scalar_prefetch = 0 : i64, scratch_operands = 0 : i64, tpu.core_type = #tpu.core_type<tc>, window_params = [{transform_indices = @transform_0, window_bounds = array<i64: 512, 4>}, {transform_indices = @transform_1, window_bounds = array<i64: 512, 4>}, {pipeline_mode = #tpu.pipeline_mode<synchronous>, transform_indices = @transform_2, window_bounds = array<i64: 4, 8>}, {pipeline_mode = #tpu.pipeline_mode<synchronous>, transform_indices = @transform_3, window_bounds = array<i64: 1, 8>}, {pipeline_mode = #tpu.pipeline_mode<synchronous>, transform_indices = @transform_4, window_bounds = array<i64: 8, 4>}, {pipeline_mode = #tpu.pipeline_mode<synchronous>, transform_indices = @transform_5, window_bounds = array<i64: 1, 4>}, {pipeline_mode = #tpu.pipeline_mode<synchronous>, transform_indices = @transform_6, window_bounds = array<i64: 1, 4>}, {pipeline_mode = #tpu.pipeline_mode<synchronous>, transform_indices = @transform_7, window_bounds = array<i64: 1, 4>}, {transform_indices = @transform_8, window_bounds = array<i64: 512, 4>}]} {
    %c0 = arith.constant 0 : index
    %c0_0 = arith.constant 0 : index
    %0 = vector.load %arg1[%c0, %c0_0] : memref<512x4xf32, #tpu.memory_space<vmem>>, vector<512x4xf32>
    %c0_1 = arith.constant 0 : index
    %c0_2 = arith.constant 0 : index
    %1 = vector.load %arg2[%c0_1, %c0_2] : memref<512x4xf32, #tpu.memory_space<vmem>>, vector<512x4xf32>
    %2 = arith.addf %0, %1 : vector<512x4xf32>
    %c0_3 = arith.constant 0 : index
    %c0_4 = arith.constant 0 : index
    %3 = vector.load %arg3[%c0_3, %c0_4] : memref<4x8xf32, #tpu.memory_space<vmem>>, vector<4x8xf32>
    %cst = arith.constant dense<0.000000e+00> : vector<512x8xf32>
    %4 = tpu.matmul %2, %3, %cst {dimension_numbers = #tpu.dot_dimension_numbers<[1], [0], [0], [1], [0, 0, 1, 1], [], []>} : vector<512x4xf32>, vector<4x8xf32>, vector<512x8xf32> -> vector<512x8xf32>
    %c0_5 = arith.constant 0 : index
    %c0_6 = arith.constant 0 : index
    %5 = vector.load %arg4[%c0_5, %c0_6] : memref<1x8xf32, #tpu.memory_space<vmem>>, vector<1x8xf32>
    %6 = vector.broadcast %5 : vector<1x8xf32> to vector<512x8xf32>
    %7 = arith.addf %4, %6 : vector<512x8xf32>
    %cst_7 = arith.constant 0.000000e+00 : f32
    %8 = vector.broadcast %cst_7 : f32 to vector<512x8xf32>
    %9 = arith.maximumf %7, %8 : vector<512x8xf32>
    %c0_8 = arith.constant 0 : index
    %c0_9 = arith.constant 0 : index
    %10 = vector.load %arg5[%c0_8, %c0_9] : memref<8x4xf32, #tpu.memory_space<vmem>>, vector<8x4xf32>
    %cst_10 = arith.constant dense<0.000000e+00> : vector<512x4xf32>
    %11 = tpu.matmul %9, %10, %cst_10 {dimension_numbers = #tpu.dot_dimension_numbers<[1], [0], [0], [1], [0, 0, 1, 1], [], []>} : vector<512x8xf32>, vector<8x4xf32>, vector<512x4xf32> -> vector<512x4xf32>
    %c0_11 = arith.constant 0 : index
    %c0_12 = arith.constant 0 : index
    %12 = vector.load %arg6[%c0_11, %c0_12] : memref<1x4xf32, #tpu.memory_space<vmem>>, vector<1x4xf32>
    %13 = vector.broadcast %12 : vector<1x4xf32> to vector<512x4xf32>
    %14 = arith.addf %11, %13 : vector<512x4xf32>
    %cst_13 = arith.constant dense<0.000000e+00> : vector<512xf32>
    %15 = vector.multi_reduction <add>, %14, %cst_13 [1] : vector<512x4xf32> to vector<512xf32>
    %16 = vector.shape_cast %15 : vector<512xf32> to vector<512x1xf32>
    %cst_14 = arith.constant 4.000000e+00 : f32
    %17 = vector.broadcast %cst_14 : f32 to vector<512x1xf32>
    %18 = arith.divf %16, %17 : vector<512x1xf32>
    %19 = vector.broadcast %18 : vector<512x1xf32> to vector<512x4xf32>
    %20 = arith.subf %14, %19 : vector<512x4xf32>
    %21 = arith.mulf %20, %20 : vector<512x4xf32>
    %cst_15 = arith.constant dense<0.000000e+00> : vector<512xf32>
    %22 = vector.multi_reduction <add>, %21, %cst_15 [1] : vector<512x4xf32> to vector<512xf32>
    %23 = vector.shape_cast %22 : vector<512xf32> to vector<512x1xf32>
    %cst_16 = arith.constant 4.000000e+00 : f32
    %24 = vector.broadcast %cst_16 : f32 to vector<512x1xf32>
    %25 = arith.divf %23, %24 : vector<512x1xf32>
    %26 = vector.broadcast %18 : vector<512x1xf32> to vector<512x4xf32>
    %27 = arith.subf %14, %26 : vector<512x4xf32>
    %cst_17 = arith.constant 9.99999974E-6 : f32
    %28 = vector.broadcast %cst_17 : f32 to vector<512x1xf32>
    %29 = arith.addf %25, %28 : vector<512x1xf32>
    %30 = math.rsqrt %29 : vector<512x1xf32>
    %31 = vector.broadcast %30 : vector<512x1xf32> to vector<512x4xf32>
    %32 = arith.mulf %27, %31 : vector<512x4xf32>
    %c0_18 = arith.constant 0 : index
    %c0_19 = arith.constant 0 : index
    %33 = vector.load %arg7[%c0_18, %c0_19] : memref<1x4xf32, #tpu.memory_space<vmem>>, vector<1x4xf32>
    %34 = vector.broadcast %33 : vector<1x4xf32> to vector<512x4xf32>
    %35 = arith.mulf %32, %34 : vector<512x4xf32>
    %c0_20 = arith.constant 0 : index
    %c0_21 = arith.constant 0 : index
    %36 = vector.load %arg8[%c0_20, %c0_21] : memref<1x4xf32, #tpu.memory_space<vmem>>, vector<1x4xf32>
    %37 = vector.broadcast %36 : vector<1x4xf32> to vector<512x4xf32>
    %38 = arith.addf %35, %37 : vector<512x4xf32>
    %c0_22 = arith.constant 0 : index
    %c0_23 = arith.constant 0 : index
    %39 = vector.load %arg9[%c0_22, %c0_23] : memref<512x4xf32, #tpu.memory_space<vmem>>, vector<512x4xf32>
    tpu.vector_store %arg9[%c0_22, %c0_23], %38 {strides = array<i32>} : memref<512x4xf32, #tpu.memory_space<vmem>>, vector<512x4xf32>,
    return
  }
  func.func @transform_0(%arg0: i32) -> (i32, i32) {
    %c0_i32 = arith.constant 0 : i32
    %c0_i32_0 = arith.constant 0 : i32
    return %arg0, %c0_i32 : i32, i32
  }
  func.func @transform_1(%arg0: i32) -> (i32, i32) {
    %c0_i32 = arith.constant 0 : i32
    %c0_i32_0 = arith.constant 0 : i32
    return %arg0, %c0_i32 : i32, i32
  }
  func.func @transform_2(%arg0: i32) -> (i32, i32) {
    %c0_i32 = arith.constant 0 : i32
    %c0_i32_0 = arith.constant 0 : i32
    %c0_i32_1 = arith.constant 0 : i32
    return %c0_i32, %c0_i32_0 : i32, i32
  }
  func.func @transform_3(%arg0: i32) -> (i32, i32) {
    %c0_i32 = arith.constant 0 : i32
    %c0_i32_0 = arith.constant 0 : i32
    %c0_i32_1 = arith.constant 0 : i32
    return %c0_i32, %c0_i32_0 : i32, i32
  }
  func.func @transform_4(%arg0: i32) -> (i32, i32) {
    %c0_i32 = arith.constant 0 : i32
    %c0_i32_0 = arith.constant 0 : i32
    %c0_i32_1 = arith.constant 0 : i32
    return %c0_i32, %c0_i32_0 : i32, i32
  }
  func.func @transform_5(%arg0: i32) -> (i32, i32) {
    %c0_i32 = arith.constant 0 : i32
    %c0_i32_0 = arith.constant 0 : i32
    %c0_i32_1 = arith.constant 0 : i32
    return %c0_i32, %c0_i32_0 : i32, i32
  }
  func.func @transform_6(%arg0: i32) -> (i32, i32) {
    %c0_i32 = arith.constant 0 : i32
    %c0_i32_0 = arith.constant 0 : i32
    %c0_i32_1 = arith.constant 0 : i32
    return %c0_i32, %c0_i32_0 : i32, i32
  }
  func.func @transform_7(%arg0: i32) -> (i32, i32) {
    %c0_i32 = arith.constant 0 : i32
    %c0_i32_0 = arith.constant 0 : i32
    %c0_i32_1 = arith.constant 0 : i32
    return %c0_i32, %c0_i32_0 : i32, i32
  }
  func.func @transform_8(%arg0: i32) -> (i32, i32) {
    %c0_i32 = arith.constant 0 : i32
    %c0_i32_0 = arith.constant 0 : i32
    return %arg0, %c0_i32 : i32, i32
  }
}

</mosaic_0001>

<bundles_post_ra>
// kernel: neg.7
= control target key start
LH: loop header
LB: loop body
LE: loop exit
PB: predicated region body
PF: predicated region fallthrough
CT: control target
= control target key end

     0   :  { %s72_s0 = inlined_call_operand.vmem [shape: f32[4,4,4], index: 0, kind: input, shape index: {}]   ;;  %s73_s1 = inlined_call_operand.vmem [shape: f32[4,4,4], index: 1, kind: output, shape index: {}]  }
   0x1   :  { %v2_v0 = vld [vmem:[%s72_s0] sm:$0xf]  ;;  %v32_v1 = vld [vmem:[%s72_s0 + $0x4] sm:$0xf]  ;;  %v34_v2 = vld [vmem:[%s72_s0 + $0x8] sm:$0xf] }
   0x2   :  { %v5_v3 = vxor.u32 2147483648, %v2_v0  ;;  %v12_v4 = vxor.u32 2147483648, %v32_v1  ;;  %v20_v5 = vxor.u32 2147483648, %v34_v2  ;;  %v36_v6 = vld [vmem:[%s72_s0 + $0xc] sm:$0xf] }
   0x3   :  { %v28_v7 = vxor.u32 2147483648, %v36_v6 }
   0x4   :  { %7 = vst [vmem:[%s73_s1] sm:$0xf] %v5_v3  ;;  %33 = vst [vmem:[%s73_s1 + $0x4] sm:$0xf] %v12_v4 }
   0x5   :  { %35 = vst [vmem:[%s73_s1 + $0x8] sm:$0xf] %v20_v5  ;;  %37 = vst [vmem:[%s73_s1 + $0xc] sm:$0xf] %v28_v7 }

// kernel: spectral_conv2d_forward.3
= control target key start
LH: loop header
LB: loop body
LE: loop exit
PB: predicated region body
PF: predicated region fallthrough
CT: control target
= control target key end

     0   :  { %vm29_vm0 = vcmask 523264   ;;  %vm131_vm1 = vcmask 261120   ;;  %s573_s1 = inlined_call_operand.vmem [shape: f32[64,32], index: 1, kind: input, shape index: {}]   ;;  %s574_s0 = inlined_call_operand.vmem [shape: f32[32,64], index: 0, kind: input, shape index: {}]   ;;  %s575_s2 = inlined_call_operand.vmem [shape: f32[32,32], index: 2, kind: input, shape index: {}]   ;;  %s576_s3 = inlined_call_operand.vmem [shape: f32[32,64], index: 3, kind: input, shape index: {}]   ;;  %s577_s4 = inlined_call_operand.vmem [shape: f32[32,64], index: 4, kind: output, shape index: {}]  }
   0x1   :  { %v21_v0 = vld [vmem:[%s573_s1] sm:$0xff]  ;;  %v22_v1 = vld [vmem:[%s573_s1 + $0x8] sm:$0xff]  ;;  %v23_v2 = vld [vmem:[%s573_s1 + $0x10] sm:$0xff] }
   0x2   :  { %v428_v3 = vpack.c.bf16 %v22_v1, %v21_v0  ;;  %v24_v4 = vld [vmem:[%s573_s1 + $0x18] sm:$0xff]  ;;  %v25_v6 = vld [vmem:[%s573_s1 + $0x20] sm:$0xff]  ;;  %v26_v7 = vld [vmem:[%s573_s1 + $0x28] sm:$0xff] }
   0x3   :  { %v432_v5 = vpack.c.bf16 %v24_v4, %v23_v2  ;;  %v17_v8 = vld [vmem:[%s574_s0] sm:$0xff]  ;;  %v128_v10 = vld [vmem:[%s575_s2 + $0x8] sm:$0xff]  ;;  %v129_v11 = vld [vmem:[%s575_s2 + $0x10] sm:$0xff]  ;;  %v436_v12 = vpack.c.bf16 %v26_v7, %v25_v6 }
   0x4   :  { %429 = vmatprep.subr.bf16.mxu0 %v428_v3  ;;  %394 = vmatprep.mubr.msk.f32.mxu0 %vm29_vm0, %v17_v8  ;;  %v127_v9 = vld [vmem:[%s575_s2] sm:$0xff]  ;;  %v130_v14 = vld [vmem:[%s575_s2 + $0x18] sm:$0xff]  ;;  %v27_v15 = vld [vmem:[%s573_s1 + $0x30] sm:$0xff] }
   0x5   :  { %431 = vmatpush3.bf16.msra.mxu0 %v428_v3  ;;  %v444_v13 = vpack.c.bf16 %v128_v10, %v127_v9  ;;  %v28_v16 = vld [vmem:[%s573_s1 + $0x38] sm:$0xff]  ;;  %v448_v17 = vpack.c.bf16 %v130_v14, %v129_v11  ;;  %v18_v19 = vld [vmem:[%s574_s0 + $0x8] sm:$0xff]  ;;  %v19_v20 = vld [vmem:[%s574_s0 + $0x10] sm:$0xff] }
   0x6   :  { %433 = vmatprep.subr.bf16.mxu0 %v432_v5  ;;  %v440_v18 = vpack.c.bf16 %v28_v16, %v27_v15  ;;  %v20_v21 = vld [vmem:[%s574_s0 + $0x18] sm:$0xff]  ;;  %v229_v22 = vld [vmem:[%s576_s3] sm:$0xff]  ;;  %v230_v23 = vld [vmem:[%s576_s3 + $0x8] sm:$0xff] }
   0x7   :  { %445 = vmatprep.subr.bf16.mxu1 %v444_v13  ;;  %v452_v24 = vpack.c.bf16 %v230_v23, %v229_v22  ;;  %v231_v25 = vld [vmem:[%s576_s3 + $0x10] sm:$0xff]  ;;  %v232_v26 = vld [vmem:[%s576_s3 + $0x18] sm:$0xff] }
   0x8   :  { %447 = vmatpush3.bf16.msra.mxu1 %v444_v13  ;;  %v456_v29 = vpack.c.bf16 %v232_v26, %v231_v25 }
   0x9   :  { %435 = vmatpush3.bf16.msra.mxu0 %v432_v5  ;;  %449 = vmatprep.subr.bf16.mxu1 %v448_v17 }
   0xa   :  { %437 = vmatprep.subr.bf16.mxu0 %v436_v12 }
   0xc   :  { %451 = vmatpush3.bf16.msra.mxu1 %v448_v17 }
   0xd   :  { %439 = vmatpush3.bf16.msra.mxu0 %v436_v12  ;;  %453 = vmatprep.subr.bf16.mxu1 %v452_v24 }
   0xe   :  { %441 = vmatprep.subr.bf16.mxu0 %v440_v18 }
  0x11   :  { %443 = vmatpush3.bf16.msra.mxu0 %v440_v18 }
  0x14   :  { %395 = vmatmul.mubr.msk.f32.vlgmr.msra.gmra.mrb[0].mxu0 %vm29_vm0, %v18_v19 }
  0x15   :  { %397 = vmatprep.mubr.msk.f32.mxu0 %vm29_vm0, %v19_v20 }
  0x18   :  { %398 = vmatmul.mubr.msk.f32.gmra.mrb[2].mxu0 %vm29_vm0, %v20_v21 }
  0xe7   :  { %v396_v27 = vpop.f32.mrb[0].mxu0 }
  0xe8   :  { %v108_v28 = vpop.f32.mrb[1].mxu0 }
  0xe9   :  { %408 = vmatprep.mubr.msk.f32.mxu1 %vm131_vm1, %v108_v28 }
  0xea   :  { %409 = vmatmul.mubr.msk.f32.vlgmr.msra.gmra.mrb[0].mxu1 %vm131_vm1, %v396_v27 }
  0xeb   :  { %v399_v30 = vpop.f32.mrb[2].mxu0  ;;  %455 = vmatpush3.bf16.msra.mxu1 %v452_v24 }
  0xec   :  { %v118_v31 = vpop.f32.mrb[3].mxu0  ;;  %457 = vmatprep.subr.bf16.mxu1 %v456_v29 }
  0xed   :  { %411 = vmatprep.mubr.msk.f32.mxu1 %vm131_vm1, %v118_v31 }
  0xee   :  { %412 = vmatmul.mubr.msk.f32.gmra.mrb[2].mxu1 %vm131_vm1, %v399_v30 }
  0xef   :  { %459 = vmatpush3.bf16.msra.mxu1 %v456_v29 }
 0x1bd   :  { %v410_v32 = vpop.f32.mrb[0].mxu1 }
 0x1be   :  { %v210_v33 = vpop.f32.mrb[1].mxu1 }
 0x1bf   :  { %422 = vmatprep.mubr.msk.f32.mxu1 %vm131_vm1, %v210_v33 }
 0x1c0   :  { %423 = vmatmul.mubr.msk.f32.vlgmr.msra.gmra.mrb[4].mxu1 %vm131_vm1, %v410_v32 }
 0x1c1   :  { %v413_v34 = vpop.f32.mrb[2].mxu1 }
 0x1c2   :  { %v220_v35 = vpop.f32.mrb[3].mxu1 }
 0x1c3   :  { %425 = vmatprep.mubr.msk.f32.mxu1 %vm131_vm1, %v220_v35 }
 0x1c4   :  { %426 = vmatmul.mubr.msk.f32.gmra.mrb[6].mxu1 %vm131_vm1, %v413_v34 }
 0x293   :  { %v424_v36 = vpop.f32.mrb[4].mxu1 }
 0x294   :  { %331 = vst.msk [vmem:[%s577_s4 + $0x8] sm:$0xff] %vm29_vm0, %v424_v36  ;;  %v311_v37 = vpop.f32.mrb[5].mxu1 }
 0x295   :  { %330 = vst.msk [vmem:[%s577_s4] sm:$0xff] %vm29_vm0, %v311_v37 }
 0x297   :  { %v427_v38 = vpop.f32.mrb[6].mxu1 }
 0x298   :  { %333 = vst.msk [vmem:[%s577_s4 + $0x18] sm:$0xff] %vm29_vm0, %v427_v38  ;;  %v321_v39 = vpop.f32.mrb[7].mxu1 }
 0x299   :  { %332 = vst.msk [vmem:[%s577_s4 + $0x10] sm:$0xff] %vm29_vm0, %v321_v39 }

// kernel: spectral_conv2d_forward.5
= control target key start
LH: loop header
LB: loop body
LE: loop exit
PB: predicated region body
PF: predicated region fallthrough
CT: control target
= control target key end

     0   :  { %vm422_vm0 = vcmask 1043456   ;;  %vm229_vm1 = vcmask 31744   ;;  %vm883_vm2 = vcmask 64512   ;;  %s4975_s2 = inlined_call_operand.vmem [shape: f32[4,8], index: 2, kind: input, shape index: {}]   ;;  %s4976_s0 = inlined_call_operand.vmem [shape: f32[512,4], index: 0, kind: input, shape index: {}]   ;;  %s4977_s1 = inlined_call_operand.vmem [shape: f32[512,4], index: 1, kind: input, shape index: {}]   ;;  %s4978_s4 = inlined_call_operand.vmem [shape: f32[8,4], index: 4, kind: input, shape index: {}]   ;;  %s4979_s3 = inlined_call_operand.vmem [shape: f32[1,8], index: 3, kind: input, shape index: {}]   ;;  %s4980_s5 = inlined_call_operand.vmem [shape: f32[1,4], index: 5, kind: input, shape index: {}]   ;;  %s4981_s6 = inlined_call_operand.vmem [shape: f32[1,4], index: 6, kind: input, shape index: {}]   ;;  %s4982_s7 = inlined_call_operand.vmem [shape: f32[1,4], index: 7, kind: input, shape index: {}]   ;;  %s4983_s8 = inlined_call_operand.vmem [shape: f32[512,4], index: 8, kind: output, shape index: {}]  }
   0x1   :  { %v221_v0 = vld [vmem:[%s4975_s2] sm:$0xf]  ;;  %v30_v4 = vld [vmem:[%s4976_s0 + $0x8] sm:$0xff]  ;;  %v31_v6 = vld [vmem:[%s4976_s0 + $0x10] sm:$0xff] }
   0x2   :  { %v29_v1 = vld [vmem:[%s4976_s0] sm:$0xff]  ;;  %2767 = vmatprep.subr.msk.mxu0 %vm422_vm0, %v221_v0  ;;  %v94_v5 = vld [vmem:[%s4977_s1 + $0x8] sm:$0xff]  ;;  %v95_v8 = vld [vmem:[%s4977_s1 + $0x10] sm:$0xff] }
   0x3   :  { %v93_v2 = vld [vmem:[%s4977_s1] sm:$0xff]  ;;  %2768 = vmatpush3.msk.msra.mxu0 %vm422_vm0, %v221_v0  ;;  %v158_v7 = vadd.f32 %v94_v5, %v30_v4  ;;  %v32_v9 = vld [vmem:[%s4976_s0 + $0x18] sm:$0xff]  ;;  %v159_v11 = vadd.f32 %v95_v8, %v31_v6  ;;  %v34_v16 = vld [vmem:[%s4976_s0 + $0x28] sm:$0xff] }
   0x4   :  { %v157_v3 = vadd.f32 %v93_v2, %v29_v1  ;;  %v96_v10 = vld [vmem:[%s4977_s1 + $0x18] sm:$0xff]  ;;  %v33_v12 = vld [vmem:[%s4976_s0 + $0x20] sm:$0xff]  ;;  %v98_v17 = vld [vmem:[%s4977_s1 + $0x28] sm:$0xff] }
   0x5   :  { %v97_v13 = vld [vmem:[%s4977_s1 + $0x20] sm:$0xff]  ;;  %v160_v14 = vadd.f32 %v96_v10, %v32_v9  ;;  %v35_v18 = vld [vmem:[%s4976_s0 + $0x30] sm:$0xff]  ;;  %v162_v20 = vadd.f32 %v98_v17, %v34_v16  ;;  %v36_v22 = vld [vmem:[%s4976_s0 + $0x38] sm:$0xff] }
   0x6   :  { %2769 = vmatprep.mubr.msk.f32.mxu0 %vm229_vm1, %v157_v3  ;;  %v161_v15 = vadd.f32 %v97_v13, %v33_v12  ;;  %v99_v19 = vld [vmem:[%s4977_s1 + $0x30] sm:$0xff]  ;;  %v100_v23 = vld [vmem:[%s4977_s1 + $0x38] sm:$0xff]  ;;  %v37_v24 = vld [vmem:[%s4976_s0 + $0x40] sm:$0xff] }
   0x7   :  { %2770 = vmatmul.mubr.msk.f32.vlgmr.msra.gmra.mrb[0].mxu0 %vm229_vm1, %v158_v7  ;;  %v163_v21 = vadd.f32 %v99_v19, %v35_v18  ;;  %v101_v25 = vld [vmem:[%s4977_s1 + $0x40] sm:$0xff]  ;;  %v164_v26 = vadd.f32 %v100_v23, %v36_v22  ;;  %v38_v28 = vld [vmem:[%s4976_s0 + $0x48] sm:$0xff]  ;;  %v39_v30 = vld [vmem:[%s4976_s0 + $0x50] sm:$0xff] }
   0x8   :  { %2772 = vmatprep.mubr.msk.f32.mxu0 %vm229_vm1, %v159_v11  ;;  %v165_v27 = vadd.f32 %v101_v25, %v37_v24  ;;  %v102_v29 = vld [vmem:[%s4977_s1 + $0x48] sm:$0xff]  ;;  %v103_v31 = vld [vmem:[%s4977_s1 + $0x50] sm:$0xff]  ;;  %v40_v34 = vld [vmem:[%s4976_s0 + $0x58] sm:$0xff] }
   0x9   :  { %v166_v32 = vadd.f32 %v102_v29, %v38_v28  ;;  %v167_v33 = vadd.f32 %v103_v31, %v39_v30  ;;  %v104_v35 = vld [vmem:[%s4977_s1 + $0x58] sm:$0xff]  ;;  %v41_v36 = vld [vmem:[%s4976_s0 + $0x60] sm:$0xff]  ;;  %v42_v40 = vld [vmem:[%s4976_s0 + $0x68] sm:$0xff] }
   0xa   :  { %v105_v37 = vld [vmem:[%s4977_s1 + $0x60] sm:$0xff]  ;;  %v168_v38 = vadd.f32 %v104_v35, %v40_v34  ;;  %v106_v41 = vld [vmem:[%s4977_s1 + $0x68] sm:$0xff]  ;;  %v43_v42 = vld [vmem:[%s4976_s0 + $0x70] sm:$0xff] }
   0xb   :  { %2773 = vmatmul.mubr.msk.f32.gmra.mrb[2].mxu0 %vm229_vm1, %v160_v14  ;;  %v169_v39 = vadd.f32 %v105_v37, %v41_v36  ;;  %v107_v43 = vld [vmem:[%s4977_s1 + $0x70] sm:$0xff]  ;;  %v62_v44 = vld [vmem:[%s4976_s0 + $0x108] sm:$0xff]  ;;  %v44_v46 = vld [vmem:[%s4976_s0 + $0x78] sm:$0xff]  ;;  %v170_v52 = vadd.f32 %v106_v41, %v42_v40 }
   0xc   :  { %2775 = vmatprep.mubr.msk.f32.mxu0 %vm229_vm1, %v161_v15  ;;  %v126_v45 = vld [vmem:[%s4977_s1 + $0x108] sm:$0xff]  ;;  %v108_v47 = vld [vmem:[%s4977_s1 + $0x78] sm:$0xff]  ;;  %v63_v49 = vld [vmem:[%s4976_s0 + $0x110] sm:$0xff]  ;;  %v171_v59 = vadd.f32 %v107_v43, %v43_v42 }
   0xd   :  { %v3254_v48 = vadd.f32 %v126_v45, %v62_v44  ;;  %v127_v50 = vld [vmem:[%s4977_s1 + $0x110] sm:$0xff]  ;;  %v64_v51 = vld [vmem:[%s4976_s0 + $0x118] sm:$0xff]  ;;  %v45_v53 = vld [vmem:[%s4976_s0 + $0x80] sm:$0xff]  ;;  %v172_v12 = vadd.f32 %v108_v47, %v44_v46 }
   0xe   :  { %v109_v54 = vld [vmem:[%s4977_s1 + $0x80] sm:$0xff]  ;;  %v3272_v55 = vadd.f32 %v127_v50, %v63_v49  ;;  %v128_v56 = vld [vmem:[%s4977_s1 + $0x118] sm:$0xff]  ;;  %v66_v62 = vld [vmem:[%s4976_s0 + $0x128] sm:$0xff] }
   0xf   :  { %2776 = vmatmul.mubr.msk.f32.gmra.mrb[4].mxu0 %vm229_vm1, %v162_v20  ;;  %v65_v57 = vld [vmem:[%s4976_s0 + $0x120] sm:$0xff]  ;;  %v3284_v60 = vadd.f32 %v128_v56, %v64_v51  ;;  %v130_v63 = vld [vmem:[%s4977_s1 + $0x128] sm:$0xff]  ;;  %v67_v0 = vld [vmem:[%s4976_s0 + $0x130] sm:$0xff]  ;;  %v173_v19 = vadd.f32 %v109_v54, %v45_v53 }
  0x10   :  { %2778 = vmatprep.mubr.msk.f32.mxu0 %vm229_vm1, %v163_v21  ;;  %v129_v58 = vld [vmem:[%s4977_s1 + $0x120] sm:$0xff]  ;;  %v3297_v1 = vadd.f32 %v130_v63, %v66_v62  ;;  %v131_v2 = vld [vmem:[%s4977_s1 + $0x130] sm:$0xff]  ;;  %v68_v3 = vld [vmem:[%s4976_s0 + $0x138] sm:$0xff] }
  0x11   :  { %v3286_v61 = vadd.f32 %v129_v58, %v65_v57  ;;  %v132_v4 = vld [vmem:[%s4977_s1 + $0x138] sm:$0xff]  ;;  %v46_v5 = vld [vmem:[%s4976_s0 + $0x88] sm:$0xff]  ;;  %v3314_v7 = vadd.f32 %v131_v2, %v67_v0  ;;  %v69_v9 = vld [vmem:[%s4976_s0 + $0x140] sm:$0xff] }
  0x12   :  { %v110_v6 = vld [vmem:[%s4977_s1 + $0x88] sm:$0xff]  ;;  %v3316_v8 = vadd.f32 %v132_v4, %v68_v3  ;;  %v133_v10 = vld [vmem:[%s4977_s1 + $0x140] sm:$0xff]  ;;  %v47_v13 = vld [vmem:[%s4976_s0 + $0x90] sm:$0xff] }
  0x13   :  { %2779 = vmatmul.mubr.msk.f32.gmra.mrb[6].mxu0 %vm229_vm1, %v164_v26  ;;  %v70_v11 = vld [vmem:[%s4976_s0 + $0x148] sm:$0xff]  ;;  %v111_v14 = vld [vmem:[%s4977_s1 + $0x90] sm:$0xff]  ;;  %v3334_v15 = vadd.f32 %v133_v10, %v69_v9  ;;  %v72_v22 = vld [vmem:[%s4976_s0 + $0x158] sm:$0xff]  ;;  %v174_v36 = vadd.f32 %v110_v6, %v46_v5 }
  0x14   :  { %2781 = vmatprep.mubr.msk.f32.mxu0 %vm229_vm1, %v165_v27  ;;  %v134_v16 = vld [vmem:[%s4977_s1 + $0x148] sm:$0xff]  ;;  %v71_v17 = vld [vmem:[%s4976_s0 + $0x150] sm:$0xff]  ;;  %v136_v23 = vld [vmem:[%s4977_s1 + $0x158] sm:$0xff]  ;;  %v175_v43 = vadd.f32 %v111_v14, %v47_v13 }
  0x15   :  { %v135_v18 = vld [vmem:[%s4977_s1 + $0x150] sm:$0xff]  ;;  %v3346_v20 = vadd.f32 %v134_v16, %v70_v11  ;;  %v73_v24 = vld [vmem:[%s4976_s0 + $0x160] sm:$0xff]  ;;  %v3359_v25 = vadd.f32 %v136_v23, %v72_v22  ;;  %v74_v27 = vld [vmem:[%s4976_s0 + $0x168] sm:$0xff] }
  0x16   :  { %v3348_v21 = vadd.f32 %v135_v18, %v71_v17  ;;  %v137_v26 = vld [vmem:[%s4977_s1 + $0x160] sm:$0xff]  ;;  %v138_v28 = vld [vmem:[%s4977_s1 + $0x168] sm:$0xff]  ;;  %v48_v29 = vld [vmem:[%s4976_s0 + $0x98] sm:$0xff] }
  0x17   :  { %2782 = vmatmul.mubr.msk.f32.gmra.mrb[8].mxu0 %vm229_vm1, %v166_v32  ;;  %v112_v30 = vld [vmem:[%s4977_s1 + $0x98] sm:$0xff]  ;;  %v3376_v31 = vadd.f32 %v137_v26, %v73_v24  ;;  %v3378_v32 = vadd.f32 %v138_v28, %v74_v27  ;;  %v139_v34 = vld [vmem:[%s4977_s1 + $0x170] sm:$0xff]  ;;  %v49_v37 = vld [vmem:[%s4976_s0 + $0xa0] sm:$0xff] }
  0x18   :  { %2784 = vmatprep.mubr.msk.f32.mxu0 %vm229_vm1, %v167_v33  ;;  %v75_v33 = vld [vmem:[%s4976_s0 + $0x170] sm:$0xff]  ;;  %v76_v35 = vld [vmem:[%s4976_s0 + $0x178] sm:$0xff]  ;;  %v77_v41 = vld [vmem:[%s4976_s0 + $0x180] sm:$0xff]  ;;  %v176_v0 = vadd.f32 %v112_v30, %v48_v29 }
  0x19   :  { %v140_v40 = vld [vmem:[%s4977_s1 + $0x178] sm:$0xff]  ;;  %v141_v42 = vld [vmem:[%s4977_s1 + $0x180] sm:$0xff]  ;;  %v78_v46 = vld [vmem:[%s4976_s0 + $0x188] sm:$0xff] }
  0x1a   :  { %v3408_v44 = vadd.f32 %v140_v40, %v76_v35  ;;  %v3410_v45 = vadd.f32 %v141_v42, %v77_v41  ;;  %v142_v47 = vld [vmem:[%s4977_s1 + $0x188] sm:$0xff]  ;;  %v79_v49 = vld [vmem:[%s4976_s0 + $0x190] sm:$0xff]  ;;  %v144_v53 = vld [vmem:[%s4977_s1 + $0x198] sm:$0xff] }
  0x1b   :  { %2785 = vmatmul.mubr.msk.f32.gmra.mrb[10].mxu0 %vm229_vm1, %v168_v38  ;;  %v113_v38 = vld [vmem:[%s4977_s1 + $0xa0] sm:$0xff]  ;;  %v3421_v50 = vadd.f32 %v142_v47, %v78_v46  ;;  %v143_v51 = vld [vmem:[%s4977_s1 + $0x190] sm:$0xff]  ;;  %v50_v54 = vld [vmem:[%s4976_s0 + $0xa8] sm:$0xff] }
  0x1c   :  { %2787 = vmatprep.mubr.msk.f32.mxu0 %vm229_vm1, %v169_v39  ;;  %v3396_v39 = vadd.f32 %v139_v34, %v75_v33  ;;  %v114_v56 = vld [vmem:[%s4977_s1 + $0xa8] sm:$0xff]  ;;  %v3438_v57 = vadd.f32 %v143_v51, %v79_v49  ;;  %v145_v62 = vld [vmem:[%s4977_s1 + $0x1a0] sm:$0xff]  ;;  %v51_v2 = vld [vmem:[%s4976_s0 + $0xb0] sm:$0xff]  ;;  %v177_v10 = vadd.f32 %v113_v38, %v49_v37 }
  0x1d   :  { %v82_v63 = vld [vmem:[%s4976_s0 + $0x1a8] sm:$0xff]  ;;  %v115_v3 = vld [vmem:[%s4977_s1 + $0xb0] sm:$0xff]  ;;  %v84_v13 = vld [vmem:[%s4976_s0 + $0x1b8] sm:$0xff]  ;;  %v178_v33 = vadd.f32 %v114_v56, %v50_v54 }
  0x1e   :  { %v146_v5 = vld [vmem:[%s4977_s1 + $0x1a8] sm:$0xff]  ;;  %v83_v6 = vld [vmem:[%s4976_s0 + $0x1b0] sm:$0xff]  ;;  %v148_v14 = vld [vmem:[%s4977_s1 + $0x1b8] sm:$0xff]  ;;  %v179_v41 = vadd.f32 %v115_v3, %v51_v2 }
  0x1f   :  { %2788 = vmatmul.mubr.msk.f32.gmra.mrb[12].mxu0 %vm229_vm1, %v170_v52  ;;  %v80_v52 = vld [vmem:[%s4976_s0 + $0x198] sm:$0xff]  ;;  %v147_v9 = vld [vmem:[%s4977_s1 + $0x1b0] sm:$0xff]  ;;  %v3470_v11 = vadd.f32 %v146_v5, %v82_v63  ;;  %v85_v16 = vld [vmem:[%s4976_s0 + $0x1c0] sm:$0xff]  ;;  %v3483_v17 = vadd.f32 %v148_v14, %v84_v13 }
  0x20   :  { %2790 = vmatprep.mubr.msk.f32.mxu0 %vm229_vm1, %v171_v59  ;;  %v3440_v58 = vadd.f32 %v144_v53, %v80_v52  ;;  %v81_v59 = vld [vmem:[%s4976_s0 + $0x1a0] sm:$0xff]  ;;  %v150_v22 = vld [vmem:[%s4977_s1 + $0x1c8] sm:$0xff]  ;;  %v52_v23 = vld [vmem:[%s4976_s0 + $0xb8] sm:$0xff] }
  0x21   :  { %v3458_v4 = vadd.f32 %v145_v62, %v81_v59  ;;  %v149_v18 = vld [vmem:[%s4977_s1 + $0x1c0] sm:$0xff]  ;;  %v116_v24 = vld [vmem:[%s4977_s1 + $0xb8] sm:$0xff]  ;;  %v87_v28 = vld [vmem:[%s4976_s0 + $0x1d0] sm:$0xff] }
  0x22   :  { %v3500_v26 = vadd.f32 %v149_v18, %v85_v16  ;;  %v151_v29 = vld [vmem:[%s4977_s1 + $0x1d0] sm:$0xff]  ;;  %v88_v30 = vld [vmem:[%s4976_s0 + $0x1d8] sm:$0xff]  ;;  %v53_v34 = vld [vmem:[%s4976_s0 + $0xc0] sm:$0xff]  ;;  %v180_v62 = vadd.f32 %v116_v24, %v52_v23 }
  0x23   :  { %2791 = vmatmul.mubr.msk.f32.gmra.mrb[14].mxu0 %vm229_vm1, %v172_v12  ;;  %v3472_v12 = vadd.f32 %v147_v9, %v83_v6  ;;  %v117_v35 = vld [vmem:[%s4977_s1 + $0xc0] sm:$0xff]  ;;  %v152_v37 = vld [vmem:[%s4977_s1 + $0x1d8] sm:$0xff]  ;;  %v90_v46 = vld [vmem:[%s4976_s0 + $0x1e8] sm:$0xff] }
  0x24   :  { %2793 = vmatprep.mubr.msk.f32.mxu0 %vm229_vm1, %v173_v19  ;;  %v86_v19 = vld [vmem:[%s4976_s0 + $0x1c8] sm:$0xff]  ;;  %v89_v38 = vld [vmem:[%s4976_s0 + $0x1e0] sm:$0xff]  ;;  %v3532_v42 = vadd.f32 %v152_v37, %v88_v30  ;;  %v91_v49 = vld [vmem:[%s4976_s0 + $0x1f0] sm:$0xff]  ;;  %v181_v63 = vadd.f32 %v117_v35, %v53_v34 }
  0x25   :  { %v3502_v27 = vadd.f32 %v150_v22, %v86_v19  ;;  %v153_v40 = vld [vmem:[%s4977_s1 + $0x1e0] sm:$0xff]  ;;  %v154_v47 = vld [vmem:[%s4977_s1 + $0x1e8] sm:$0xff]  ;;  %v155_v52 = vld [vmem:[%s4977_s1 + $0x1f0] sm:$0xff] }
  0x26   :  { %v3545_v51 = vadd.f32 %v154_v47, %v90_v46  ;;  %v92_v53 = vld [vmem:[%s4976_s0 + $0x1f8] sm:$0xff]  ;;  %v3556_v56 = vadd.f32 %v155_v52, %v91_v49  ;;  %v118_v2 = vld [vmem:[%s4977_s1 + $0xc8] sm:$0xff]  ;;  %v55_v3 = vld [vmem:[%s4976_s0 + $0xd0] sm:$0xff] }
  0x27   :  { %2794 = vmatmul.mubr.msk.f32.gmra.mrb[16].mxu0 %vm229_vm1, %v174_v36  ;;  %v3520_v36 = vadd.f32 %v151_v29, %v87_v28  ;;  %v156_v54 = vld [vmem:[%s4977_s1 + $0x1f8] sm:$0xff]  ;;  %v119_v5 = vld [vmem:[%s4977_s1 + $0xd0] sm:$0xff]  ;;  %v57_v14 = vld [vmem:[%s4976_s0 + $0xe0] sm:$0xff] }
  0x28   :  { %2796 = vmatprep.mubr.msk.f32.mxu0 %vm229_vm1, %v175_v43  ;;  %v3534_v43 = vadd.f32 %v153_v40, %v89_v38  ;;  %v3558_v59 = vadd.f32 %v156_v54, %v92_v53  ;;  %v183_v9 = vadd.f32 %v119_v5, %v55_v3  ;;  %v120_v13 = vld [vmem:[%s4977_s1 + $0xd8] sm:$0xff]  ;;  %v121_v16 = vld [vmem:[%s4977_s1 + $0xe0] sm:$0xff]  ;;  %v58_v22 = vld [vmem:[%s4976_s0 + $0xe8] sm:$0xff] }
  0x29   :  { %v185_v19 = vadd.f32 %v121_v16, %v57_v14  ;;  %v122_v23 = vld [vmem:[%s4977_s1 + $0xe8] sm:$0xff]  ;;  %v59_v24 = vld [vmem:[%s4976_s0 + $0xf0] sm:$0xff]  ;;  %v124_v34 = vld [vmem:[%s4977_s1 + $0xf8] sm:$0xff] }
  0x2a   :  { %v123_v28 = vld [vmem:[%s4977_s1 + $0xf0] sm:$0xff]  ;;  %v186_v29 = vadd.f32 %v122_v23, %v58_v22  ;;  %v61_v35 = vld [vmem:[%s4976_s0 + $0x100] sm:$0xff] }
  0x2b   :  { %2797 = vmatmul.mubr.msk.f32.gmra.mrb[18].mxu0 %vm229_vm1, %v176_v0  ;;  %v54_v0 = vld [vmem:[%s4976_s0 + $0xc8] sm:$0xff]  ;;  %v187_v30 = vadd.f32 %v123_v28, %v59_v24  ;;  %v125_v37 = vld [vmem:[%s4977_s1 + $0x100] sm:$0xff] }
  0x2c   :  { %2799 = vmatprep.mubr.msk.f32.mxu0 %vm229_vm1, %v177_v10  ;;  %v182_v6 = vadd.f32 %v118_v2, %v54_v0  ;;  %v56_v10 = vld [vmem:[%s4976_s0 + $0xd8] sm:$0xff]  ;;  %v189_v40 = vadd.f32 %v125_v37, %v61_v35 }
  0x2d   :  { %v184_v18 = vadd.f32 %v120_v13, %v56_v10 }
  0x2f   :  { %2800 = vmatmul.mubr.msk.f32.gmra.mrb[20].mxu0 %vm229_vm1, %v178_v33  ;;  %v60_v33 = vld [vmem:[%s4976_s0 + $0xf8] sm:$0xff] }
  0x30   :  { %2802 = vmatprep.mubr.msk.f32.mxu0 %vm229_vm1, %v179_v41  ;;  %v188_v38 = vadd.f32 %v124_v34, %v60_v33 }
  0x33   :  { %2803 = vmatmul.mubr.msk.f32.gmra.mrb[22].mxu0 %vm229_vm1, %v180_v62 }
  0x34   :  { %2805 = vmatprep.mubr.msk.f32.mxu0 %vm229_vm1, %v181_v63 }
  0x37   :  { %2806 = vmatmul.mubr.msk.f32.gmra.mrb[24].mxu0 %vm229_vm1, %v182_v6 }
  0x38   :  { %2808 = vmatprep.mubr.msk.f32.mxu0 %vm229_vm1, %v183_v9 }
  0x3b   :  { %2809 = vmatmul.mubr.msk.f32.gmra.mrb[26].mxu0 %vm229_vm1, %v184_v18 }
  0x3c   :  { %2811 = vmatprep.mubr.msk.f32.mxu0 %vm229_vm1, %v185_v19 }
  0x3f   :  { %2812 = vmatmul.mubr.msk.f32.gmra.mrb[28].mxu0 %vm229_vm1, %v186_v29 }
  0x40   :  { %2814 = vmatprep.mubr.msk.f32.mxu0 %vm229_vm1, %v187_v30 }
  0x43   :  { %2815 = vmatmul.mubr.msk.f32.gmra.mrb[30].mxu0 %vm229_vm1, %v188_v38 }
  0x44   :  { %2817 = vmatprep.mubr.msk.f32.mxu0 %vm229_vm1, %v189_v40 }
  0x47   :  { %2818 = vmatmul.mubr.msk.f32.gmra.mrb[32].mxu0 %vm229_vm1, %v3254_v48  ;;  %v875_v48 = vld [vmem:[%s4978_s4] sm:$0xff] }
  0x48   :  { %2820 = vmatprep.mubr.msk.f32.mxu0 %vm229_vm1, %v3272_v55  ;;  %2865 = vmatprep.subr.mxu1 %v875_v48  ;;  %v3688_v55 = vld [vmem:[%s4979_s3] ss:$0 sm:$0xff] }
  0x49   :  { %2866 = vmatpush3.msra.mxu1 %v875_v48 }
  0x4b   :  { %2821 = vmatmul.mubr.msk.f32.gmra.mrb[34].mxu0 %vm229_vm1, %v3284_v60 }
  0x4c   :  { %2823 = vmatprep.mubr.msk.f32.mxu0 %vm229_vm1, %v3286_v61 }
  0x4f   :  { %2824 = vmatmul.mubr.msk.f32.gmra.mrb[36].mxu0 %vm229_vm1, %v3297_v1 }
  0x50   :  { %2826 = vmatprep.mubr.msk.f32.mxu0 %vm229_vm1, %v3314_v7 }
  0x53   :  { %2827 = vmatmul.mubr.msk.f32.gmra.mrb[38].mxu0 %vm229_vm1, %v3316_v8 }
  0x54   :  { %2829 = vmatprep.mubr.msk.f32.mxu0 %vm229_vm1, %v3334_v15 }
  0x57   :  { %2830 = vmatmul.mubr.msk.f32.gmra.mrb[40].mxu0 %vm229_vm1, %v3346_v20 }
  0x58   :  { %2832 = vmatprep.mubr.msk.f32.mxu0 %vm229_vm1, %v3348_v21 }
  0x5b   :  { %2833 = vmatmul.mubr.msk.f32.gmra.mrb[42].mxu0 %vm229_vm1, %v3359_v25 }
  0x5c   :  { %2835 = vmatprep.mubr.msk.f32.mxu0 %vm229_vm1, %v3376_v31 }
  0x5f   :  { %2836 = vmatmul.mubr.msk.f32.gmra.mrb[44].mxu0 %vm229_vm1, %v3378_v32 }
  0x60   :  { %2838 = vmatprep.mubr.msk.f32.mxu0 %vm229_vm1, %v3396_v39 }
  0x63   :  { %2839 = vmatmul.mubr.msk.f32.gmra.mrb[46].mxu0 %vm229_vm1, %v3408_v44 }
  0x64   :  { %2841 = vmatprep.mubr.msk.f32.mxu0 %vm229_vm1, %v3410_v45 }
  0x67   :  { %2842 = vmatmul.mubr.msk.f32.gmra.mrb[48].mxu0 %vm229_vm1, %v3421_v50 }
  0x68   :  { %2844 = vmatprep.mubr.msk.f32.mxu0 %vm229_vm1, %v3438_v57 }
  0x6b   :  { %2845 = vmatmul.mubr.msk.f32.gmra.mrb[50].mxu0 %vm229_vm1, %v3440_v58 }
  0x6c   :  { %2847 = vmatprep.mubr.msk.f32.mxu0 %vm229_vm1, %v3458_v4 }
  0x6f   :  { %2848 = vmatmul.mubr.msk.f32.gmra.mrb[52].mxu0 %vm229_vm1, %v3470_v11 }
  0x70   :  { %2850 = vmatprep.mubr.msk.f32.mxu0 %vm229_vm1, %v3472_v12 }
  0x73   :  { %2851 = vmatmul.mubr.msk.f32.gmra.mrb[54].mxu0 %vm229_vm1, %v3483_v17 }
  0x74   :  { %2853 = vmatprep.mubr.msk.f32.mxu0 %vm229_vm1, %v3500_v26 }
  0x77   :  { %2854 = vmatmul.mubr.msk.f32.gmra.mrb[56].mxu0 %vm229_vm1, %v3502_v27 }
  0x78   :  { %2856 = vmatprep.mubr.msk.f32.mxu0 %vm229_vm1, %v3520_v36 }
  0x7b   :  { %2857 = vmatmul.mubr.msk.f32.gmra.mrb[58].mxu0 %vm229_vm1, %v3532_v42 }
  0x7c   :  { %2859 = vmatprep.mubr.msk.f32.mxu0 %vm229_vm1, %v3534_v43 }
  0x7f   :  { %2860 = vmatmul.mubr.msk.f32.gmra.mrb[60].mxu0 %vm229_vm1, %v3545_v51 }
  0x80   :  { %2862 = vmatprep.mubr.msk.f32.mxu0 %vm229_vm1, %v3556_v56 }
  0x83   :  { %2863 = vmatmul.mubr.msk.f32.gmra.mrb[62].mxu0 %vm229_vm1, %v3558_v59 }
  0xda   :  { %v2771_v60 = vpop.f32.mrb[0].mxu0 }
  0xdb   :  { %v498_v61 = vadd.f32 %v2771_v60, %v3688_v55  ;;  %v492_v1 = vpop.f32.mrb[1].mxu0 }
  0xdc   :  { %v493_v7 = vadd.f32 %v3688_v55, %v492_v1 }
  0xdd   :  { %v812_v20 = vmax.f32 %v498_v61, 0.0 }
  0xde   :  { %v811_v8 = vmax.f32 %v493_v7, 0.0  ;;  %v2774_v15 = vpop.f32.mrb[2].mxu0 }
  0xdf   :  { %v508_v21 = vadd.f32 %v2774_v15, %v3688_v55  ;;  %v502_v25 = vpop.f32.mrb[3].mxu0 }
  0xe0   :  { %v503_v31 = vadd.f32 %v3688_v55, %v502_v25  ;;  %2867 = vmatprep.mubr.msk.f32.mxu1 %vm883_vm2, %v811_v8 }
  0xe1   :  { %2868 = vmatmul.mubr.msk.f32.vlgmr.msra.gmra.mrb[0].mxu1 %vm883_vm2, %v812_v20  ;;  %v814_v44 = vmax.f32 %v508_v21, 0.0 }
  0xe2   :  { %v813_v32 = vmax.f32 %v503_v31, 0.0  ;;  %v2777_v39 = vpop.f32.mrb[4].mxu0 }
  0xe3   :  { %v518_v45 = vadd.f32 %v2777_v39, %v3688_v55  ;;  %v512_v50 = vpop.f32.mrb[5].mxu0 }
  0xe4   :  { %v513_v57 = vadd.f32 %v3688_v55, %v512_v50  ;;  %2870 = vmatprep.mubr.msk.f32.mxu1 %vm883_vm2, %v813_v32 }
  0xe5   :  { %v816_v58 = vmax.f32 %v518_v45, 0.0  ;;  %2871 = vmatmul.mubr.msk.f32.gmra.mrb[2].mxu1 %vm883_vm2, %v814_v44 }
  0xe6   :  { %v815_v4 = vmax.f32 %v513_v57, 0.0  ;;  %v2780_v11 = vpop.f32.mrb[6].mxu0 }
  0xe7   :  { %v528_v12 = vadd.f32 %v2780_v11, %v3688_v55  ;;  %v522_v17 = vpop.f32.mrb[7].mxu0 }
  0xe8   :  { %v523_v26 = vadd.f32 %v3688_v55, %v522_v17  ;;  %2873 = vmatprep.mubr.msk.f32.mxu1 %vm883_vm2, %v815_v4 }
  0xe9   :  { %v818_v27 = vmax.f32 %v528_v12, 0.0  ;;  %2874 = vmatmul.mubr.msk.f32.gmra.mrb[4].mxu1 %vm883_vm2, %v816_v58 }
  0xea   :  { %v817_v36 = vmax.f32 %v523_v26, 0.0  ;;  %v2783_v41 = vpop.f32.mrb[8].mxu0 }
  0xeb   :  { %v538_v42 = vadd.f32 %v2783_v41, %v3688_v55  ;;  %v532_v43 = vpop.f32.mrb[9].mxu0 }
  0xec   :  { %v533_v46 = vadd.f32 %v3688_v55, %v532_v43  ;;  %2876 = vmatprep.mubr.msk.f32.mxu1 %vm883_vm2, %v817_v36 }
  0xed   :  { %v820_v47 = vmax.f32 %v538_v42, 0.0  ;;  %2877 = vmatmul.mubr.msk.f32.gmra.mrb[6].mxu1 %vm883_vm2, %v818_v27 }
  0xee   :  { %v819_v49 = vmax.f32 %v533_v46, 0.0  ;;  %v2786_v51 = vpop.f32.mrb[10].mxu0 }
  0xef   :  { %v548_v52 = vadd.f32 %v2786_v51, %v3688_v55  ;;  %v542_v53 = vpop.f32.mrb[11].mxu0 }
  0xf0   :  { %v543_v54 = vadd.f32 %v3688_v55, %v542_v53  ;;  %2879 = vmatprep.mubr.msk.f32.mxu1 %vm883_vm2, %v819_v49 }
  0xf1   :  { %v822_v56 = vmax.f32 %v548_v52, 0.0  ;;  %2880 = vmatmul.mubr.msk.f32.gmra.mrb[8].mxu1 %vm883_vm2, %v820_v47 }
  0xf2   :  { %v821_v59 = vmax.f32 %v543_v54, 0.0  ;;  %v2789_v62 = vpop.f32.mrb[12].mxu0 }
  0xf3   :  { %v558_v63 = vadd.f32 %v2789_v62, %v3688_v55  ;;  %v552_v0 = vpop.f32.mrb[13].mxu0 }
  0xf4   :  { %v553_v2 = vadd.f32 %v3688_v55, %v552_v0  ;;  %2882 = vmatprep.mubr.msk.f32.mxu1 %vm883_vm2, %v821_v59 }
  0xf5   :  { %v824_v3 = vmax.f32 %v558_v63, 0.0  ;;  %2883 = vmatmul.mubr.msk.f32.gmra.mrb[10].mxu1 %vm883_vm2, %v822_v56 }
  0xf6   :  { %v823_v5 = vmax.f32 %v553_v2, 0.0  ;;  %v2792_v6 = vpop.f32.mrb[14].mxu0 }
  0xf7   :  { %v568_v9 = vadd.f32 %v2792_v6, %v3688_v55  ;;  %v562_v10 = vpop.f32.mrb[15].mxu0 }
  0xf8   :  { %v563_v13 = vadd.f32 %v3688_v55, %v562_v10  ;;  %2885 = vmatprep.mubr.msk.f32.mxu1 %vm883_vm2, %v823_v5 }
  0xf9   :  { %v826_v14 = vmax.f32 %v568_v9, 0.0  ;;  %2886 = vmatmul.mubr.msk.f32.gmra.mrb[12].mxu1 %vm883_vm2, %v824_v3 }
  0xfa   :  { %v825_v16 = vmax.f32 %v563_v13, 0.0  ;;  %v2795_v18 = vpop.f32.mrb[16].mxu0 }
  0xfb   :  { %v578_v19 = vadd.f32 %v2795_v18, %v3688_v55  ;;  %v572_v22 = vpop.f32.mrb[17].mxu0 }
  0xfc   :  { %v573_v23 = vadd.f32 %v3688_v55, %v572_v22  ;;  %2888 = vmatprep.mubr.msk.f32.mxu1 %vm883_vm2, %v825_v16 }
  0xfd   :  { %v828_v24 = vmax.f32 %v578_v19, 0.0  ;;  %2889 = vmatmul.mubr.msk.f32.gmra.mrb[14].mxu1 %vm883_vm2, %v826_v14 }
  0xfe   :  { %v827_v28 = vmax.f32 %v573_v23, 0.0  ;;  %v2798_v29 = vpop.f32.mrb[18].mxu0 }
  0xff   :  { %v588_v30 = vadd.f32 %v2798_v29, %v3688_v55  ;;  %v582_v33 = vpop.f32.mrb[19].mxu0 }
 0x100   :  { %v583_v34 = vadd.f32 %v3688_v55, %v582_v33  ;;  %2891 = vmatprep.mubr.msk.f32.mxu1 %vm883_vm2, %v827_v28 }
 0x101   :  { %v830_v35 = vmax.f32 %v588_v30, 0.0  ;;  %2892 = vmatmul.mubr.msk.f32.gmra.mrb[16].mxu1 %vm883_vm2, %v828_v24 }
 0x102   :  { %v829_v37 = vmax.f32 %v583_v34, 0.0  ;;  %v2801_v38 = vpop.f32.mrb[20].mxu0 }
 0x103   :  { %v598_v40 = vadd.f32 %v2801_v38, %v3688_v55  ;;  %v592_v48 = vpop.f32.mrb[21].mxu0 }
 0x104   :  { %v593_v60 = vadd.f32 %v3688_v55, %v592_v48  ;;  %2894 = vmatprep.mubr.msk.f32.mxu1 %vm883_vm2, %v829_v37 }
 0x105   :  { %v832_v61 = vmax.f32 %v598_v40, 0.0  ;;  %2895 = vmatmul.mubr.msk.f32.gmra.mrb[18].mxu1 %vm883_vm2, %v830_v35 }
 0x106   :  { %v831_v1 = vmax.f32 %v593_v60, 0.0  ;;  %v2804_v7 = vpop.f32.mrb[22].mxu0 }
 0x107   :  { %v608_v8 = vadd.f32 %v2804_v7, %v3688_v55  ;;  %v602_v15 = vpop.f32.mrb[23].mxu0 }
 0x108   :  { %v603_v20 = vadd.f32 %v3688_v55, %v602_v15  ;;  %2897 = vmatprep.mubr.msk.f32.mxu1 %vm883_vm2, %v831_v1 }
 0x109   :  { %v834_v21 = vmax.f32 %v608_v8, 0.0  ;;  %2898 = vmatmul.mubr.msk.f32.gmra.mrb[20].mxu1 %vm883_vm2, %v832_v61 }
 0x10a   :  { %v833_v25 = vmax.f32 %v603_v20, 0.0  ;;  %v2807_v31 = vpop.f32.mrb[24].mxu0 }
 0x10b   :  { %v618_v32 = vadd.f32 %v2807_v31, %v3688_v55  ;;  %v612_v39 = vpop.f32.mrb[25].mxu0 }
 0x10c   :  { %v613_v44 = vadd.f32 %v3688_v55, %v612_v39  ;;  %2900 = vmatprep.mubr.msk.f32.mxu1 %vm883_vm2, %v833_v25 }
 0x10d   :  { %v836_v45 = vmax.f32 %v618_v32, 0.0  ;;  %2901 = vmatmul.mubr.msk.f32.gmra.mrb[22].mxu1 %vm883_vm2, %v834_v21 }
 0x10e   :  { %v835_v50 = vmax.f32 %v613_v44, 0.0  ;;  %v2810_v57 = vpop.f32.mrb[26].mxu0 }
 0x10f   :  { %v628_v58 = vadd.f32 %v2810_v57, %v3688_v55  ;;  %v622_v4 = vpop.f32.mrb[27].mxu0 }
 0x110   :  { %v623_v11 = vadd.f32 %v3688_v55, %v622_v4  ;;  %2903 = vmatprep.mubr.msk.f32.mxu1 %vm883_vm2, %v835_v50 }
 0x111   :  { %v838_v12 = vmax.f32 %v628_v58, 0.0  ;;  %2904 = vmatmul.mubr.msk.f32.gmra.mrb[24].mxu1 %vm883_vm2, %v836_v45 }
 0x112   :  { %v837_v17 = vmax.f32 %v623_v11, 0.0  ;;  %v2813_v26 = vpop.f32.mrb[28].mxu0 }
 0x113   :  { %v638_v27 = vadd.f32 %v2813_v26, %v3688_v55  ;;  %v632_v36 = vpop.f32.mrb[29].mxu0 }
 0x114   :  { %v633_v41 = vadd.f32 %v3688_v55, %v632_v36  ;;  %2906 = vmatprep.mubr.msk.f32.mxu1 %vm883_vm2, %v837_v17 }
 0x115   :  { %v840_v42 = vmax.f32 %v638_v27, 0.0  ;;  %2907 = vmatmul.mubr.msk.f32.gmra.mrb[26].mxu1 %vm883_vm2, %v838_v12 }
 0x116   :  { %v839_v43 = vmax.f32 %v633_v41, 0.0  ;;  %v2816_v46 = vpop.f32.mrb[30].mxu0 }
 0x117   :  { %v648_v47 = vadd.f32 %v2816_v46, %v3688_v55  ;;  %v642_v49 = vpop.f32.mrb[31].mxu0 }
 0x118   :  { %v643_v51 = vadd.f32 %v3688_v55, %v642_v49  ;;  %2909 = vmatprep.mubr.msk.f32.mxu1 %vm883_vm2, %v839_v43 }
 0x119   :  { %v842_v52 = vmax.f32 %v648_v47, 0.0  ;;  %2910 = vmatmul.mubr.msk.f32.gmra.mrb[28].mxu1 %vm883_vm2, %v840_v42 }
 0x11a   :  { %v841_v53 = vmax.f32 %v643_v51, 0.0  ;;  %v2819_v54 = vpop.f32.mrb[32].mxu0 }
 0x11b   :  { %v658_v56 = vadd.f32 %v2819_v54, %v3688_v55  ;;  %v652_v59 = vpop.f32.mrb[33].mxu0 }
 0x11c   :  { %v653_v62 = vadd.f32 %v3688_v55, %v652_v59  ;;  %2912 = vmatprep.mubr.msk.f32.mxu1 %vm883_vm2, %v841_v53 }
 0x11d   :  { %v844_v63 = vmax.f32 %v658_v56, 0.0  ;;  %2913 = vmatmul.mubr.msk.f32.gmra.mrb[30].mxu1 %vm883_vm2, %v842_v52 }
 0x11e   :  { %v843_v0 = vmax.f32 %v653_v62, 0.0  ;;  %v2822_v2 = vpop.f32.mrb[34].mxu0 }
 0x11f   :  { %v668_v3 = vadd.f32 %v2822_v2, %v3688_v55  ;;  %v662_v5 = vpop.f32.mrb[35].mxu0 }
 0x120   :  { %v663_v6 = vadd.f32 %v3688_v55, %v662_v5  ;;  %2915 = vmatprep.mubr.msk.f32.mxu1 %vm883_vm2, %v843_v0 }
 0x121   :  { %v846_v9 = vmax.f32 %v668_v3, 0.0  ;;  %2916 = vmatmul.mubr.msk.f32.gmra.mrb[32].mxu1 %vm883_vm2, %v844_v63 }
 0x122   :  { %v845_v10 = vmax.f32 %v663_v6, 0.0  ;;  %v2825_v13 = vpop.f32.mrb[36].mxu0 }
 0x123   :  { %v678_v14 = vadd.f32 %v2825_v13, %v3688_v55  ;;  %v672_v16 = vpop.f32.mrb[37].mxu0 }
 0x124   :  { %v673_v18 = vadd.f32 %v3688_v55, %v672_v16  ;;  %2918 = vmatprep.mubr.msk.f32.mxu1 %vm883_vm2, %v845_v10 }
 0x125   :  { %v848_v19 = vmax.f32 %v678_v14, 0.0  ;;  %2919 = vmatmul.mubr.msk.f32.gmra.mrb[34].mxu1 %vm883_vm2, %v846_v9 }
 0x126   :  { %v847_v22 = vmax.f32 %v673_v18, 0.0  ;;  %v2828_v23 = vpop.f32.mrb[38].mxu0 }
 0x127   :  { %v688_v24 = vadd.f32 %v2828_v23, %v3688_v55  ;;  %v682_v28 = vpop.f32.mrb[39].mxu0 }
 0x128   :  { %v683_v29 = vadd.f32 %v3688_v55, %v682_v28  ;;  %2921 = vmatprep.mubr.msk.f32.mxu1 %vm883_vm2, %v847_v22 }
 0x129   :  { %v850_v30 = vmax.f32 %v688_v24, 0.0  ;;  %2922 = vmatmul.mubr.msk.f32.gmra.mrb[36].mxu1 %vm883_vm2, %v848_v19 }
 0x12a   :  { %v849_v33 = vmax.f32 %v683_v29, 0.0  ;;  %v2831_v34 = vpop.f32.mrb[40].mxu0 }
 0x12b   :  { %v698_v35 = vadd.f32 %v2831_v34, %v3688_v55  ;;  %v692_v37 = vpop.f32.mrb[41].mxu0 }
 0x12c   :  { %v693_v38 = vadd.f32 %v3688_v55, %v692_v37  ;;  %2924 = vmatprep.mubr.msk.f32.mxu1 %vm883_vm2, %v849_v33 }
 0x12d   :  { %v852_v40 = vmax.f32 %v698_v35, 0.0  ;;  %2925 = vmatmul.mubr.msk.f32.gmra.mrb[38].mxu1 %vm883_vm2, %v850_v30 }
 0x12e   :  { %v851_v48 = vmax.f32 %v693_v38, 0.0  ;;  %v2834_v60 = vpop.f32.mrb[42].mxu0 }
 0x12f   :  { %v708_v61 = vadd.f32 %v2834_v60, %v3688_v55  ;;  %v702_v1 = vpop.f32.mrb[43].mxu0 }
 0x130   :  { %v703_v7 = vadd.f32 %v3688_v55, %v702_v1  ;;  %2927 = vmatprep.mubr.msk.f32.mxu1 %vm883_vm2, %v851_v48 }
 0x131   :  { %v854_v8 = vmax.f32 %v708_v61, 0.0  ;;  %2928 = vmatmul.mubr.msk.f32.gmra.mrb[40].mxu1 %vm883_vm2, %v852_v40 }
 0x132   :  { %v853_v15 = vmax.f32 %v703_v7, 0.0  ;;  %v2837_v20 = vpop.f32.mrb[44].mxu0  ;;  %v3821_v7 = vld [vmem:[%s4980_s5] ss:$0 sm:$0xff] }
 0x133   :  { %v718_v21 = vadd.f32 %v2837_v20, %v3688_v55  ;;  %v712_v25 = vpop.f32.mrb[45].mxu0 }
 0x134   :  { %v713_v31 = vadd.f32 %v3688_v55, %v712_v25  ;;  %2930 = vmatprep.mubr.msk.f32.mxu1 %vm883_vm2, %v853_v15 }
 0x135   :  { %v856_v32 = vmax.f32 %v718_v21, 0.0  ;;  %2931 = vmatmul.mubr.msk.f32.gmra.mrb[42].mxu1 %vm883_vm2, %v854_v8 }
 0x136   :  { %v855_v39 = vmax.f32 %v713_v31, 0.0  ;;  %v2840_v44 = vpop.f32.mrb[46].mxu0 }
 0x137   :  { %v728_v45 = vadd.f32 %v2840_v44, %v3688_v55  ;;  %v722_v50 = vpop.f32.mrb[47].mxu0 }
 0x138   :  { %v723_v57 = vadd.f32 %v3688_v55, %v722_v50  ;;  %2933 = vmatprep.mubr.msk.f32.mxu1 %vm883_vm2, %v855_v39 }
 0x139   :  { %v858_v58 = vmax.f32 %v728_v45, 0.0  ;;  %2934 = vmatmul.mubr.msk.f32.gmra.mrb[44].mxu1 %vm883_vm2, %v856_v32 }
 0x13a   :  { %v857_v4 = vmax.f32 %v723_v57, 0.0  ;;  %v2843_v11 = vpop.f32.mrb[48].mxu0 }
 0x13b   :  { %v738_v12 = vadd.f32 %v2843_v11, %v3688_v55  ;;  %v732_v17 = vpop.f32.mrb[49].mxu0 }
 0x13c   :  { %v733_v26 = vadd.f32 %v3688_v55, %v732_v17  ;;  %2936 = vmatprep.mubr.msk.f32.mxu1 %vm883_vm2, %v857_v4 }
 0x13d   :  { %v860_v27 = vmax.f32 %v738_v12, 0.0  ;;  %2937 = vmatmul.mubr.msk.f32.gmra.mrb[46].mxu1 %vm883_vm2, %v858_v58 }
 0x13e   :  { %v859_v36 = vmax.f32 %v733_v26, 0.0  ;;  %v2846_v41 = vpop.f32.mrb[50].mxu0 }
 0x13f   :  { %v748_v42 = vadd.f32 %v2846_v41, %v3688_v55  ;;  %v742_v43 = vpop.f32.mrb[51].mxu0 }
 0x140   :  { %v743_v46 = vadd.f32 %v3688_v55, %v742_v43  ;;  %2939 = vmatprep.mubr.msk.f32.mxu1 %vm883_vm2, %v859_v36 }
 0x141   :  { %v862_v47 = vmax.f32 %v748_v42, 0.0  ;;  %2940 = vmatmul.mubr.msk.f32.gmra.mrb[48].mxu1 %vm883_vm2, %v860_v27 }
 0x142   :  { %v861_v49 = vmax.f32 %v743_v46, 0.0  ;;  %v2849_v51 = vpop.f32.mrb[52].mxu0 }
 0x143   :  { %v758_v52 = vadd.f32 %v2849_v51, %v3688_v55  ;;  %v752_v53 = vpop.f32.mrb[53].mxu0 }
 0x144   :  { %v753_v54 = vadd.f32 %v3688_v55, %v752_v53  ;;  %2942 = vmatprep.mubr.msk.f32.mxu1 %vm883_vm2, %v861_v49 }
 0x145   :  { %v864_v56 = vmax.f32 %v758_v52, 0.0  ;;  %2943 = vmatmul.mubr.msk.f32.gmra.mrb[50].mxu1 %vm883_vm2, %v862_v47 }
 0x146   :  { %v863_v59 = vmax.f32 %v753_v54, 0.0  ;;  %v2852_v62 = vpop.f32.mrb[54].mxu0 }
 0x147   :  { %v768_v63 = vadd.f32 %v2852_v62, %v3688_v55  ;;  %v762_v0 = vpop.f32.mrb[55].mxu0 }
 0x148   :  { %v763_v2 = vadd.f32 %v3688_v55, %v762_v0  ;;  %2945 = vmatprep.mubr.msk.f32.mxu1 %vm883_vm2, %v863_v59 }
 0x149   :  { %v866_v3 = vmax.f32 %v768_v63, 0.0  ;;  %2946 = vmatmul.mubr.msk.f32.gmra.mrb[52].mxu1 %vm883_vm2, %v864_v56 }
 0x14a   :  { %v865_v5 = vmax.f32 %v763_v2, 0.0  ;;  %v2855_v6 = vpop.f32.mrb[56].mxu0 }
 0x14b   :  { %v778_v9 = vadd.f32 %v2855_v6, %v3688_v55  ;;  %v772_v10 = vpop.f32.mrb[57].mxu0 }
 0x14c   :  { %v773_v13 = vadd.f32 %v3688_v55, %v772_v10  ;;  %2948 = vmatprep.mubr.msk.f32.mxu1 %vm883_vm2, %v865_v5 }
 0x14d   :  { %v868_v14 = vmax.f32 %v778_v9, 0.0  ;;  %2949 = vmatmul.mubr.msk.f32.gmra.mrb[54].mxu1 %vm883_vm2, %v866_v3 }
 0x14e   :  { %v867_v16 = vmax.f32 %v773_v13, 0.0  ;;  %v2858_v18 = vpop.f32.mrb[58].mxu0 }
 0x14f   :  { %v788_v19 = vadd.f32 %v2858_v18, %v3688_v55  ;;  %v782_v22 = vpop.f32.mrb[59].mxu0 }
 0x150   :  { %v783_v23 = vadd.f32 %v3688_v55, %v782_v22  ;;  %2951 = vmatprep.mubr.msk.f32.mxu1 %vm883_vm2, %v867_v16 }
 0x151   :  { %v870_v24 = vmax.f32 %v788_v19, 0.0  ;;  %2952 = vmatmul.mubr.msk.f32.gmra.mrb[56].mxu1 %vm883_vm2, %v868_v14 }
 0x152   :  { %v869_v28 = vmax.f32 %v783_v23, 0.0  ;;  %v2861_v29 = vpop.f32.mrb[60].mxu0 }
 0x153   :  { %v798_v30 = vadd.f32 %v2861_v29, %v3688_v55  ;;  %v792_v33 = vpop.f32.mrb[61].mxu0 }
 0x154   :  { %v793_v34 = vadd.f32 %v3688_v55, %v792_v33  ;;  %2954 = vmatprep.mubr.msk.f32.mxu1 %vm883_vm2, %v869_v28 }
 0x155   :  { %v872_v35 = vmax.f32 %v798_v30, 0.0  ;;  %2955 = vmatmul.mubr.msk.f32.gmra.mrb[58].mxu1 %vm883_vm2, %v870_v24 }
 0x156   :  { %v871_v37 = vmax.f32 %v793_v34, 0.0  ;;  %v2864_v38 = vpop.f32.mrb[62].mxu0 }
 0x157   :  { %v808_v40 = vadd.f32 %v2864_v38, %v3688_v55  ;;  %v802_v48 = vpop.f32.mrb[63].mxu0 }
 0x158   :  { %v803_v60 = vadd.f32 %v3688_v55, %v802_v48  ;;  %2957 = vmatprep.mubr.msk.f32.mxu1 %vm883_vm2, %v871_v37 }
 0x159   :  { %v874_v61 = vmax.f32 %v808_v40, 0.0  ;;  %2958 = vmatmul.mubr.msk.f32.gmra.mrb[60].mxu1 %vm883_vm2, %v872_v35 }
 0x15a   :  { %v873_v1 = vmax.f32 %v803_v60, 0.0 }
 0x15c   :  { %2960 = vmatprep.mubr.msk.f32.mxu1 %vm883_vm2, %v873_v1 }
 0x15d   :  { %2961 = vmatmul.mubr.msk.f32.gmra.mrb[62].mxu1 %vm883_vm2, %v874_v61 }
 0x1b4   :  { %v2869_v8 = vpop.f32.mrb[0].mxu1 }
 0x1b5   :  { %v3824_v15 = vadd.f32 %v2869_v8, %v3821_v7  ;;  %v1142_v55 = vpop.f32.mrb[1].mxu1 }
 0x1b6   :  { %v3827_v20 = vadd.f32 %v3821_v7, %v1142_v55 }
 0x1b7   :  { %v1464_v21 = vsel %vm229_vm1, %v3824_v15, 0.0 }
 0x1b8   :  { %1465 = vadd.xlane.f32.xlu0 %v1464_v21  ;;  %v2872_v25 = vpop.f32.mrb[2].mxu1  ;;  %v1461_v45 = vsel %vm229_vm1, %v3827_v20, 0.0 }
 0x1b9   :  { %v3832_v31 = vadd.f32 %v2872_v25, %v3821_v7  ;;  %v1152_v32 = vpop.f32.mrb[3].mxu1 }
 0x1ba   :  { %v3835_v39 = vadd.f32 %v3821_v7, %v1152_v32 }
 0x1bb   :  { %v1470_v44 = vsel %vm229_vm1, %v3832_v31, 0.0 }
 0x1bc   :  { %1471 = vadd.xlane.f32.xlu1 %v1470_v44  ;;  %v2875_v50 = vpop.f32.mrb[4].mxu1  ;;  %1462 = vadd.xlane.f32.xlu0 %v1461_v45  ;;  %v1467_v11 = vsel %vm229_vm1, %v3835_v39, 0.0 }
 0x1bd   :  { %v1162_v57 = vpop.f32.mrb[5].mxu1  ;;  %v3845_v4 = vadd.f32 %v2875_v50, %v3821_v7 }
 0x1be   :  { %v3842_v58 = vadd.f32 %v3821_v7, %v1162_v57 }
 0x1bf   :  { %v1476_v41 = vsel %vm229_vm1, %v3845_v4, 0.0 }
 0x1c0   :  { %v2878_v12 = vpop.f32.mrb[6].mxu1  ;;  %1468 = vadd.xlane.f32.xlu1 %v1467_v11  ;;  %v1473_v17 = vsel %vm229_vm1, %v3842_v58, 0.0 }
 0x1c1   :  { %v1172_v26 = vpop.f32.mrb[7].mxu1  ;;  %1474 = vadd.xlane.f32.xlu0 %v1473_v17  ;;  %v3855_v36 = vadd.f32 %v2878_v12, %v3821_v7 }
 0x1c2   :  { %v3852_v27 = vadd.f32 %v3821_v7, %v1172_v26 }
 0x1c3   :  { %v1482_v51 = vsel %vm229_vm1, %v3855_v36, 0.0 }
 0x1c4   :  { %v2881_v42 = vpop.f32.mrb[8].mxu1  ;;  %1477 = vadd.xlane.f32.xlu1 %v1476_v41  ;;  %v1479_v43 = vsel %vm229_vm1, %v3852_v27, 0.0 }
 0x1c5   :  { %v1182_v46 = vpop.f32.mrb[9].mxu1  ;;  %1480 = vadd.xlane.f32.xlu0 %v1479_v43  ;;  %v3865_v49 = vadd.f32 %v2881_v42, %v3821_v7 }
 0x1c6   :  { %v3862_v47 = vadd.f32 %v3821_v7, %v1182_v46 }
 0x1c7   :  { %v1488_v62 = vsel %vm229_vm1, %v3865_v49, 0.0 }
 0x1c8   :  { %v2884_v52 = vpop.f32.mrb[10].mxu1  ;;  %1483 = vadd.xlane.f32.xlu1 %v1482_v51  ;;  %v1485_v53 = vsel %vm229_vm1, %v3862_v47, 0.0 }
 0x1c9   :  { %v1192_v54 = vpop.f32.mrb[11].mxu1  ;;  %1486 = vadd.xlane.f32.xlu0 %v1485_v53  ;;  %v3875_v59 = vadd.f32 %v2884_v52, %v3821_v7 }
 0x1ca   :  { %v3872_v56 = vadd.f32 %v3821_v7, %v1192_v54 }
 0x1cb   :  { %v1494_v6 = vsel %vm229_vm1, %v3875_v59, 0.0 }
 0x1cc   :  { %v2887_v63 = vpop.f32.mrb[12].mxu1  ;;  %1489 = vadd.xlane.f32.xlu1 %v1488_v62  ;;  %v1491_v0 = vsel %vm229_vm1, %v3872_v56, 0.0 }
 0x1cd   :  { %v1202_v2 = vpop.f32.mrb[13].mxu1  ;;  %1492 = vadd.xlane.f32.xlu0 %v1491_v0  ;;  %v3885_v5 = vadd.f32 %v2887_v63, %v3821_v7 }
 0x1ce   :  { %v3882_v3 = vadd.f32 %v3821_v7, %v1202_v2 }
 0x1cf   :  { %v1500_v18 = vsel %vm229_vm1, %v3885_v5, 0.0 }
 0x1d0   :  { %v2890_v9 = vpop.f32.mrb[14].mxu1  ;;  %1495 = vadd.xlane.f32.xlu1 %v1494_v6  ;;  %v1497_v10 = vsel %vm229_vm1, %v3882_v3, 0.0 }
 0x1d1   :  { %v1212_v13 = vpop.f32.mrb[15].mxu1  ;;  %1498 = vadd.xlane.f32.xlu0 %v1497_v10  ;;  %v3895_v16 = vadd.f32 %v2890_v9, %v3821_v7 }
 0x1d2   :  { %v3892_v14 = vadd.f32 %v3821_v7, %v1212_v13 }
 0x1d3   :  { %v1506_v29 = vsel %vm229_vm1, %v3895_v16, 0.0 }
 0x1d4   :  { %v2893_v19 = vpop.f32.mrb[16].mxu1  ;;  %1501 = vadd.xlane.f32.xlu1 %v1500_v18  ;;  %v1503_v22 = vsel %vm229_vm1, %v3892_v14, 0.0 }
 0x1d5   :  { %v1222_v23 = vpop.f32.mrb[17].mxu1  ;;  %1504 = vadd.xlane.f32.xlu0 %v1503_v22  ;;  %v3905_v28 = vadd.f32 %v2893_v19, %v3821_v7 }
 0x1d6   :  { %v3902_v24 = vadd.f32 %v3821_v7, %v1222_v23 }
 0x1d7   :  { %v1512_v38 = vsel %vm229_vm1, %v3905_v28, 0.0 }
 0x1d8   :  { %v2896_v30 = vpop.f32.mrb[18].mxu1  ;;  %1507 = vadd.xlane.f32.xlu1 %v1506_v29  ;;  %v1509_v33 = vsel %vm229_vm1, %v3902_v24, 0.0 }
 0x1d9   :  { %v1232_v34 = vpop.f32.mrb[19].mxu1  ;;  %1510 = vadd.xlane.f32.xlu0 %v1509_v33  ;;  %v3915_v37 = vadd.f32 %v2896_v30, %v3821_v7 }
 0x1da   :  { %v3912_v35 = vadd.f32 %v3821_v7, %v1232_v34 }
 0x1db   :  { %v1518_v8 = vsel %vm229_vm1, %v3915_v37, 0.0 }
 0x1dc   :  { %v2899_v40 = vpop.f32.mrb[20].mxu1  ;;  %1513 = vadd.xlane.f32.xlu1 %v1512_v38  ;;  %v1515_v48 = vsel %vm229_vm1, %v3912_v35, 0.0 }
 0x1dd   :  { %v1242_v60 = vpop.f32.mrb[21].mxu1  ;;  %1516 = vadd.xlane.f32.xlu0 %v1515_v48  ;;  %v3925_v1 = vadd.f32 %v2899_v40, %v3821_v7 }
 0x1de   :  { %v3922_v61 = vadd.f32 %v3821_v7, %v1242_v60 }
 0x1df   :  { %v1524_v45 = vsel %vm229_vm1, %v3925_v1, 0.0 }
 0x1e0   :  { %v2902_v55 = vpop.f32.mrb[22].mxu1  ;;  %1519 = vadd.xlane.f32.xlu1 %v1518_v8  ;;  %v1521_v21 = vsel %vm229_vm1, %v3922_v61, 0.0 }
 0x1e1   :  { %v1252_v25 = vpop.f32.mrb[23].mxu1  ;;  %1522 = vadd.xlane.f32.xlu0 %v1521_v21  ;;  %v3935_v44 = vadd.f32 %v2902_v55, %v3821_v7 }
 0x1e2   :  { %v3932_v32 = vadd.f32 %v3821_v7, %v1252_v25 }
 0x1e3   :  { %v1530_v26 = vsel %vm229_vm1, %v3935_v44, 0.0 }
 0x1e4   :  { %v2905_v50 = vpop.f32.mrb[24].mxu1  ;;  %1525 = vadd.xlane.f32.xlu1 %v1524_v45  ;;  %v1527_v57 = vsel %vm229_vm1, %v3932_v32, 0.0 }
 0x1e5   :  { %v1262_v11 = vpop.f32.mrb[25].mxu1  ;;  %1528 = vadd.xlane.f32.xlu0 %v1527_v57  ;;  %v3945_v17 = vadd.f32 %v2905_v50, %v3821_v7 }
 0x1e6   :  { %v3942_v12 = vadd.f32 %v3821_v7, %v1262_v11 }
 0x1e7   :  { %v1536_v52 = vsel %vm229_vm1, %v3945_v17, 0.0 }
 0x1e8   :  { %v2908_v41 = vpop.f32.mrb[26].mxu1  ;;  %1531 = vadd.xlane.f32.xlu1 %v1530_v26  ;;  %v1533_v42 = vsel %vm229_vm1, %v3942_v12, 0.0 }
 0x1e9   :  { %v1272_v43 = vpop.f32.mrb[27].mxu1  ;;  %1534 = vadd.xlane.f32.xlu0 %v1533_v42  ;;  %v3955_v51 = vadd.f32 %v2908_v41, %v3821_v7 }
 0x1ea   :  { %v3952_v46 = vadd.f32 %v3821_v7, %v1272_v43 }
 0x1eb   :  { %v1542_v2 = vsel %vm229_vm1, %v3955_v51, 0.0 }
 0x1ec   :  { %v2911_v53 = vpop.f32.mrb[28].mxu1  ;;  %1537 = vadd.xlane.f32.xlu1 %v1536_v52  ;;  %v1539_v54 = vsel %vm229_vm1, %v3952_v46, 0.0 }
 0x1ed   :  { %v1282_v62 = vpop.f32.mrb[29].mxu1  ;;  %1540 = vadd.xlane.f32.xlu0 %v1539_v54  ;;  %v3965_v0 = vadd.f32 %v2911_v53, %v3821_v7 }
 0x1ee   :  { %v3962_v63 = vadd.f32 %v3821_v7, %v1282_v62 }
 0x1ef   :  { %v1548_v19 = vsel %vm229_vm1, %v3965_v0, 0.0 }
 0x1f0   :  { %v2914_v6 = vpop.f32.mrb[30].mxu1  ;;  %1543 = vadd.xlane.f32.xlu1 %v1542_v2  ;;  %v1545_v9 = vsel %vm229_vm1, %v3962_v63, 0.0 }
 0x1f1   :  { %v1292_v10 = vpop.f32.mrb[31].mxu1  ;;  %1546 = vadd.xlane.f32.xlu0 %v1545_v9  ;;  %v3975_v18 = vadd.f32 %v2914_v6, %v3821_v7 }
 0x1f2   :  { %v3972_v13 = vadd.f32 %v3821_v7, %v1292_v10 }
 0x1f3   :  { %v1554_v34 = vsel %vm229_vm1, %v3975_v18, 0.0 }
 0x1f4   :  { %v2917_v22 = vpop.f32.mrb[32].mxu1  ;;  %1549 = vadd.xlane.f32.xlu1 %v1548_v19  ;;  %v1551_v23 = vsel %vm229_vm1, %v3972_v13, 0.0 }
 0x1f5   :  { %v1302_v29 = vpop.f32.mrb[33].mxu1  ;;  %1552 = vadd.xlane.f32.xlu0 %v1551_v23  ;;  %v3985_v33 = vadd.f32 %v2917_v22, %v3821_v7 }
 0x1f6   :  { %v3982_v30 = vadd.f32 %v3821_v7, %v1302_v29 }
 0x1f7   :  { %v1560_v55 = vsel %vm229_vm1, %v3985_v33, 0.0 }
 0x1f8   :  { %v2920_v38 = vpop.f32.mrb[34].mxu1  ;;  %1555 = vadd.xlane.f32.xlu1 %v1554_v34  ;;  %v1557_v40 = vsel %vm229_vm1, %v3982_v30, 0.0 }
 0x1f9   :  { %v1312_v48 = vpop.f32.mrb[35].mxu1  ;;  %1558 = vadd.xlane.f32.xlu0 %v1557_v40  ;;  %v3995_v8 = vadd.f32 %v2920_v38, %v3821_v7 }
 0x1fa   :  { %v3992_v60 = vadd.f32 %v3821_v7, %v1312_v48 }
 0x1fb   :  { %v1566_v11 = vsel %vm229_vm1, %v3995_v8, 0.0 }
 0x1fc   :  { %v2923_v21 = vpop.f32.mrb[36].mxu1  ;;  %1561 = vadd.xlane.f32.xlu1 %v1560_v55  ;;  %v1563_v25 = vsel %vm229_vm1, %v3992_v60, 0.0 }
 0x1fd   :  { %v1322_v45 = vpop.f32.mrb[37].mxu1  ;;  %1564 = vadd.xlane.f32.xlu0 %v1563_v25  ;;  %v4005_v57 = vadd.f32 %v2923_v21, %v3821_v7 }
 0x1fe   :  { %v4002_v50 = vadd.f32 %v3821_v7, %v1322_v45 }
 0x1ff   :  { %v1572_v53 = vsel %vm229_vm1, %v4005_v57, 0.0 }
 0x200   :  { %v2926_v26 = vpop.f32.mrb[38].mxu1  ;;  %1567 = vadd.xlane.f32.xlu1 %v1566_v11  ;;  %v1569_v41 = vsel %vm229_vm1, %v4002_v50, 0.0 }
 0x201   :  { %v1332_v42 = vpop.f32.mrb[39].mxu1  ;;  %1570 = vadd.xlane.f32.xlu0 %v1569_v41  ;;  %v4015_v52 = vadd.f32 %v2926_v26, %v3821_v7 }
 0x202   :  { %v4012_v43 = vadd.f32 %v3821_v7, %v1332_v42 }
 0x203   :  { %v1578_v10 = vsel %vm229_vm1, %v4015_v52, 0.0 }
 0x204   :  { %v2929_v54 = vpop.f32.mrb[40].mxu1  ;;  %1573 = vadd.xlane.f32.xlu1 %v1572_v53  ;;  %v1575_v62 = vsel %vm229_vm1, %v4012_v43, 0.0 }
 0x205   :  { %v1342_v2 = vpop.f32.mrb[41].mxu1  ;;  %1576 = vadd.xlane.f32.xlu0 %v1575_v62  ;;  %v4025_v9 = vadd.f32 %v2929_v54, %v3821_v7 }
 0x206   :  { %v4022_v6 = vadd.f32 %v3821_v7, %v1342_v2 }
 0x207   :  { %v1584_v38 = vsel %vm229_vm1, %v4025_v9, 0.0 }
 0x208   :  { %v2932_v19 = vpop.f32.mrb[42].mxu1  ;;  %1579 = vadd.xlane.f32.xlu1 %v1578_v10  ;;  %v1581_v22 = vsel %vm229_vm1, %v4022_v6, 0.0 }
 0x209   :  { %v1352_v23 = vpop.f32.mrb[43].mxu1  ;;  %1582 = vadd.xlane.f32.xlu0 %v1581_v22  ;;  %v4035_v34 = vadd.f32 %v2932_v19, %v3821_v7 }
 0x20a   :  { %v4032_v29 = vadd.f32 %v3821_v7, %v1352_v23 }
 0x20b   :  { %v1590_v45 = vsel %vm229_vm1, %v4035_v34, 0.0 }
 0x20c   :  { %v2935_v40 = vpop.f32.mrb[44].mxu1  ;;  %1585 = vadd.xlane.f32.xlu1 %v1584_v38  ;;  %v1587_v48 = vsel %vm229_vm1, %v4032_v29, 0.0 }
 0x20d   :  { %v1362_v55 = vpop.f32.mrb[45].mxu1  ;;  %1588 = vadd.xlane.f32.xlu0 %v1587_v48  ;;  %v4045_v25 = vadd.f32 %v2935_v40, %v3821_v7 }
 0x20e   :  { %v4042_v21 = vadd.f32 %v3821_v7, %v1362_v55 }
 0x20f   :  { %v1596_v54 = vsel %vm229_vm1, %v4045_v25, 0.0 }
 0x210   :  { %v2938_v11 = vpop.f32.mrb[46].mxu1  ;;  %1591 = vadd.xlane.f32.xlu1 %v1590_v45  ;;  %v1593_v26 = vsel %vm229_vm1, %v4042_v21, 0.0 }
 0x211   :  { %v1372_v41 = vpop.f32.mrb[47].mxu1  ;;  %1594 = vadd.xlane.f32.xlu0 %v1593_v26  ;;  %v4055_v53 = vadd.f32 %v2938_v11, %v3821_v7 }
 0x212   :  { %v4052_v42 = vadd.f32 %v3821_v7, %v1372_v41 }
 0x213   :  { %v1602_v23 = vsel %vm229_vm1, %v4055_v53, 0.0 }
 0x214   :  { %v2941_v62 = vpop.f32.mrb[48].mxu1  ;;  %1597 = vadd.xlane.f32.xlu1 %v1596_v54  ;;  %v1599_v2 = vsel %vm229_vm1, %v4052_v42, 0.0 }
 0x215   :  { %v1382_v10 = vpop.f32.mrb[49].mxu1  ;;  %1600 = vadd.xlane.f32.xlu0 %v1599_v2  ;;  %v4065_v22 = vadd.f32 %v2941_v62, %v3821_v7 }
 0x216   :  { %v4062_v19 = vadd.f32 %v3821_v7, %v1382_v10 }
 0x217   :  { %v1608_v11 = vsel %vm229_vm1, %v4065_v22, 0.0 }
 0x218   :  { %v2944_v38 = vpop.f32.mrb[50].mxu1  ;;  %1603 = vadd.xlane.f32.xlu1 %v1602_v23  ;;  %v1605_v40 = vsel %vm229_vm1, %v4062_v19, 0.0 }
 0x219   :  { %v1392_v48 = vpop.f32.mrb[51].mxu1  ;;  %1606 = vadd.xlane.f32.xlu0 %v1605_v40  ;;  %v4075_v45 = vadd.f32 %v2944_v38, %v3821_v7 }
 0x21a   :  { %v4072_v55 = vadd.f32 %v3821_v7, %v1392_v48 }
 0x21b   :  { %5017 = vst [vmem:[#allocation2_spill] sm:$0xff] %v4075_v45  ;;  %v1614_v10 = vsel %vm229_vm1, %v4075_v45, 0.0 }
 0x21c   :  { %v2947_v26 = vpop.f32.mrb[52].mxu1  ;;  %1609 = vadd.xlane.f32.xlu1 %v1608_v11  ;;  %v1611_v41 = vsel %vm229_vm1, %v4072_v55, 0.0 }
 0x21d   :  { %v1402_v54 = vpop.f32.mrb[53].mxu1  ;;  %1612 = vadd.xlane.f32.xlu0 %v1611_v41  ;;  %v4085_v2 = vadd.f32 %v2947_v26, %v3821_v7 }
 0x21e   :  { %v4082_v62 = vadd.f32 %v3821_v7, %v1402_v54 }
 0x21f   :  { %5019 = vst [vmem:[#allocation4_spill] sm:$0xff] %v4085_v2  ;;  %v1620_v26 = vsel %vm229_vm1, %v4085_v2, 0.0 }
 0x220   :  { %5018 = vst [vmem:[#allocation3_spill] sm:$0xff] %v4082_v62  ;;  %v2950_v23 = vpop.f32.mrb[54].mxu1  ;;  %1615 = vadd.xlane.f32.xlu1 %v1614_v10  ;;  %v1617_v38 = vsel %vm229_vm1, %v4082_v62, 0.0 }
 0x221   :  { %v1412_v40 = vpop.f32.mrb[55].mxu1  ;;  %1618 = vadd.xlane.f32.xlu0 %v1617_v38  ;;  %v4095_v11 = vadd.f32 %v2950_v23, %v3821_v7 }
 0x222   :  { %v4092_v48 = vadd.f32 %v3821_v7, %v1412_v40 }
 0x223   :  { %5021 = vst [vmem:[#allocation6_spill] sm:$0xff] %v4095_v11  ;;  %v1626_v23 = vsel %vm229_vm1, %v4095_v11, 0.0 }
 0x224   :  { %5020 = vst [vmem:[#allocation5_spill] sm:$0xff] %v4092_v48  ;;  %v2953_v41 = vpop.f32.mrb[56].mxu1  ;;  %1621 = vadd.xlane.f32.xlu1 %v1620_v26  ;;  %v1623_v54 = vsel %vm229_vm1, %v4092_v48, 0.0 }
 0x225   :  { %v1422_v10 = vpop.f32.mrb[57].mxu1  ;;  %1624 = vadd.xlane.f32.xlu0 %v1623_v54  ;;  %v4105_v38 = vadd.f32 %v2953_v41, %v3821_v7 }
 0x226   :  { %v4102_v62 = vadd.f32 %v3821_v7, %v1422_v10 }
 0x227   :  { %5023 = vst [vmem:[#allocation8_spill] sm:$0xff] %v4105_v38  ;;  %v1632_v41 = vsel %vm229_vm1, %v4105_v38, 0.0 }
 0x228   :  { %5022 = vst [vmem:[#allocation7_spill] sm:$0xff] %v4102_v62  ;;  %v2956_v40 = vpop.f32.mrb[58].mxu1  ;;  %1627 = vadd.xlane.f32.xlu1 %v1626_v23  ;;  %v1629_v2 = vsel %vm229_vm1, %v4102_v62, 0.0 }
 0x229   :  { %v1432_v26 = vpop.f32.mrb[59].mxu1  ;;  %1630 = vadd.xlane.f32.xlu0 %v1629_v2  ;;  %v4115_v54 = vadd.f32 %v2956_v40, %v3821_v7 }
 0x22a   :  { %v4112_v48 = vadd.f32 %v3821_v7, %v1432_v26 }
 0x22b   :  { %5025 = vst [vmem:[#allocation10_spill] sm:$0xff] %v4115_v54  ;;  %v1638_v40 = vsel %vm229_vm1, %v4115_v54, 0.0 }
 0x22c   :  { %5024 = vst [vmem:[#allocation9_spill] sm:$0xff] %v4112_v48  ;;  %v2959_v10 = vpop.f32.mrb[60].mxu1  ;;  %1633 = vadd.xlane.f32.xlu1 %v1632_v41  ;;  %v1635_v11 = vsel %vm229_vm1, %v4112_v48, 0.0 }
 0x22d   :  { %v1442_v23 = vpop.f32.mrb[61].mxu1  ;;  %1636 = vadd.xlane.f32.xlu0 %v1635_v11  ;;  %v4125_v2 = vadd.f32 %v2959_v10, %v3821_v7 }
 0x22e   :  { %v4122_v62 = vadd.f32 %v3821_v7, %v1442_v23 }
 0x22f   :  { %5027 = vst [vmem:[#allocation12_spill] sm:$0xff] %v4125_v2  ;;  %v1644_v10 = vsel %vm229_vm1, %v4125_v2, 0.0 }
 0x230   :  { %5026 = vst [vmem:[#allocation11_spill] sm:$0xff] %v4122_v62  ;;  %v2962_v26 = vpop.f32.mrb[62].mxu1  ;;  %1639 = vadd.xlane.f32.xlu1 %v1638_v40  ;;  %v1641_v38 = vsel %vm229_vm1, %v4122_v62, 0.0 }
 0x231   :  { %v1452_v41 = vpop.f32.mrb[63].mxu1  ;;  %1642 = vadd.xlane.f32.xlu0 %v1641_v38  ;;  %v4135_v11 = vadd.f32 %v2962_v26, %v3821_v7 }
 0x232   :  { %v4132_v48 = vadd.f32 %v3821_v7, %v1452_v41 }
 0x233   :  { %5028 = vst [vmem:[#allocation13_spill] sm:$0xff] %v4135_v11  ;;  %v1650_v40 = vsel %vm229_vm1, %v4135_v11, 0.0 }
 0x234   :  { %1645 = vadd.xlane.f32.xlu1 %v1644_v10  ;;  %v1647_v23 = vsel %vm229_vm1, %v4132_v48, 0.0 }
 0x235   :  { %1648 = vadd.xlane.f32.xlu0 %v1647_v23 }
 0x238   :  { %1651 = vadd.xlane.f32.xlu1 %v1650_v40 }
 0x245   :  { %v1466_v62 = vpop.xlane.xlu0 %1465 }
 0x246   :  { %v1655_v38 = vmul.f32 0.25, %v1466_v62 }
 0x248   :  { %v4144_v41 = vsub.f32 %v3824_v15, %v1655_v38 }
 0x249   :  { %v1472_v54 = vpop.xlane.xlu1 %1471  ;;  %v1463_v7 = vpop.xlane.xlu0 %1462 }
 0x24a   :  { %5029 = vst [vmem:[#allocation14_spill] sm:$0xff] %v4144_v41  ;;  %v1657_v26 = vmul.f32 0.25, %v1472_v54  ;;  %v1654_v45 = vmul.f32 0.25, %v1463_v7  ;;  %v1783_v10 = vmul.f32 %v4144_v41, %v4144_v41 }
 0x24c   :  { %v4149_v2 = vsub.f32 %v3832_v31, %v1657_v26  ;;  %v4152_v23 = vsub.f32 %v3827_v20, %v1654_v45  ;;  %v1849_v40 = vsel %vm229_vm1, %v1783_v10, 0.0 }
 0x24d   :  { %1850 = vadd.xlane.f32.xlu1 %v1849_v40  ;;  %v1469_v62 = vpop.xlane.xlu1 %1468 }
 0x24e   :  { %5030 = vst [vmem:[#allocation15_spill] sm:$0xff] %v4152_v23  ;;  %v1656_v11 = vmul.f32 0.25, %v1469_v62  ;;  %v1475_v15 = vpop.xlane.xlu0 %1474  ;;  %v1785_v38 = vmul.f32 %v4149_v2, %v4149_v2  ;;  %v1782_v54 = vmul.f32 %v4152_v23, %v4152_v23 }
 0x24f   :  { %v1658_v7 = vmul.f32 0.25, %v1475_v15 }
 0x250   :  { %v4160_v41 = vsub.f32 %v3835_v39, %v1656_v11  ;;  %v1855_v31 = vsel %vm229_vm1, %v1785_v38, 0.0  ;;  %v1846_v20 = vsel %vm229_vm1, %v1782_v54, 0.0 }
 0x251   :  { %v4165_v45 = vsub.f32 %v3842_v58, %v1658_v7  ;;  %1856 = vadd.xlane.f32.xlu1 %v1855_v31  ;;  %v1478_v26 = vpop.xlane.xlu1 %1477  ;;  %1847 = vadd.xlane.f32.xlu0 %v1846_v20 }
 0x252   :  { %v1659_v10 = vmul.f32 0.25, %v1478_v26  ;;  %v1481_v40 = vpop.xlane.xlu0 %1480  ;;  %v1784_v62 = vmul.f32 %v4160_v41, %v4160_v41 }
 0x253   :  { %v1660_v23 = vmul.f32 0.25, %v1481_v40  ;;  %v1786_v11 = vmul.f32 %v4165_v45, %v4165_v45 }
 0x254   :  { %v4170_v15 = vsub.f32 %v3845_v4, %v1659_v10  ;;  %v1852_v39 = vsel %vm229_vm1, %v1784_v62, 0.0 }
 0x255   :  { %v4176_v58 = vsub.f32 %v3852_v27, %v1660_v23  ;;  %v1484_v38 = vpop.xlane.xlu1 %1483  ;;  %1853 = vadd.xlane.f32.xlu0 %v1852_v39  ;;  %v1858_v10 = vsel %vm229_vm1, %v1786_v11, 0.0 }
 0x256   :  { %v1661_v54 = vmul.f32 0.25, %v1484_v38  ;;  %v1487_v7 = vpop.xlane.xlu0 %1486  ;;  %v1787_v31 = vmul.f32 %v4170_v15, %v4170_v15 }
 0x257   :  { %v1662_v20 = vmul.f32 0.25, %v1487_v7  ;;  %v1788_v40 = vmul.f32 %v4176_v58, %v4176_v58 }
 0x258   :  { %v4181_v26 = vsub.f32 %v3855_v36, %v1661_v54  ;;  %v1861_v4 = vsel %vm229_vm1, %v1787_v31, 0.0 }
 0x259   :  { %v4188_v27 = vsub.f32 %v3862_v47, %v1662_v20  ;;  %1862 = vadd.xlane.f32.xlu1 %v1861_v4  ;;  %v1490_v23 = vpop.xlane.xlu1 %1489  ;;  %1859 = vadd.xlane.f32.xlu0 %v1858_v10  ;;  %v1864_v7 = vsel %vm229_vm1, %v1788_v40, 0.0 }
 0x25a   :  { %v1663_v62 = vmul.f32 0.25, %v1490_v23  ;;  %v1493_v39 = vpop.xlane.xlu0 %1492  ;;  %v1789_v38 = vmul.f32 %v4181_v26, %v4181_v26 }
 0x25b   :  { %v1664_v36 = vmul.f32 0.25, %v1493_v39  ;;  %v1790_v47 = vmul.f32 %v4188_v27, %v4188_v27 }
 0x25c   :  { %v4193_v54 = vsub.f32 %v3865_v49, %v1663_v62  ;;  %v1867_v11 = vsel %vm229_vm1, %v1789_v38, 0.0 }
 0x25d   :  { %v4200_v31 = vsub.f32 %v3872_v56, %v1664_v36  ;;  %1868 = vadd.xlane.f32.xlu1 %v1867_v11  ;;  %v1496_v20 = vpop.xlane.xlu1 %1495  ;;  %1865 = vadd.xlane.f32.xlu0 %v1864_v7  ;;  %v1870_v39 = vsel %vm229_vm1, %v1790_v47, 0.0 }
 0x25e   :  { %v1665_v4 = vmul.f32 0.25, %v1496_v20  ;;  %v1499_v10 = vpop.xlane.xlu0 %1498  ;;  %v1791_v23 = vmul.f32 %v4193_v54, %v4193_v54 }
 0x25f   :  { %v1666_v49 = vmul.f32 0.25, %v1499_v10  ;;  %v1792_v56 = vmul.f32 %v4200_v31, %v4200_v31 }
 0x260   :  { %v4205_v62 = vsub.f32 %v3875_v59, %v1665_v4  ;;  %v1873_v40 = vsel %vm229_vm1, %v1791_v23, 0.0 }
 0x261   :  { %v4212_v38 = vsub.f32 %v3882_v3, %v1666_v49  ;;  %1874 = vadd.xlane.f32.xlu1 %v1873_v40  ;;  %v1502_v36 = vpop.xlane.xlu1 %1501  ;;  %1871 = vadd.xlane.f32.xlu0 %v1870_v39  ;;  %v1876_v10 = vsel %vm229_vm1, %v1792_v56, 0.0 }
 0x262   :  { %v1667_v11 = vmul.f32 0.25, %v1502_v36  ;;  %v1505_v7 = vpop.xlane.xlu0 %1504  ;;  %v1793_v20 = vmul.f32 %v4205_v62, %v4205_v62 }
 0x263   :  { %v1668_v59 = vmul.f32 0.25, %v1505_v7  ;;  %v1794_v3 = vmul.f32 %v4212_v38, %v4212_v38 }
 0x264   :  { %v4217_v4 = vsub.f32 %v3885_v5, %v1667_v11  ;;  %v1879_v47 = vsel %vm229_vm1, %v1793_v20, 0.0 }
 0x265   :  { %v4224_v23 = vsub.f32 %v3892_v14, %v1668_v59  ;;  %1880 = vadd.xlane.f32.xlu1 %v1879_v47  ;;  %v1508_v49 = vpop.xlane.xlu1 %1507  ;;  %1877 = vadd.xlane.f32.xlu0 %v1876_v10  ;;  %v1882_v7 = vsel %vm229_vm1, %v1794_v3, 0.0 }
 0x266   :  { %v1669_v40 = vmul.f32 0.25, %v1508_v49  ;;  %v1511_v39 = vpop.xlane.xlu0 %1510  ;;  %v1795_v36 = vmul.f32 %v4217_v4, %v4217_v4 }
 0x267   :  { %v1670_v5 = vmul.f32 0.25, %v1511_v39  ;;  %v1796_v14 = vmul.f32 %v4224_v23, %v4224_v23 }
 0x268   :  { %v4229_v11 = vsub.f32 %v3895_v16, %v1669_v40  ;;  %v1885_v56 = vsel %vm229_vm1, %v1795_v36, 0.0 }
 0x269   :  { %v4236_v20 = vsub.f32 %v3902_v24, %v1670_v5  ;;  %1886 = vadd.xlane.f32.xlu1 %v1885_v56  ;;  %v1514_v59 = vpop.xlane.xlu1 %1513  ;;  %1883 = vadd.xlane.f32.xlu0 %v1882_v7  ;;  %v1888_v39 = vsel %vm229_vm1, %v1796_v14, 0.0 }
 0x26a   :  { %v1671_v47 = vmul.f32 0.25, %v1514_v59  ;;  %v1517_v10 = vpop.xlane.xlu0 %1516  ;;  %v1797_v49 = vmul.f32 %v4229_v11, %v4229_v11 }
 0x26b   :  { %v1672_v16 = vmul.f32 0.25, %v1517_v10  ;;  %v1798_v24 = vmul.f32 %v4236_v20, %v4236_v20 }
 0x26c   :  { %v4241_v40 = vsub.f32 %v3905_v28, %v1671_v47  ;;  %v1891_v3 = vsel %vm229_vm1, %v1797_v49, 0.0 }
 0x26d   :  { %v4248_v36 = vsub.f32 %v3912_v35, %v1672_v16  ;;  %1892 = vadd.xlane.f32.xlu1 %v1891_v3  ;;  %v1520_v5 = vpop.xlane.xlu1 %1519  ;;  %1889 = vadd.xlane.f32.xlu0 %v1888_v39  ;;  %v1894_v10 = vsel %vm229_vm1, %v1798_v24, 0.0 }
 0x26e   :  { %v1673_v56 = vmul.f32 0.25, %v1520_v5  ;;  %v1523_v7 = vpop.xlane.xlu0 %1522  ;;  %v1799_v59 = vmul.f32 %v4241_v40, %v4241_v40 }
 0x26f   :  { %v1674_v28 = vmul.f32 0.25, %v1523_v7  ;;  %v1800_v35 = vmul.f32 %v4248_v36, %v4248_v36 }
 0x270   :  { %v4253_v47 = vsub.f32 %v3915_v37, %v1673_v56  ;;  %v1897_v14 = vsel %vm229_vm1, %v1799_v59, 0.0 }
 0x271   :  { %v4260_v49 = vsub.f32 %v3922_v61, %v1674_v28  ;;  %1898 = vadd.xlane.f32.xlu1 %v1897_v14  ;;  %v1526_v16 = vpop.xlane.xlu1 %1525  ;;  %1895 = vadd.xlane.f32.xlu0 %v1894_v10  ;;  %v1900_v7 = vsel %vm229_vm1, %v1800_v35, 0.0 }
 0x272   :  { %v1675_v3 = vmul.f32 0.25, %v1526_v16  ;;  %v1529_v39 = vpop.xlane.xlu0 %1528  ;;  %v1801_v5 = vmul.f32 %v4253_v47, %v4253_v47 }
 0x273   :  { %v1676_v37 = vmul.f32 0.25, %v1529_v39  ;;  %v1802_v61 = vmul.f32 %v4260_v49, %v4260_v49 }
 0x274   :  { %v4265_v56 = vsub.f32 %v3925_v1, %v1675_v3  ;;  %v1903_v24 = vsel %vm229_vm1, %v1801_v5, 0.0 }
 0x275   :  { %v4272_v59 = vsub.f32 %v3932_v32, %v1676_v37  ;;  %1904 = vadd.xlane.f32.xlu1 %v1903_v24  ;;  %v1532_v28 = vpop.xlane.xlu1 %1531  ;;  %1901 = vadd.xlane.f32.xlu0 %v1900_v7  ;;  %v1906_v39 = vsel %vm229_vm1, %v1802_v61, 0.0 }
 0x276   :  { %v1677_v14 = vmul.f32 0.25, %v1532_v28  ;;  %v1535_v10 = vpop.xlane.xlu0 %1534  ;;  %v1803_v16 = vmul.f32 %v4265_v56, %v4265_v56 }
 0x277   :  { %v1678_v1 = vmul.f32 0.25, %v1535_v10  ;;  %v1804_v32 = vmul.f32 %v4272_v59, %v4272_v59 }
 0x278   :  { %v4277_v3 = vsub.f32 %v3935_v44, %v1677_v14  ;;  %v1909_v35 = vsel %vm229_vm1, %v1803_v16, 0.0 }
 0x279   :  { %v4284_v5 = vsub.f32 %v3942_v12, %v1678_v1  ;;  %1910 = vadd.xlane.f32.xlu1 %v1909_v35  ;;  %v1538_v37 = vpop.xlane.xlu1 %1537  ;;  %1907 = vadd.xlane.f32.xlu0 %v1906_v39  ;;  %v1912_v10 = vsel %vm229_vm1, %v1804_v32, 0.0 }
 0x27a   :  { %v1679_v24 = vmul.f32 0.25, %v1538_v37  ;;  %v1541_v7 = vpop.xlane.xlu0 %1540  ;;  %v1805_v28 = vmul.f32 %v4277_v3, %v4277_v3 }
 0x27b   :  { %v1680_v44 = vmul.f32 0.25, %v1541_v7  ;;  %v1806_v12 = vmul.f32 %v4284_v5, %v4284_v5 }
 0x27c   :  { %v4289_v14 = vsub.f32 %v3945_v17, %v1679_v24  ;;  %v1915_v61 = vsel %vm229_vm1, %v1805_v28, 0.0 }
 0x27d   :  { %v4296_v16 = vsub.f32 %v3952_v46, %v1680_v44  ;;  %1916 = vadd.xlane.f32.xlu1 %v1915_v61  ;;  %v1544_v1 = vpop.xlane.xlu1 %1543  ;;  %1913 = vadd.xlane.f32.xlu0 %v1912_v10  ;;  %v1918_v7 = vsel %vm229_vm1, %v1806_v12, 0.0 }
 0x27e   :  { %v1681_v35 = vmul.f32 0.25, %v1544_v1  ;;  %v1547_v39 = vpop.xlane.xlu0 %1546  ;;  %v1807_v37 = vmul.f32 %v4289_v14, %v4289_v14 }
 0x27f   :  { %v1682_v17 = vmul.f32 0.25, %v1547_v39  ;;  %v1808_v46 = vmul.f32 %v4296_v16, %v4296_v16 }
 0x280   :  { %v4301_v24 = vsub.f32 %v3955_v51, %v1681_v35  ;;  %v1921_v32 = vsel %vm229_vm1, %v1807_v37, 0.0 }
 0x281   :  { %v4308_v28 = vsub.f32 %v3962_v63, %v1682_v17  ;;  %1922 = vadd.xlane.f32.xlu1 %v1921_v32  ;;  %v1550_v44 = vpop.xlane.xlu1 %1549  ;;  %1919 = vadd.xlane.f32.xlu0 %v1918_v7  ;;  %v1924_v39 = vsel %vm229_vm1, %v1808_v46, 0.0 }
 0x282   :  { %v1683_v61 = vmul.f32 0.25, %v1550_v44  ;;  %v1553_v10 = vpop.xlane.xlu0 %1552  ;;  %v1809_v1 = vmul.f32 %v4301_v24, %v4301_v24 }
 0x283   :  { %v1684_v51 = vmul.f32 0.25, %v1553_v10  ;;  %v1810_v63 = vmul.f32 %v4308_v28, %v4308_v28 }
 0x284   :  { %v4313_v35 = vsub.f32 %v3965_v0, %v1683_v61  ;;  %v1927_v12 = vsel %vm229_vm1, %v1809_v1, 0.0 }
 0x285   :  { %v4320_v37 = vsub.f32 %v3972_v13, %v1684_v51  ;;  %1928 = vadd.xlane.f32.xlu1 %v1927_v12  ;;  %v1556_v17 = vpop.xlane.xlu1 %1555  ;;  %1925 = vadd.xlane.f32.xlu0 %v1924_v39  ;;  %v1930_v10 = vsel %vm229_vm1, %v1810_v63, 0.0 }
 0x286   :  { %v1685_v32 = vmul.f32 0.25, %v1556_v17  ;;  %v1559_v7 = vpop.xlane.xlu0 %1558  ;;  %v1811_v44 = vmul.f32 %v4313_v35, %v4313_v35 }
 0x287   :  { %v1686_v0 = vmul.f32 0.25, %v1559_v7  ;;  %v1812_v13 = vmul.f32 %v4320_v37, %v4320_v37 }
 0x288   :  { %v4325_v61 = vsub.f32 %v3975_v18, %v1685_v32  ;;  %v1933_v46 = vsel %vm229_vm1, %v1811_v44, 0.0 }
 0x289   :  { %v4332_v1 = vsub.f32 %v3982_v30, %v1686_v0  ;;  %1934 = vadd.xlane.f32.xlu1 %v1933_v46  ;;  %v1562_v51 = vpop.xlane.xlu1 %1561  ;;  %1931 = vadd.xlane.f32.xlu0 %v1930_v10  ;;  %v1936_v7 = vsel %vm229_vm1, %v1812_v13, 0.0 }
 0x28a   :  { %v1687_v12 = vmul.f32 0.25, %v1562_v51  ;;  %v1565_v39 = vpop.xlane.xlu0 %1564  ;;  %v1813_v17 = vmul.f32 %v4325_v61, %v4325_v61 }
 0x28b   :  { %v1688_v18 = vmul.f32 0.25, %v1565_v39  ;;  %v1814_v30 = vmul.f32 %v4332_v1, %v4332_v1 }
 0x28c   :  { %v4337_v32 = vsub.f32 %v3985_v33, %v1687_v12  ;;  %v1939_v63 = vsel %vm229_vm1, %v1813_v17, 0.0 }
 0x28d   :  { %v4344_v44 = vsub.f32 %v3992_v60, %v1688_v18  ;;  %1940 = vadd.xlane.f32.xlu1 %v1939_v63  ;;  %v1568_v0 = vpop.xlane.xlu1 %1567  ;;  %1937 = vadd.xlane.f32.xlu0 %v1936_v7  ;;  %v1942_v39 = vsel %vm229_vm1, %v1814_v30, 0.0 }
 0x28e   :  { %v1689_v46 = vmul.f32 0.25, %v1568_v0  ;;  %v1571_v10 = vpop.xlane.xlu0 %1570  ;;  %v1815_v51 = vmul.f32 %v4337_v32, %v4337_v32 }
 0x28f   :  { %v1690_v33 = vmul.f32 0.25, %v1571_v10  ;;  %v1816_v60 = vmul.f32 %v4344_v44, %v4344_v44 }
 0x290   :  { %v4349_v12 = vsub.f32 %v3995_v8, %v1689_v46  ;;  %v1945_v13 = vsel %vm229_vm1, %v1815_v51, 0.0 }
 0x291   :  { %v4356_v17 = vsub.f32 %v4002_v50, %v1690_v33  ;;  %1946 = vadd.xlane.f32.xlu1 %v1945_v13  ;;  %v1574_v18 = vpop.xlane.xlu1 %1573  ;;  %1943 = vadd.xlane.f32.xlu0 %v1942_v39  ;;  %v1948_v10 = vsel %vm229_vm1, %v1816_v60, 0.0 }
 0x292   :  { %v1691_v63 = vmul.f32 0.25, %v1574_v18  ;;  %v1577_v7 = vpop.xlane.xlu0 %1576  ;;  %v1817_v0 = vmul.f32 %v4349_v12, %v4349_v12 }
 0x293   :  { %v1692_v8 = vmul.f32 0.25, %v1577_v7  ;;  %v1818_v50 = vmul.f32 %v4356_v17, %v4356_v17 }
 0x294   :  { %v4361_v46 = vsub.f32 %v4005_v57, %v1691_v63  ;;  %v1951_v30 = vsel %vm229_vm1, %v1817_v0, 0.0 }
 0x295   :  { %v4368_v51 = vsub.f32 %v4012_v43, %v1692_v8  ;;  %1952 = vadd.xlane.f32.xlu1 %v1951_v30  ;;  %v1580_v33 = vpop.xlane.xlu1 %1579  ;;  %1949 = vadd.xlane.f32.xlu0 %v1948_v10  ;;  %v1954_v7 = vsel %vm229_vm1, %v1818_v50, 0.0 }
 0x296   :  { %v1693_v13 = vmul.f32 0.25, %v1580_v33  ;;  %v1583_v39 = vpop.xlane.xlu0 %1582  ;;  %v1819_v18 = vmul.f32 %v4361_v46, %v4361_v46 }
 0x297   :  { %v1694_v57 = vmul.f32 0.25, %v1583_v39  ;;  %v1820_v43 = vmul.f32 %v4368_v51, %v4368_v51 }
 0x298   :  { %v4373_v63 = vsub.f32 %v4015_v52, %v1693_v13  ;;  %v1957_v60 = vsel %vm229_vm1, %v1819_v18, 0.0 }
 0x299   :  { %v4380_v0 = vsub.f32 %v4022_v6, %v1694_v57  ;;  %1958 = vadd.xlane.f32.xlu1 %v1957_v60  ;;  %v1586_v8 = vpop.xlane.xlu1 %1585  ;;  %1955 = vadd.xlane.f32.xlu0 %v1954_v7  ;;  %v1960_v39 = vsel %vm229_vm1, %v1820_v43, 0.0 }
 0x29a   :  { %v1695_v30 = vmul.f32 0.25, %v1586_v8  ;;  %v1589_v10 = vpop.xlane.xlu0 %1588  ;;  %v1821_v33 = vmul.f32 %v4373_v63, %v4373_v63 }
 0x29b   :  { %v1696_v52 = vmul.f32 0.25, %v1589_v10  ;;  %v1822_v6 = vmul.f32 %v4380_v0, %v4380_v0 }
 0x29c   :  { %v4385_v13 = vsub.f32 %v4025_v9, %v1695_v30  ;;  %v1963_v50 = vsel %vm229_vm1, %v1821_v33, 0.0 }
 0x29d   :  { %v4392_v18 = vsub.f32 %v4032_v29, %v1696_v52  ;;  %1964 = vadd.xlane.f32.xlu1 %v1963_v50  ;;  %v1592_v57 = vpop.xlane.xlu1 %1591  ;;  %1961 = vadd.xlane.f32.xlu0 %v1960_v39  ;;  %v1966_v10 = vsel %vm229_vm1, %v1822_v6, 0.0 }
 0x29e   :  { %v1697_v60 = vmul.f32 0.25, %v1592_v57  ;;  %v1595_v7 = vpop.xlane.xlu0 %1594  ;;  %v1823_v8 = vmul.f32 %v4385_v13, %v4385_v13 }
 0x29f   :  { %v1698_v9 = vmul.f32 0.25, %v1595_v7  ;;  %v1824_v29 = vmul.f32 %v4392_v18, %v4392_v18 }
 0x2a0   :  { %v4397_v30 = vsub.f32 %v4035_v34, %v1697_v60  ;;  %v1969_v43 = vsel %vm229_vm1, %v1823_v8, 0.0 }
 0x2a1   :  { %v4404_v33 = vsub.f32 %v4042_v21, %v1698_v9  ;;  %1970 = vadd.xlane.f32.xlu1 %v1969_v43  ;;  %v1598_v52 = vpop.xlane.xlu1 %1597  ;;  %1967 = vadd.xlane.f32.xlu0 %v1966_v10  ;;  %v1972_v7 = vsel %vm229_vm1, %v1824_v29, 0.0 }
 0x2a2   :  { %v1699_v50 = vmul.f32 0.25, %v1598_v52  ;;  %v1601_v39 = vpop.xlane.xlu0 %1600  ;;  %v1825_v57 = vmul.f32 %v4397_v30, %v4397_v30 }
 0x2a3   :  { %5031 = vst [vmem:[#allocation16_spill] sm:$0xff] %v4404_v33  ;;  %v1700_v34 = vmul.f32 0.25, %v1601_v39  ;;  %v1826_v21 = vmul.f32 %v4404_v33, %v4404_v33 }
 0x2a4   :  { %v4409_v60 = vsub.f32 %v4045_v25, %v1699_v50  ;;  %v1975_v6 = vsel %vm229_vm1, %v1825_v57, 0.0 }
 0x2a5   :  { %v4416_v8 = vsub.f32 %v4052_v42, %v1700_v34  ;;  %1976 = vadd.xlane.f32.xlu1 %v1975_v6  ;;  %v1604_v9 = vpop.xlane.xlu1 %1603  ;;  %1973 = vadd.xlane.f32.xlu0 %v1972_v7  ;;  %v1978_v39 = vsel %vm229_vm1, %v1826_v21, 0.0 }
 0x2a6   :  { %v1701_v43 = vmul.f32 0.25, %v1604_v9  ;;  %v1607_v10 = vpop.xlane.xlu0 %1606  ;;  %v1827_v52 = vmul.f32 %v4409_v60, %v4409_v60 }
 0x2a7   :  { %5032 = vst [vmem:[#allocation17_spill] sm:$0xff] %v4416_v8  ;;  %v1702_v25 = vmul.f32 0.25, %v1607_v10  ;;  %v1828_v42 = vmul.f32 %v4416_v8, %v4416_v8  ;;  %v5063_v8 = vld [vmem:[#allocation15_spill] sm:$0xff] }
 0x2a8   :  { %v4421_v50 = vsub.f32 %v4055_v53, %v1701_v43  ;;  %v1981_v29 = vsel %vm229_vm1, %v1827_v52, 0.0 }
 0x2a9   :  { %v4428_v57 = vsub.f32 %v4062_v19, %v1702_v25  ;;  %1982 = vadd.xlane.f32.xlu1 %v1981_v29  ;;  %v1610_v34 = vpop.xlane.xlu1 %1609  ;;  %1979 = vadd.xlane.f32.xlu0 %v1978_v39  ;;  %v1984_v10 = vsel %vm229_vm1, %v1828_v42, 0.0 }
 0x2aa   :  { %5033 = vst [vmem:[#allocation18_spill] sm:$0xff] %v4421_v50  ;;  %v1703_v6 = vmul.f32 0.25, %v1610_v34  ;;  %v1613_v7 = vpop.xlane.xlu0 %1612  ;;  %v1829_v9 = vmul.f32 %v4421_v50, %v4421_v50 }
 0x2ab   :  { %5034 = vst [vmem:[#allocation19_spill] sm:$0xff] %v4428_v57  ;;  %v1704_v53 = vmul.f32 0.25, %v1613_v7  ;;  %v1830_v19 = vmul.f32 %v4428_v57, %v4428_v57 }
 0x2ac   :  { %v4433_v43 = vsub.f32 %v4065_v22, %v1703_v6  ;;  %v1987_v21 = vsel %vm229_vm1, %v1829_v9, 0.0  ;;  %v5037_v6 = vld [vmem:[#allocation2_spill] sm:$0xff] }
 0x2ad   :  { %v4440_v52 = vsub.f32 %v4072_v55, %v1704_v53  ;;  %1988 = vadd.xlane.f32.xlu1 %v1987_v21  ;;  %v1616_v25 = vpop.xlane.xlu1 %1615  ;;  %1985 = vadd.xlane.f32.xlu0 %v1984_v10  ;;  %v1990_v9 = vsel %vm229_vm1, %v1830_v19, 0.0  ;;  %v5039_v53 = vld [vmem:[#allocation3_spill] sm:$0xff] }
 0x2ae   :  { %5035 = vst [vmem:[#allocation20_spill] sm:$0xff] %v4433_v43  ;;  %v1705_v29 = vmul.f32 0.25, %v1616_v25  ;;  %v1619_v39 = vpop.xlane.xlu0 %1618  ;;  %v1831_v34 = vmul.f32 %v4433_v43, %v4433_v43 }
 0x2af   :  { %5036 = vst [vmem:[#allocation21_spill] sm:$0xff] %v4440_v52  ;;  %v1706_v22 = vmul.f32 0.25, %v1619_v39  ;;  %v1832_v55 = vmul.f32 %v4440_v52, %v4440_v52 }
 0x2b0   :  { %v4445_v7 = vsub.f32 %v5037_v6, %v1705_v29  ;;  %v1993_v42 = vsel %vm229_vm1, %v1831_v34, 0.0  ;;  %v5041_v6 = vld [vmem:[#allocation4_spill] sm:$0xff] }
 0x2b1   :  { %v4452_v21 = vsub.f32 %v5039_v53, %v1706_v22  ;;  %1994 = vadd.xlane.f32.xlu1 %v1993_v42  ;;  %v1622_v10 = vpop.xlane.xlu1 %1621  ;;  %1991 = vadd.xlane.f32.xlu0 %v1990_v9  ;;  %v1996_v34 = vsel %vm229_vm1, %v1832_v55, 0.0  ;;  %v5043_v53 = vld [vmem:[#allocation5_spill] sm:$0xff] }
 0x2b2   :  { %5038 = vst [vmem:[#allocation2_spill] sm:$0xff] %v4445_v7  ;;  %v1707_v25 = vmul.f32 0.25, %v1622_v10  ;;  %v1625_v57 = vpop.xlane.xlu0 %1624  ;;  %v1833_v39 = vmul.f32 %v4445_v7, %v4445_v7 }
 0x2b3   :  { %5040 = vst [vmem:[#allocation3_spill] sm:$0xff] %v4452_v21  ;;  %v1708_v29 = vmul.f32 0.25, %v1625_v57  ;;  %v1834_v22 = vmul.f32 %v4452_v21, %v4452_v21 }
 0x2b4   :  { %v4457_v43 = vsub.f32 %v5041_v6, %v1707_v25  ;;  %v1999_v19 = vsel %vm229_vm1, %v1833_v39, 0.0  ;;  %v5045_v6 = vld [vmem:[#allocation6_spill] sm:$0xff] }
 0x2b5   :  { %v4464_v42 = vsub.f32 %v5043_v53, %v1708_v29  ;;  %2000 = vadd.xlane.f32.xlu1 %v1999_v19  ;;  %v1628_v9 = vpop.xlane.xlu1 %1627  ;;  %1997 = vadd.xlane.f32.xlu0 %v1996_v34  ;;  %v2002_v39 = vsel %vm229_vm1, %v1834_v22, 0.0  ;;  %v5047_v53 = vld [vmem:[#allocation7_spill] sm:$0xff] }
 0x2b6   :  { %5042 = vst [vmem:[#allocation4_spill] sm:$0xff] %v4457_v43  ;;  %v1709_v10 = vmul.f32 0.25, %v1628_v9  ;;  %v1631_v52 = vpop.xlane.xlu0 %1630  ;;  %v1835_v57 = vmul.f32 %v4457_v43, %v4457_v43 }
 0x2b7   :  { %5044 = vst [vmem:[#allocation5_spill] sm:$0xff] %v4464_v42  ;;  %v1710_v25 = vmul.f32 0.25, %v1631_v52  ;;  %v1836_v29 = vmul.f32 %v4464_v42, %v4464_v42 }
 0x2b8   :  { %v4469_v7 = vsub.f32 %v5045_v6, %v1709_v10  ;;  %v2005_v55 = vsel %vm229_vm1, %v1835_v57, 0.0  ;;  %v5049_v6 = vld [vmem:[#allocation8_spill] sm:$0xff] }
 0x2b9   :  { %v4476_v19 = vsub.f32 %v5047_v53, %v1710_v25  ;;  %2006 = vadd.xlane.f32.xlu1 %v2005_v55  ;;  %v1634_v34 = vpop.xlane.xlu1 %1633  ;;  %2003 = vadd.xlane.f32.xlu0 %v2002_v39  ;;  %v2008_v57 = vsel %vm229_vm1, %v1836_v29, 0.0  ;;  %v5051_v53 = vld [vmem:[#allocation9_spill] sm:$0xff] }
 0x2ba   :  { %5046 = vst [vmem:[#allocation6_spill] sm:$0xff] %v4469_v7  ;;  %v1711_v9 = vmul.f32 0.25, %v1634_v34  ;;  %v1637_v21 = vpop.xlane.xlu0 %1636  ;;  %v1837_v52 = vmul.f32 %v4469_v7, %v4469_v7 }
 0x2bb   :  { %5048 = vst [vmem:[#allocation7_spill] sm:$0xff] %v4476_v19  ;;  %v1712_v10 = vmul.f32 0.25, %v1637_v21  ;;  %v1838_v25 = vmul.f32 %v4476_v19, %v4476_v19 }
 0x2bc   :  { %v4481_v43 = vsub.f32 %v5049_v6, %v1711_v9  ;;  %v2011_v22 = vsel %vm229_vm1, %v1837_v52, 0.0  ;;  %v5053_v6 = vld [vmem:[#allocation10_spill] sm:$0xff] }
 0x2bd   :  { %v4488_v55 = vsub.f32 %v5051_v53, %v1712_v10  ;;  %2012 = vadd.xlane.f32.xlu1 %v2011_v22  ;;  %v1640_v39 = vpop.xlane.xlu1 %1639  ;;  %2009 = vadd.xlane.f32.xlu0 %v2008_v57  ;;  %v2014_v52 = vsel %vm229_vm1, %v1838_v25, 0.0  ;;  %v5055_v53 = vld [vmem:[#allocation11_spill] sm:$0xff] }
 0x2be   :  { %5050 = vst [vmem:[#allocation8_spill] sm:$0xff] %v4481_v43  ;;  %v1713_v34 = vmul.f32 0.25, %v1640_v39  ;;  %v1643_v42 = vpop.xlane.xlu0 %1642  ;;  %v1839_v21 = vmul.f32 %v4481_v43, %v4481_v43 }
 0x2bf   :  { %5052 = vst [vmem:[#allocation9_spill] sm:$0xff] %v4488_v55  ;;  %v1714_v9 = vmul.f32 0.25, %v1643_v42  ;;  %v1840_v10 = vmul.f32 %v4488_v55, %v4488_v55 }
 0x2c0   :  { %v4493_v7 = vsub.f32 %v5053_v6, %v1713_v34  ;;  %v2017_v29 = vsel %vm229_vm1, %v1839_v21, 0.0  ;;  %v5057_v6 = vld [vmem:[#allocation12_spill] sm:$0xff] }
 0x2c1   :  { %v4500_v22 = vsub.f32 %v5055_v53, %v1714_v9  ;;  %2018 = vadd.xlane.f32.xlu1 %v2017_v29  ;;  %v1646_v57 = vpop.xlane.xlu1 %1645  ;;  %2015 = vadd.xlane.f32.xlu0 %v2014_v52  ;;  %v2020_v21 = vsel %vm229_vm1, %v1840_v10, 0.0 }
 0x2c2   :  { %5054 = vst [vmem:[#allocation10_spill] sm:$0xff] %v4493_v7  ;;  %v1715_v39 = vmul.f32 0.25, %v1646_v57  ;;  %v1649_v19 = vpop.xlane.xlu0 %1648  ;;  %v1841_v42 = vmul.f32 %v4493_v7, %v4493_v7  ;;  %v5060_v57 = vld [vmem:[#allocation13_spill] sm:$0xff] }
 0x2c3   :  { %5056 = vst [vmem:[#allocation11_spill] sm:$0xff] %v4500_v22  ;;  %v1716_v34 = vmul.f32 0.25, %v1649_v19  ;;  %v1842_v9 = vmul.f32 %v4500_v22, %v4500_v22 }
 0x2c4   :  { %v4505_v43 = vsub.f32 %v5057_v6, %v1715_v39  ;;  %v2023_v25 = vsel %vm229_vm1, %v1841_v42, 0.0 }
 0x2c5   :  { %v4512_v29 = vsub.f32 %v4132_v48, %v1716_v34  ;;  %2024 = vadd.xlane.f32.xlu1 %v2023_v25  ;;  %v1652_v52 = vpop.xlane.xlu1 %1651  ;;  %2021 = vadd.xlane.f32.xlu0 %v2020_v21  ;;  %v2026_v10 = vsel %vm229_vm1, %v1842_v9, 0.0 }
 0x2c6   :  { %5058 = vst [vmem:[#allocation12_spill] sm:$0xff] %v4505_v43  ;;  %v1717_v53 = vmul.f32 0.25, %v1652_v52  ;;  %v1843_v19 = vmul.f32 %v4505_v43, %v4505_v43 }
 0x2c7   :  { %5059 = vst [vmem:[#allocation22_spill] sm:$0xff] %v4512_v29  ;;  %v1844_v6 = vmul.f32 %v4512_v29, %v4512_v29 }
 0x2c8   :  { %v4517_v39 = vsub.f32 %v5060_v57, %v1717_v53  ;;  %v2029_v42 = vsel %vm229_vm1, %v1843_v19, 0.0 }
 0x2c9   :  { %2030 = vadd.xlane.f32.xlu1 %v2029_v42  ;;  %2027 = vadd.xlane.f32.xlu0 %v2026_v10  ;;  %v2032_v25 = vsel %vm229_vm1, %v1844_v6, 0.0 }
 0x2ca   :  { %5061 = vst [vmem:[#allocation13_spill] sm:$0xff] %v4517_v39  ;;  %v1845_v48 = vmul.f32 %v4517_v39, %v4517_v39 }
 0x2cc   :  { %v2035_v34 = vsel %vm229_vm1, %v1845_v48, 0.0 }
 0x2cd   :  { %2036 = vadd.xlane.f32.xlu1 %v2035_v34  ;;  %2033 = vadd.xlane.f32.xlu0 %v2032_v25 }
 0x2da   :  { %v1851_v21 = vpop.xlane.xlu1 %1850 }
 0x2db   :  { %v2039_v52 = vmul.f32 0.25, %v1851_v21  ;;  %v4530_v21 = vld [vmem:[%s4981_s6] ss:$0 sm:$0xff] }
 0x2dd   :  { %v2103_v53 = vadd.f32 1e-05, %v2039_v52 }
 0x2de   :  { %v1857_v19 = vpop.xlane.xlu1 %1856  ;;  %v1848_v57 = vpop.xlane.xlu0 %1847 }
 0x2df   :  { %2963 = vrsqrt.f32 %v2103_v53  ;;  %v2041_v9 = vmul.f32 0.25, %v1857_v19  ;;  %v2038_v22 = vmul.f32 0.25, %v1848_v57  ;;  %v5062_v19 = vld [vmem:[#allocation14_spill] sm:$0xff] }
 0x2e1   :  { %v2105_v29 = vadd.f32 1e-05, %v2041_v9  ;;  %v2102_v42 = vadd.f32 1e-05, %v2038_v22 }
 0x2e2   :  { %v1854_v10 = vpop.xlane.xlu0 %1853 }
 0x2e3   :  { %2965 = vrsqrt.f32 %v2105_v29  ;;  %v2040_v43 = vmul.f32 0.25, %v1854_v10 }
 0x2e4   :  { %2967 = vrsqrt.f32 %v2102_v42 }
 0x2e5   :  { %v2104_v39 = vadd.f32 1e-05, %v2040_v43  ;;  %v4536_v43 = vld [vmem:[%s4982_s7] ss:$0 sm:$0xff] }
 0x2e6   :  { %v1863_v48 = vpop.xlane.xlu1 %1862  ;;  %v1860_v55 = vpop.xlane.xlu0 %1859 }
 0x2e7   :  { %2969 = vrsqrt.f32 %v2104_v39  ;;  %v2043_v6 = vmul.f32 0.25, %v1863_v48  ;;  %v2042_v34 = vmul.f32 0.25, %v1860_v55 }
 0x2e9   :  { %v2964_v25 = vpop.eup %2963  ;;  %v2107_v52 = vadd.f32 1e-05, %v2043_v6  ;;  %v2106_v53 = vadd.f32 1e-05, %v2042_v34 }
 0x2ea   :  { %v2231_v22 = vmul.f32 %v2964_v25, %v5062_v19  ;;  %v1869_v57 = vpop.xlane.xlu1 %1868  ;;  %v1866_v29 = vpop.xlane.xlu0 %1865 }
 0x2eb   :  { %2971 = vrsqrt.f32 %v2107_v52  ;;  %v2045_v39 = vmul.f32 0.25, %v1869_v57  ;;  %v2044_v55 = vmul.f32 0.25, %v1866_v29 }
 0x2ec   :  { %v2302_v9 = vmul.f32 %v4530_v21, %v2231_v22  ;;  %2973 = vrsqrt.f32 %v2106_v53 }
 0x2ed   :  { %v2966_v42 = vpop.eup %2965  ;;  %v2109_v10 = vadd.f32 1e-05, %v2045_v39  ;;  %v2108_v48 = vadd.f32 1e-05, %v2044_v55 }
 0x2ee   :  { %v2968_v6 = vpop.eup %2967  ;;  %v2373_v34 = vadd.f32 %v4536_v43, %v2302_v9  ;;  %v2233_v25 = vmul.f32 %v2966_v42, %v4149_v2  ;;  %v1875_v19 = vpop.xlane.xlu1 %1874 }
 0x2ef   :  { %v1872_v7 = vpop.xlane.xlu0 %1871  ;;  %v2230_v50 = vmul.f32 %v2968_v6, %v5063_v8  ;;  %2975 = vrsqrt.f32 %v2109_v10  ;;  %v2047_v33 = vmul.f32 0.25, %v1875_v19 }
 0x2f0   :  { %v2046_v52 = vmul.f32 0.25, %v1872_v7  ;;  %2437 = vst.msk [vmem:[%s4983_s8 + $0x8] sm:$0xff] %vm229_vm1, %v2373_v34  ;;  %v2304_v53 = vmul.f32 %v4530_v21, %v2233_v25  ;;  %2977 = vrsqrt.f32 %v2108_v48 }
 0x2f1   :  { %v2970_v22 = vpop.eup %2969  ;;  %v2301_v57 = vmul.f32 %v4530_v21, %v2230_v50  ;;  %v2111_v29 = vadd.f32 1e-05, %v2047_v33 }
 0x2f2   :  { %v2110_v2 = vadd.f32 1e-05, %v2046_v52  ;;  %v2375_v39 = vadd.f32 %v4536_v43, %v2304_v53  ;;  %v2232_v8 = vmul.f32 %v2970_v22, %v4160_v41  ;;  %v1881_v55 = vpop.xlane.xlu1 %1880 }
 0x2f3   :  { %v1878_v9 = vpop.xlane.xlu0 %1877  ;;  %v2372_v7 = vadd.f32 %v4536_v43, %v2301_v57  ;;  %2979 = vrsqrt.f32 %v2111_v29  ;;  %v2049_v42 = vmul.f32 0.25, %v1881_v55 }
 0x2f4   :  { %v2048_v10 = vmul.f32 0.25, %v1878_v9  ;;  %2439 = vst.msk [vmem:[%s4983_s8 + $0x18] sm:$0xff] %vm229_vm1, %v2375_v39  ;;  %v2303_v50 = vmul.f32 %v4530_v21, %v2232_v8  ;;  %2981 = vrsqrt.f32 %v2110_v2 }
 0x2f5   :  { %v2972_v33 = vpop.eup %2971  ;;  %2436 = vst.msk [vmem:[%s4983_s8] sm:$0xff] %vm229_vm1, %v2372_v7  ;;  %v2113_v41 = vadd.f32 1e-05, %v2049_v42 }
 0x2f6   :  { %v2112_v48 = vadd.f32 1e-05, %v2048_v10  ;;  %v2974_v6 = vpop.eup %2973  ;;  %v2374_v34 = vadd.f32 %v4536_v43, %v2303_v50  ;;  %v2235_v25 = vmul.f32 %v2972_v33, %v4170_v15  ;;  %v1887_v19 = vpop.xlane.xlu1 %1886 }
 0x2f7   :  { %v1884_v52 = vpop.xlane.xlu0 %1883  ;;  %v2234_v53 = vmul.f32 %v2974_v6, %v4165_v45  ;;  %2983 = vrsqrt.f32 %v2113_v41  ;;  %v2051_v22 = vmul.f32 0.25, %v1887_v19 }
 0x2f8   :  { %v2050_v57 = vmul.f32 0.25, %v1884_v52  ;;  %2438 = vst.msk [vmem:[%s4983_s8 + $0x10] sm:$0xff] %vm229_vm1, %v2374_v34  ;;  %v2306_v29 = vmul.f32 %v4530_v21, %v2235_v25  ;;  %2985 = vrsqrt.f32 %v2112_v48 }
 0x2f9   :  { %v2976_v2 = vpop.eup %2975  ;;  %v2305_v39 = vmul.f32 %v4530_v21, %v2234_v53  ;;  %v2115_v8 = vadd.f32 1e-05, %v2051_v22 }
 0x2fa   :  { %v2114_v15 = vadd.f32 1e-05, %v2050_v57  ;;  %v2978_v55 = vpop.eup %2977  ;;  %v2377_v9 = vadd.f32 %v4536_v43, %v2306_v29  ;;  %v2237_v45 = vmul.f32 %v2976_v2, %v4181_v26  ;;  %v1893_v7 = vpop.xlane.xlu1 %1892 }
 0x2fb   :  { %v1890_v42 = vpop.xlane.xlu0 %1889  ;;  %v2376_v10 = vadd.f32 %v4536_v43, %v2305_v39  ;;  %v2236_v50 = vmul.f32 %v2978_v55, %v4176_v58  ;;  %2987 = vrsqrt.f32 %v2115_v8  ;;  %v2053_v33 = vmul.f32 0.25, %v1893_v7 }
 0x2fc   :  { %2441 = vst.msk [vmem:[%s4983_s8 + $0x28] sm:$0xff] %vm229_vm1, %v2377_v9  ;;  %v2308_v41 = vmul.f32 %v4530_v21, %v2237_v45  ;;  %2989 = vrsqrt.f32 %v2114_v15  ;;  %v2052_v48 = vmul.f32 0.25, %v1890_v42 }
 0x2fd   :  { %v2980_v6 = vpop.eup %2979  ;;  %2440 = vst.msk [vmem:[%s4983_s8 + $0x20] sm:$0xff] %vm229_vm1, %v2376_v10  ;;  %v2307_v26 = vmul.f32 %v4530_v21, %v2236_v50  ;;  %v2117_v58 = vadd.f32 1e-05, %v2053_v33 }
 0x2fe   :  { %v2982_v34 = vpop.eup %2981  ;;  %v2379_v25 = vadd.f32 %v4536_v43, %v2308_v41  ;;  %v2239_v19 = vmul.f32 %v2980_v6, %v4193_v54  ;;  %v2116_v52 = vadd.f32 1e-05, %v2052_v48  ;;  %v1899_v53 = vpop.xlane.xlu1 %1898 }
 0x2ff   :  { %v1896_v22 = vpop.xlane.xlu0 %1895  ;;  %v2378_v57 = vadd.f32 %v4536_v43, %v2307_v26  ;;  %v2238_v29 = vmul.f32 %v2982_v34, %v4188_v27  ;;  %2991 = vrsqrt.f32 %v2117_v58  ;;  %v2055_v2 = vmul.f32 0.25, %v1899_v53 }
 0x300   :  { %2443 = vst.msk [vmem:[%s4983_s8 + $0x38] sm:$0xff] %vm229_vm1, %v2379_v25  ;;  %v2310_v39 = vmul.f32 %v4530_v21, %v2239_v19  ;;  %2993 = vrsqrt.f32 %v2116_v52  ;;  %v2054_v8 = vmul.f32 0.25, %v1896_v22 }
 0x301   :  { %v2984_v15 = vpop.eup %2983  ;;  %2442 = vst.msk [vmem:[%s4983_s8 + $0x30] sm:$0xff] %vm229_vm1, %v2378_v57  ;;  %v2309_v54 = vmul.f32 %v4530_v21, %v2238_v29  ;;  %v2119_v27 = vadd.f32 1e-05, %v2055_v2 }
 0x302   :  { %v2986_v55 = vpop.eup %2985  ;;  %v2381_v9 = vadd.f32 %v4536_v43, %v2310_v39  ;;  %v2241_v45 = vmul.f32 %v2984_v15, %v4205_v62  ;;  %v2118_v7 = vadd.f32 1e-05, %v2054_v8  ;;  %v1905_v42 = vpop.xlane.xlu1 %1904 }
 0x303   :  { %v1902_v10 = vpop.xlane.xlu0 %1901  ;;  %v2380_v50 = vadd.f32 %v4536_v43, %v2309_v54  ;;  %v2240_v33 = vmul.f32 %v2986_v55, %v4200_v31  ;;  %2995 = vrsqrt.f32 %v2119_v27  ;;  %v2057_v41 = vmul.f32 0.25, %v1905_v42 }
 0x304   :  { %2445 = vst.msk [vmem:[%s4983_s8 + $0x48] sm:$0xff] %vm229_vm1, %v2381_v9  ;;  %v2312_v48 = vmul.f32 %v4530_v21, %v2241_v45  ;;  %2997 = vrsqrt.f32 %v2118_v7  ;;  %v2056_v6 = vmul.f32 0.25, %v1902_v10 }
 0x305   :  { %v2988_v26 = vpop.eup %2987  ;;  %2444 = vst.msk [vmem:[%s4983_s8 + $0x40] sm:$0xff] %vm229_vm1, %v2380_v50  ;;  %v2311_v62 = vmul.f32 %v4530_v21, %v2240_v33  ;;  %v2121_v31 = vadd.f32 1e-05, %v2057_v41 }
 0x306   :  { %v2990_v58 = vpop.eup %2989  ;;  %v2383_v34 = vadd.f32 %v4536_v43, %v2312_v48  ;;  %v2243_v25 = vmul.f32 %v2988_v26, %v4217_v4  ;;  %v2120_v19 = vadd.f32 1e-05, %v2056_v6  ;;  %v1911_v52 = vpop.xlane.xlu1 %1910 }
 0x307   :  { %v1908_v53 = vpop.xlane.xlu0 %1907  ;;  %v2382_v22 = vadd.f32 %v4536_v43, %v2311_v62  ;;  %v2242_v57 = vmul.f32 %v2990_v58, %v4212_v38  ;;  %2999 = vrsqrt.f32 %v2121_v31  ;;  %v2059_v29 = vmul.f32 0.25, %v1911_v52 }
 0x308   :  { %2447 = vst.msk [vmem:[%s4983_s8 + $0x58] sm:$0xff] %vm229_vm1, %v2383_v34  ;;  %v2314_v2 = vmul.f32 %v4530_v21, %v2243_v25  ;;  %3001 = vrsqrt.f32 %v2120_v19  ;;  %v2058_v39 = vmul.f32 0.25, %v1908_v53 }
 0x309   :  { %v2992_v8 = vpop.eup %2991  ;;  %2446 = vst.msk [vmem:[%s4983_s8 + $0x50] sm:$0xff] %vm229_vm1, %v2382_v22  ;;  %v2313_v4 = vmul.f32 %v4530_v21, %v2242_v57  ;;  %v2123_v38 = vadd.f32 1e-05, %v2059_v29 }
 0x30a   :  { %v2994_v15 = vpop.eup %2993  ;;  %v2385_v54 = vadd.f32 %v4536_v43, %v2314_v2  ;;  %v2245_v27 = vmul.f32 %v2992_v8, %v4229_v11  ;;  %v2122_v55 = vadd.f32 1e-05, %v2058_v39  ;;  %v1917_v9 = vpop.xlane.xlu1 %1916 }
 0x30b   :  { %v1914_v45 = vpop.xlane.xlu0 %1913  ;;  %v2384_v7 = vadd.f32 %v4536_v43, %v2313_v4  ;;  %v2244_v42 = vmul.f32 %v2994_v15, %v4224_v23  ;;  %3003 = vrsqrt.f32 %v2123_v38  ;;  %v2061_v10 = vmul.f32 0.25, %v1917_v9 }
 0x30c   :  { %2449 = vst.msk [vmem:[%s4983_s8 + $0x68] sm:$0xff] %vm229_vm1, %v2385_v54  ;;  %v2316_v50 = vmul.f32 %v4530_v21, %v2245_v27  ;;  %3005 = vrsqrt.f32 %v2122_v55  ;;  %v2060_v33 = vmul.f32 0.25, %v1914_v45 }
 0x30d   :  { %v2996_v41 = vpop.eup %2995  ;;  %2448 = vst.msk [vmem:[%s4983_s8 + $0x60] sm:$0xff] %vm229_vm1, %v2384_v7  ;;  %v2315_v11 = vmul.f32 %v4530_v21, %v2244_v42  ;;  %v2125_v23 = vadd.f32 1e-05, %v2061_v10 }
 0x30e   :  { %v2998_v48 = vpop.eup %2997  ;;  %v2387_v6 = vadd.f32 %v4536_v43, %v2316_v50  ;;  %v2247_v26 = vmul.f32 %v2996_v41, %v4241_v40  ;;  %v2124_v62 = vadd.f32 1e-05, %v2060_v33  ;;  %v1923_v31 = vpop.xlane.xlu1 %1922 }
 0x30f   :  { %v1920_v58 = vpop.xlane.xlu0 %1919  ;;  %v2386_v34 = vadd.f32 %v4536_v43, %v2315_v11  ;;  %v2246_v25 = vmul.f32 %v2998_v48, %v4236_v20  ;;  %3007 = vrsqrt.f32 %v2125_v23  ;;  %v2063_v19 = vmul.f32 0.25, %v1923_v31 }
 0x310   :  { %2451 = vst.msk [vmem:[%s4983_s8 + $0x78] sm:$0xff] %vm229_vm1, %v2387_v6  ;;  %v2318_v52 = vmul.f32 %v4530_v21, %v2247_v26  ;;  %3009 = vrsqrt.f32 %v2124_v62  ;;  %v2062_v53 = vmul.f32 0.25, %v1920_v58 }
 0x311   :  { %v3000_v22 = vpop.eup %2999  ;;  %2450 = vst.msk [vmem:[%s4983_s8 + $0x70] sm:$0xff] %vm229_vm1, %v2386_v34  ;;  %v2317_v40 = vmul.f32 %v4530_v21, %v2246_v25  ;;  %v2127_v20 = vadd.f32 1e-05, %v2063_v19 }
 0x312   :  { %v3002_v57 = vpop.eup %3001  ;;  %v2389_v29 = vadd.f32 %v4536_v43, %v2318_v52  ;;  %v2249_v2 = vmul.f32 %v3000_v22, %v4253_v47  ;;  %v2126_v39 = vadd.f32 1e-05, %v2062_v53  ;;  %v1929_v8 = vpop.xlane.xlu1 %1928 }
 0x313   :  { %v1926_v4 = vpop.xlane.xlu0 %1925  ;;  %v2388_v38 = vadd.f32 %v4536_v43, %v2317_v40  ;;  %v2248_v15 = vmul.f32 %v3002_v57, %v4248_v36  ;;  %3011 = vrsqrt.f32 %v2127_v20  ;;  %v2065_v54 = vmul.f32 0.25, %v1929_v8 }
 0x314   :  { %2453 = vst.msk [vmem:[%s4983_s8 + $0x88] sm:$0xff] %vm229_vm1, %v2389_v29  ;;  %v2320_v27 = vmul.f32 %v4530_v21, %v2249_v2  ;;  %3013 = vrsqrt.f32 %v2126_v39  ;;  %v2064_v55 = vmul.f32 0.25, %v1926_v4 }
 0x315   :  { %v3004_v9 = vpop.eup %3003  ;;  %2452 = vst.msk [vmem:[%s4983_s8 + $0x80] sm:$0xff] %vm229_vm1, %v2388_v38  ;;  %v2319_v47 = vmul.f32 %v4530_v21, %v2248_v15  ;;  %v2129_v36 = vadd.f32 1e-05, %v2065_v54 }
 0x316   :  { %v3006_v45 = vpop.eup %3005  ;;  %v2391_v7 = vadd.f32 %v4536_v43, %v2320_v27  ;;  %v2251_v42 = vmul.f32 %v3004_v9, %v4265_v56  ;;  %v2128_v10 = vadd.f32 1e-05, %v2064_v55  ;;  %v1935_v50 = vpop.xlane.xlu1 %1934 }
 0x317   :  { %v1932_v33 = vpop.xlane.xlu0 %1931  ;;  %v2390_v41 = vadd.f32 %v4536_v43, %v2319_v47  ;;  %v2250_v11 = vmul.f32 %v3006_v45, %v4260_v49  ;;  %3015 = vrsqrt.f32 %v2129_v36  ;;  %v2067_v23 = vmul.f32 0.25, %v1935_v50 }
 0x318   :  { %2455 = vst.msk [vmem:[%s4983_s8 + $0x98] sm:$0xff] %vm229_vm1, %v2391_v7  ;;  %v2322_v48 = vmul.f32 %v4530_v21, %v2251_v42  ;;  %3017 = vrsqrt.f32 %v2128_v10  ;;  %v2066_v6 = vmul.f32 0.25, %v1932_v33 }
 0x319   :  { %v3008_v26 = vpop.eup %3007  ;;  %2454 = vst.msk [vmem:[%s4983_s8 + $0x90] sm:$0xff] %vm229_vm1, %v2390_v41  ;;  %v2321_v56 = vmul.f32 %v4530_v21, %v2250_v11  ;;  %v2131_v49 = vadd.f32 1e-05, %v2067_v23 }
 0x31a   :  { %v3010_v62 = vpop.eup %3009  ;;  %v2393_v31 = vadd.f32 %v4536_v43, %v2322_v48  ;;  %v2253_v58 = vmul.f32 %v3008_v26, %v4277_v3  ;;  %v2130_v34 = vadd.f32 1e-05, %v2066_v6  ;;  %v1941_v25 = vpop.xlane.xlu1 %1940 }
 0x31b   :  { %v1938_v19 = vpop.xlane.xlu0 %1937  ;;  %v2392_v52 = vadd.f32 %v4536_v43, %v2321_v56  ;;  %v2252_v53 = vmul.f32 %v3010_v62, %v4272_v59  ;;  %3019 = vrsqrt.f32 %v2131_v49  ;;  %v2069_v22 = vmul.f32 0.25, %v1941_v25 }
 0x31c   :  { %2457 = vst.msk [vmem:[%s4983_s8 + $0xa8] sm:$0xff] %vm229_vm1, %v2393_v31  ;;  %v2324_v40 = vmul.f32 %v4530_v21, %v2253_v58  ;;  %3021 = vrsqrt.f32 %v2130_v34  ;;  %v2068_v20 = vmul.f32 0.25, %v1938_v19 }
 0x31d   :  { %v3012_v57 = vpop.eup %3011  ;;  %2456 = vst.msk [vmem:[%s4983_s8 + $0xa0] sm:$0xff] %vm229_vm1, %v2392_v52  ;;  %v2323_v3 = vmul.f32 %v4530_v21, %v2252_v53  ;;  %v2133_v59 = vadd.f32 1e-05, %v2069_v22 }
 0x31e   :  { %v3014_v29 = vpop.eup %3013  ;;  %v2395_v2 = vadd.f32 %v4536_v43, %v2324_v40  ;;  %v2255_v39 = vmul.f32 %v3012_v57, %v4289_v14  ;;  %v2132_v8 = vadd.f32 1e-05, %v2068_v20  ;;  %v1947_v4 = vpop.xlane.xlu1 %1946 }
 0x31f   :  { %v1944_v38 = vpop.xlane.xlu0 %1943  ;;  %v2394_v15 = vadd.f32 %v4536_v43, %v2323_v3  ;;  %v2254_v54 = vmul.f32 %v3014_v29, %v4284_v5  ;;  %3023 = vrsqrt.f32 %v2133_v59  ;;  %v2071_v27 = vmul.f32 0.25, %v1947_v4 }
 0x320   :  { %2459 = vst.msk [vmem:[%s4983_s8 + $0xb8] sm:$0xff] %vm229_vm1, %v2395_v2  ;;  %v2326_v55 = vmul.f32 %v4530_v21, %v2255_v39  ;;  %3025 = vrsqrt.f32 %v2132_v8  ;;  %v2070_v9 = vmul.f32 0.25, %v1944_v38 }
 0x321   :  { %v3016_v47 = vpop.eup %3015  ;;  %2458 = vst.msk [vmem:[%s4983_s8 + $0xb0] sm:$0xff] %vm229_vm1, %v2394_v15  ;;  %v2325_v14 = vmul.f32 %v4530_v21, %v2254_v54  ;;  %v2135_v5 = vadd.f32 1e-05, %v2071_v27 }
 0x322   :  { %v3018_v36 = vpop.eup %3017  ;;  %v2397_v45 = vadd.f32 %v4536_v43, %v2326_v55  ;;  %v2257_v7 = vmul.f32 %v3016_v47, %v4301_v24  ;;  %v2134_v42 = vadd.f32 1e-05, %v2070_v9  ;;  %v1953_v10 = vpop.xlane.xlu1 %1952 }
 0x323   :  { %v1950_v50 = vpop.xlane.xlu0 %1949  ;;  %v2396_v33 = vadd.f32 %v4536_v43, %v2325_v14  ;;  %v2256_v41 = vmul.f32 %v3018_v36, %v4296_v16  ;;  %3027 = vrsqrt.f32 %v2135_v5  ;;  %v2073_v11 = vmul.f32 0.25, %v1953_v10 }
 0x324   :  { %2461 = vst.msk [vmem:[%s4983_s8 + $0xc8] sm:$0xff] %vm229_vm1, %v2397_v45  ;;  %v2328_v23 = vmul.f32 %v4530_v21, %v2257_v7  ;;  %3029 = vrsqrt.f32 %v2134_v42  ;;  %v2072_v48 = vmul.f32 0.25, %v1950_v50 }
 0x325   :  { %v3020_v6 = vpop.eup %3019  ;;  %2460 = vst.msk [vmem:[%s4983_s8 + $0xc0] sm:$0xff] %vm229_vm1, %v2396_v33  ;;  %v2327_v24 = vmul.f32 %v4530_v21, %v2256_v41  ;;  %v2137_v16 = vadd.f32 1e-05, %v2073_v11 }
 0x326   :  { %v3022_v26 = vpop.eup %3021  ;;  %v2399_v56 = vadd.f32 %v4536_v43, %v2328_v23  ;;  %v2259_v49 = vmul.f32 %v3020_v6, %v4313_v35  ;;  %v2136_v62 = vadd.f32 1e-05, %v2072_v48  ;;  %v1959_v31 = vpop.xlane.xlu1 %1958 }
 0x327   :  { %v1956_v58 = vpop.xlane.xlu0 %1955  ;;  %v2398_v34 = vadd.f32 %v4536_v43, %v2327_v24  ;;  %v2258_v25 = vmul.f32 %v3022_v26, %v4308_v28  ;;  %3031 = vrsqrt.f32 %v2137_v16  ;;  %v2075_v19 = vmul.f32 0.25, %v1959_v31 }
 0x328   :  { %2463 = vst.msk [vmem:[%s4983_s8 + $0xd8] sm:$0xff] %vm229_vm1, %v2399_v56  ;;  %v2330_v52 = vmul.f32 %v4530_v21, %v2259_v49  ;;  %3033 = vrsqrt.f32 %v2136_v62  ;;  %v2074_v53 = vmul.f32 0.25, %v1956_v58 }
 0x329   :  { %v3024_v22 = vpop.eup %3023  ;;  %2462 = vst.msk [vmem:[%s4983_s8 + $0xd0] sm:$0xff] %vm229_vm1, %v2398_v34  ;;  %v2329_v35 = vmul.f32 %v4530_v21, %v2258_v25  ;;  %v2139_v28 = vadd.f32 1e-05, %v2075_v19 }
 0x32a   :  { %v3026_v40 = vpop.eup %3025  ;;  %v2401_v20 = vadd.f32 %v4536_v43, %v2330_v52  ;;  %v2261_v57 = vmul.f32 %v3024_v22, %v4325_v61  ;;  %v2138_v3 = vadd.f32 1e-05, %v2074_v53  ;;  %v1965_v59 = vpop.xlane.xlu1 %1964 }
 0x32b   :  { %v1962_v29 = vpop.xlane.xlu0 %1961  ;;  %v2400_v2 = vadd.f32 %v4536_v43, %v2329_v35  ;;  %v2260_v39 = vmul.f32 %v3026_v40, %v4320_v37  ;;  %3035 = vrsqrt.f32 %v2139_v28  ;;  %v2077_v8 = vmul.f32 0.25, %v1965_v59 }
 0x32c   :  { %2465 = vst.msk [vmem:[%s4983_s8 + $0xe8] sm:$0xff] %vm229_vm1, %v2401_v20  ;;  %v2332_v4 = vmul.f32 %v4530_v21, %v2261_v57  ;;  %3037 = vrsqrt.f32 %v2138_v3  ;;  %v2076_v38 = vmul.f32 0.25, %v1962_v29 }
 0x32d   :  { %v3028_v15 = vpop.eup %3027  ;;  %2464 = vst.msk [vmem:[%s4983_s8 + $0xe0] sm:$0xff] %vm229_vm1, %v2400_v2  ;;  %v2331_v61 = vmul.f32 %v4530_v21, %v2260_v39  ;;  %v2141_v37 = vadd.f32 1e-05, %v2077_v8 }
 0x32e   :  { %v3030_v54 = vpop.eup %3029  ;;  %v2403_v27 = vadd.f32 %v4536_v43, %v2332_v4  ;;  %v2263_v55 = vmul.f32 %v3028_v15, %v4337_v32  ;;  %v2140_v9 = vadd.f32 1e-05, %v2076_v38  ;;  %v1971_v47 = vpop.xlane.xlu1 %1970 }
 0x32f   :  { %v1968_v14 = vpop.xlane.xlu0 %1967  ;;  %v2402_v5 = vadd.f32 %v4536_v43, %v2331_v61  ;;  %v2262_v36 = vmul.f32 %v3030_v54, %v4332_v1  ;;  %3039 = vrsqrt.f32 %v2141_v37  ;;  %v2079_v45 = vmul.f32 0.25, %v1971_v47 }
 0x330   :  { %2467 = vst.msk [vmem:[%s4983_s8 + $0xf8] sm:$0xff] %vm229_vm1, %v2403_v27  ;;  %v2334_v7 = vmul.f32 %v4530_v21, %v2263_v55  ;;  %3041 = vrsqrt.f32 %v2140_v9  ;;  %v2078_v42 = vmul.f32 0.25, %v1968_v14 }
 0x331   :  { %v3032_v10 = vpop.eup %3031  ;;  %2466 = vst.msk [vmem:[%s4983_s8 + $0xf0] sm:$0xff] %vm229_vm1, %v2402_v5  ;;  %v2333_v32 = vmul.f32 %v4530_v21, %v2262_v36  ;;  %v2143_v1 = vadd.f32 1e-05, %v2079_v45 }
 0x332   :  { %v3034_v50 = vpop.eup %3033  ;;  %v2405_v33 = vadd.f32 %v4536_v43, %v2334_v7  ;;  %v2265_v41 = vmul.f32 %v3032_v10, %v4349_v12  ;;  %v2142_v11 = vadd.f32 1e-05, %v2078_v42  ;;  %v1977_v23 = vpop.xlane.xlu1 %1976 }
 0x333   :  { %v1974_v48 = vpop.xlane.xlu0 %1973  ;;  %v2404_v6 = vadd.f32 %v4536_v43, %v2333_v32  ;;  %v2264_v24 = vmul.f32 %v3034_v50, %v4344_v44  ;;  %3043 = vrsqrt.f32 %v2143_v1  ;;  %v2081_v16 = vmul.f32 0.25, %v1977_v23 }
 0x334   :  { %2469 = vst.msk [vmem:[%s4983_s8 + $0x108] sm:$0xff] %vm229_vm1, %v2405_v33  ;;  %v2336_v26 = vmul.f32 %v4530_v21, %v2265_v41  ;;  %3045 = vrsqrt.f32 %v2142_v11  ;;  %v2080_v56 = vmul.f32 0.25, %v1974_v48 }
 0x335   :  { %v3036_v49 = vpop.eup %3035  ;;  %2468 = vst.msk [vmem:[%s4983_s8 + $0x100] sm:$0xff] %vm229_vm1, %v2404_v6  ;;  %v2335_v12 = vmul.f32 %v4530_v21, %v2264_v24  ;;  %v2145_v44 = vadd.f32 1e-05, %v2081_v16 }
 0x336   :  { %v3038_v62 = vpop.eup %3037  ;;  %v2407_v31 = vadd.f32 %v4536_v43, %v2336_v26  ;;  %v2267_v58 = vmul.f32 %v3036_v49, %v4361_v46  ;;  %v2144_v34 = vadd.f32 1e-05, %v2080_v56  ;;  %v1983_v25 = vpop.xlane.xlu1 %1982 }
 0x337   :  { %v1980_v19 = vpop.xlane.xlu0 %1979  ;;  %v2406_v52 = vadd.f32 %v4536_v43, %v2335_v12  ;;  %v2266_v53 = vmul.f32 %v3038_v62, %v4356_v17  ;;  %3047 = vrsqrt.f32 %v2145_v44  ;;  %v2083_v22 = vmul.f32 0.25, %v1983_v25 }
 0x338   :  { %2471 = vst.msk [vmem:[%s4983_s8 + $0x118] sm:$0xff] %vm229_vm1, %v2407_v31  ;;  %v2338_v35 = vmul.f32 %v4530_v21, %v2267_v58  ;;  %3049 = vrsqrt.f32 %v2144_v34  ;;  %v2082_v28 = vmul.f32 0.25, %v1980_v19  ;;  %v5064_v58 = vld [vmem:[#allocation16_spill] sm:$0xff] }
 0x339   :  { %v3040_v40 = vpop.eup %3039  ;;  %2470 = vst.msk [vmem:[%s4983_s8 + $0x110] sm:$0xff] %vm229_vm1, %v2406_v52  ;;  %v2337_v46 = vmul.f32 %v4530_v21, %v2266_v53  ;;  %v2147_v17 = vadd.f32 1e-05, %v2083_v22 }
 0x33a   :  { %v3042_v20 = vpop.eup %3041  ;;  %v2409_v57 = vadd.f32 %v4536_v43, %v2338_v35  ;;  %v2269_v3 = vmul.f32 %v3040_v40, %v4373_v63  ;;  %v2146_v59 = vadd.f32 1e-05, %v2082_v28  ;;  %v1989_v29 = vpop.xlane.xlu1 %1988  ;;  %v5065_v40 = vld [vmem:[#allocation18_spill] sm:$0xff] }
 0x33b   :  { %v1986_v2 = vpop.xlane.xlu0 %1985  ;;  %v2408_v39 = vadd.f32 %v4536_v43, %v2337_v46  ;;  %v2268_v8 = vmul.f32 %v3042_v20, %v4368_v51  ;;  %3051 = vrsqrt.f32 %v2147_v17  ;;  %v2085_v4 = vmul.f32 0.25, %v1989_v29 }
 0x33c   :  { %2473 = vst.msk [vmem:[%s4983_s8 + $0x128] sm:$0xff] %vm229_vm1, %v2409_v57  ;;  %v2340_v38 = vmul.f32 %v4530_v21, %v2269_v3  ;;  %3053 = vrsqrt.f32 %v2146_v59  ;;  %v2084_v15 = vmul.f32 0.25, %v1986_v2  ;;  %v5066_v59 = vld [vmem:[#allocation17_spill] sm:$0xff] }
 0x33d   :  { %v3044_v61 = vpop.eup %3043  ;;  %2472 = vst.msk [vmem:[%s4983_s8 + $0x120] sm:$0xff] %vm229_vm1, %v2408_v39  ;;  %v2339_v63 = vmul.f32 %v4530_v21, %v2268_v8  ;;  %v2149_v51 = vadd.f32 1e-05, %v2085_v4 }
 0x33e   :  { %v3046_v37 = vpop.eup %3045  ;;  %v2411_v54 = vadd.f32 %v4536_v43, %v2340_v38  ;;  %v2271_v27 = vmul.f32 %v3044_v61, %v4385_v13  ;;  %v2148_v55 = vadd.f32 1e-05, %v2084_v15  ;;  %v1995_v9 = vpop.xlane.xlu1 %1994 }
 0x33f   :  { %v1992_v47 = vpop.xlane.xlu0 %1991  ;;  %v2410_v14 = vadd.f32 %v4536_v43, %v2339_v63  ;;  %v2270_v5 = vmul.f32 %v3046_v37, %v4380_v0  ;;  %3055 = vrsqrt.f32 %v2149_v51  ;;  %v2087_v36 = vmul.f32 0.25, %v1995_v9  ;;  %v5067_v51 = vld [vmem:[#allocation20_spill] sm:$0xff] }
 0x340   :  { %2475 = vst.msk [vmem:[%s4983_s8 + $0x138] sm:$0xff] %vm229_vm1, %v2411_v54  ;;  %v2342_v45 = vmul.f32 %v4530_v21, %v2271_v27  ;;  %3057 = vrsqrt.f32 %v2148_v55  ;;  %v2086_v7 = vmul.f32 0.25, %v1992_v47  ;;  %v5068_v47 = vld [vmem:[#allocation19_spill] sm:$0xff] }
 0x341   :  { %v3048_v42 = vpop.eup %3047  ;;  %2474 = vst.msk [vmem:[%s4983_s8 + $0x130] sm:$0xff] %vm229_vm1, %v2410_v14  ;;  %v2341_v13 = vmul.f32 %v4530_v21, %v2270_v5  ;;  %v2151_v0 = vadd.f32 1e-05, %v2087_v36 }
 0x342   :  { %v3050_v10 = vpop.eup %3049  ;;  %v2413_v32 = vadd.f32 %v4536_v43, %v2342_v45  ;;  %v2273_v1 = vmul.f32 %v3048_v42, %v4397_v30  ;;  %v2150_v50 = vadd.f32 1e-05, %v2086_v7  ;;  %v2001_v33 = vpop.xlane.xlu1 %2000 }
 0x343   :  { %v1998_v41 = vpop.xlane.xlu0 %1997  ;;  %v2412_v11 = vadd.f32 %v4536_v43, %v2341_v13  ;;  %v2272_v23 = vmul.f32 %v3050_v10, %v4392_v18  ;;  %3059 = vrsqrt.f32 %v2151_v0  ;;  %v2089_v48 = vmul.f32 0.25, %v2001_v33 }
 0x344   :  { %2477 = vst.msk [vmem:[%s4983_s8 + $0x148] sm:$0xff] %vm229_vm1, %v2413_v32  ;;  %v2344_v6 = vmul.f32 %v4530_v21, %v2273_v1  ;;  %3061 = vrsqrt.f32 %v2150_v50  ;;  %v2088_v24 = vmul.f32 0.25, %v1998_v41  ;;  %v5069_v32 = vld [vmem:[#allocation2_spill] sm:$0xff] }
 0x345   :  { %v3052_v16 = vpop.eup %3051  ;;  %2476 = vst.msk [vmem:[%s4983_s8 + $0x140] sm:$0xff] %vm229_vm1, %v2412_v11  ;;  %v2343_v30 = vmul.f32 %v4530_v21, %v2272_v23  ;;  %v2153_v18 = vadd.f32 1e-05, %v2089_v48  ;;  %v5070_v23 = vld [vmem:[#allocation21_spill] sm:$0xff] }
 0x346   :  { %v3054_v26 = vpop.eup %3053  ;;  %v2415_v56 = vadd.f32 %v4536_v43, %v2344_v6  ;;  %v2275_v49 = vmul.f32 %v3052_v16, %v4409_v60  ;;  %v2152_v12 = vadd.f32 1e-05, %v2088_v24  ;;  %v2007_v44 = vpop.xlane.xlu1 %2006 }
 0x347   :  { %v2004_v62 = vpop.xlane.xlu0 %2003  ;;  %v2414_v31 = vadd.f32 %v4536_v43, %v2343_v30  ;;  %v2274_v34 = vmul.f32 %v3054_v26, %v5064_v58  ;;  %3063 = vrsqrt.f32 %v2153_v18  ;;  %v2091_v25 = vmul.f32 0.25, %v2007_v44 }
 0x348   :  { %2479 = vst.msk [vmem:[%s4983_s8 + $0x158] sm:$0xff] %vm229_vm1, %v2415_v56  ;;  %v2346_v19 = vmul.f32 %v4530_v21, %v2275_v49  ;;  %3065 = vrsqrt.f32 %v2152_v12  ;;  %v2090_v52 = vmul.f32 0.25, %v2004_v62  ;;  %v5071_v12 = vld [vmem:[#allocation4_spill] sm:$0xff] }
 0x349   :  { %v3056_v53 = vpop.eup %3055  ;;  %2478 = vst.msk [vmem:[%s4983_s8 + $0x150] sm:$0xff] %vm229_vm1, %v2414_v31  ;;  %v2345_v60 = vmul.f32 %v4530_v21, %v2274_v34  ;;  %v2155_v22 = vadd.f32 1e-05, %v2091_v25  ;;  %v5072_v25 = vld [vmem:[#allocation3_spill] sm:$0xff] }
 0x34a   :  { %v3058_v35 = vpop.eup %3057  ;;  %v2417_v28 = vadd.f32 %v4536_v43, %v2346_v19  ;;  %v2277_v46 = vmul.f32 %v3056_v53, %v5065_v40  ;;  %v2154_v17 = vadd.f32 1e-05, %v2090_v52  ;;  %v2013_v20 = vpop.xlane.xlu1 %2012 }
 0x34b   :  { %v2010_v57 = vpop.xlane.xlu0 %2009  ;;  %v2416_v3 = vadd.f32 %v4536_v43, %v2345_v60  ;;  %v2276_v29 = vmul.f32 %v3058_v35, %v5066_v59  ;;  %3067 = vrsqrt.f32 %v2155_v22  ;;  %v2093_v2 = vmul.f32 0.25, %v2013_v20 }
 0x34c   :  { %2481 = vst.msk [vmem:[%s4983_s8 + $0x168] sm:$0xff] %vm229_vm1, %v2417_v28  ;;  %v2348_v39 = vmul.f32 %v4530_v21, %v2277_v46  ;;  %3069 = vrsqrt.f32 %v2154_v17  ;;  %v2092_v8 = vmul.f32 0.25, %v2010_v57  ;;  %v5073_v17 = vld [vmem:[#allocation6_spill] sm:$0xff] }
 0x34d   :  { %v3060_v4 = vpop.eup %3059  ;;  %2480 = vst.msk [vmem:[%s4983_s8 + $0x160] sm:$0xff] %vm229_vm1, %v2416_v3  ;;  %v2347_v38 = vmul.f32 %v4530_v21, %v2276_v29  ;;  %v2157_v15 = vadd.f32 1e-05, %v2093_v2  ;;  %v5074_v2 = vld [vmem:[#allocation5_spill] sm:$0xff] }
 0x34e   :  { %v3062_v61 = vpop.eup %3061  ;;  %v2419_v63 = vadd.f32 %v4536_v43, %v2348_v39  ;;  %v2279_v37 = vmul.f32 %v3060_v4, %v5067_v51  ;;  %v2156_v54 = vadd.f32 1e-05, %v2092_v8  ;;  %v2019_v27 = vpop.xlane.xlu1 %2018 }
 0x34f   :  { %v2016_v55 = vpop.xlane.xlu0 %2015  ;;  %v2418_v9 = vadd.f32 %v4536_v43, %v2347_v38  ;;  %v2278_v14 = vmul.f32 %v3062_v61, %v5068_v47  ;;  %3071 = vrsqrt.f32 %v2157_v15  ;;  %v2095_v5 = vmul.f32 0.25, %v2019_v27  ;;  %v5076_v47 = vld [vmem:[#allocation7_spill] sm:$0xff] }
 0x350   :  { %2483 = vst.msk [vmem:[%s4983_s8 + $0x178] sm:$0xff] %vm229_vm1, %v2419_v63  ;;  %v2350_v36 = vmul.f32 %v4530_v21, %v2279_v37  ;;  %3073 = vrsqrt.f32 %v2156_v54  ;;  %v2094_v45 = vmul.f32 0.25, %v2016_v55  ;;  %v5075_v54 = vld [vmem:[#allocation8_spill] sm:$0xff] }
 0x351   :  { %v3064_v7 = vpop.eup %3063  ;;  %2482 = vst.msk [vmem:[%s4983_s8 + $0x170] sm:$0xff] %vm229_vm1, %v2418_v9  ;;  %v2349_v42 = vmul.f32 %v4530_v21, %v2278_v14  ;;  %v2159_v13 = vadd.f32 1e-05, %v2095_v5 }
 0x352   :  { %v3066_v0 = vpop.eup %3065  ;;  %v2421_v10 = vadd.f32 %v4536_v43, %v2350_v36  ;;  %v2281_v1 = vmul.f32 %v3064_v7, %v5069_v32  ;;  %v2158_v50 = vadd.f32 1e-05, %v2094_v45  ;;  %v2025_v33 = vpop.xlane.xlu1 %2024  ;;  %v3092_v7 = vld [vmem:[%s4982_s7] ss:$0 sm:$0xff]  ;;  %v5078_v32 = vld [vmem:[#allocation9_spill] sm:$0xff] }
 0x353   :  { %v2022_v41 = vpop.xlane.xlu0 %2021  ;;  %v2420_v11 = vadd.f32 %v4536_v43, %v2349_v42  ;;  %v2280_v48 = vmul.f32 %v3066_v0, %v5070_v23  ;;  %3075 = vrsqrt.f32 %v2159_v13  ;;  %v2097_v6 = vmul.f32 0.25, %v2025_v33  ;;  %v5077_v13 = vld [vmem:[#allocation10_spill] sm:$0xff] }
 0x354   :  { %2485 = vst.msk [vmem:[%s4983_s8 + $0x188] sm:$0xff] %vm229_vm1, %v2421_v10  ;;  %v2352_v24 = vmul.f32 %v4530_v21, %v2281_v1  ;;  %3077 = vrsqrt.f32 %v2158_v50  ;;  %v2096_v16 = vmul.f32 0.25, %v2022_v41 }
 0x355   :  { %v3068_v30 = vpop.eup %3067  ;;  %2484 = vst.msk [vmem:[%s4983_s8 + $0x180] sm:$0xff] %vm229_vm1, %v2420_v11  ;;  %v2351_v18 = vmul.f32 %v4530_v21, %v2280_v48  ;;  %v2161_v26 = vadd.f32 1e-05, %v2097_v6  ;;  %v5079_v48 = vld [vmem:[#allocation12_spill] sm:$0xff] }
 0x356   :  { %v3070_v56 = vpop.eup %3069  ;;  %v2423_v49 = vadd.f32 %v4536_v43, %v2352_v24  ;;  %v2283_v44 = vmul.f32 %v3068_v30, %v5071_v12  ;;  %v2160_v62 = vadd.f32 1e-05, %v2096_v16  ;;  %v2031_v31 = vpop.xlane.xlu1 %2030  ;;  %v5080_v16 = vld [vmem:[#allocation11_spill] sm:$0xff] }
 0x357   :  { %v2028_v58 = vpop.xlane.xlu0 %2027  ;;  %v2422_v34 = vadd.f32 %v4536_v43, %v2351_v18  ;;  %v2282_v19 = vmul.f32 %v3070_v56, %v5072_v25  ;;  %3079 = vrsqrt.f32 %v2161_v26  ;;  %v2099_v52 = vmul.f32 0.25, %v2031_v31 }
 0x358   :  { %2487 = vst.msk [vmem:[%s4983_s8 + $0x198] sm:$0xff] %vm229_vm1, %v2423_v49  ;;  %v2354_v53 = vmul.f32 %v4530_v21, %v2283_v44  ;;  %3081 = vrsqrt.f32 %v2160_v62  ;;  %v2098_v60 = vmul.f32 0.25, %v2028_v58  ;;  %v5081_v44 = vld [vmem:[#allocation13_spill] sm:$0xff]  ;;  %v5082_v58 = vld [vmem:[#allocation22_spill] sm:$0xff] }
 0x359   :  { %v3072_v22 = vpop.eup %3071  ;;  %2486 = vst.msk [vmem:[%s4983_s8 + $0x190] sm:$0xff] %vm229_vm1, %v2422_v34  ;;  %v2353_v35 = vmul.f32 %v4530_v21, %v2282_v19  ;;  %v2163_v28 = vadd.f32 1e-05, %v2099_v52 }
 0x35a   :  { %v3074_v40 = vpop.eup %3073  ;;  %v2425_v46 = vadd.f32 %v4536_v43, %v2354_v53  ;;  %v2285_v20 = vmul.f32 %v3072_v22, %v5073_v17  ;;  %v2162_v57 = vadd.f32 1e-05, %v2098_v60  ;;  %v2037_v3 = vpop.xlane.xlu1 %2036 }
 0x35b   :  { %v2034_v59 = vpop.xlane.xlu0 %2033  ;;  %v2424_v29 = vadd.f32 %v4536_v43, %v2353_v35  ;;  %v2284_v39 = vmul.f32 %v3074_v40, %v5074_v2  ;;  %3083 = vrsqrt.f32 %v2163_v28  ;;  %v2101_v8 = vmul.f32 0.25, %v2037_v3 }
 0x35c   :  { %2489 = vst.msk [vmem:[%s4983_s8 + $0x1a8] sm:$0xff] %vm229_vm1, %v2425_v46  ;;  %v2356_v4 = vmul.f32 %v4530_v21, %v2285_v20  ;;  %3085 = vrsqrt.f32 %v2162_v57  ;;  %v2100_v38 = vmul.f32 0.25, %v2034_v59 }
 0x35d   :  { %v3076_v15 = vpop.eup %3075  ;;  %2488 = vst.msk [vmem:[%s4983_s8 + $0x1a0] sm:$0xff] %vm229_vm1, %v2424_v29  ;;  %v2355_v61 = vmul.f32 %v4530_v21, %v2284_v39  ;;  %v2165_v63 = vadd.f32 1e-05, %v2101_v8  ;;  %v3091_v21 = vld [vmem:[%s4981_s6] ss:$0 sm:$0xff] }
 0x35e   :  { %v3078_v51 = vpop.eup %3077  ;;  %v2427_v37 = vadd.f32 %v4536_v43, %v2356_v4  ;;  %v2287_v27 = vmul.f32 %v3076_v15, %v5075_v54  ;;  %v2164_v55 = vadd.f32 1e-05, %v2100_v38 }
 0x35f   :  { %v2426_v9 = vadd.f32 %v4536_v43, %v2355_v61  ;;  %v2286_v14 = vmul.f32 %v3078_v51, %v5076_v47  ;;  %3087 = vrsqrt.f32 %v2165_v63 }
 0x360   :  { %2491 = vst.msk [vmem:[%s4983_s8 + $0x1b8] sm:$0xff] %vm229_vm1, %v2427_v37  ;;  %v2358_v5 = vmul.f32 %v3091_v21, %v2287_v27  ;;  %3089 = vrsqrt.f32 %v2164_v55 }
 0x361   :  { %v3080_v36 = vpop.eup %3079  ;;  %2490 = vst.msk [vmem:[%s4983_s8 + $0x1b0] sm:$0xff] %vm229_vm1, %v2426_v9  ;;  %v2357_v43 = vmul.f32 %v3091_v21, %v2286_v14 }
 0x362   :  { %v3082_v45 = vpop.eup %3081  ;;  %v2429_v42 = vadd.f32 %v3092_v7, %v2358_v5  ;;  %v2289_v0 = vmul.f32 %v3080_v36, %v5077_v13 }
 0x363   :  { %v2428_v10 = vadd.f32 %v3092_v7, %v2357_v43  ;;  %v2288_v1 = vmul.f32 %v3082_v45, %v5078_v32 }
 0x364   :  { %2493 = vst.msk [vmem:[%s4983_s8 + $0x1c8] sm:$0xff] %vm229_vm1, %v2429_v42  ;;  %v2360_v50 = vmul.f32 %v3091_v21, %v2289_v0 }
 0x365   :  { %v3084_v33 = vpop.eup %3083  ;;  %2492 = vst.msk [vmem:[%s4983_s8 + $0x1c0] sm:$0xff] %vm229_vm1, %v2428_v10  ;;  %v2359_v41 = vmul.f32 %v3091_v21, %v2288_v1 }
 0x366   :  { %v3086_v11 = vpop.eup %3085  ;;  %v2431_v23 = vadd.f32 %v3092_v7, %v2360_v50  ;;  %v2291_v6 = vmul.f32 %v3084_v33, %v5079_v48 }
 0x367   :  { %v2430_v24 = vadd.f32 %v3092_v7, %v2359_v41  ;;  %v2290_v30 = vmul.f32 %v3086_v11, %v5080_v16 }
 0x368   :  { %2495 = vst.msk [vmem:[%s4983_s8 + $0x1d8] sm:$0xff] %vm229_vm1, %v2431_v23  ;;  %v2362_v18 = vmul.f32 %v3091_v21, %v2291_v6 }
 0x369   :  { %v3088_v26 = vpop.eup %3087  ;;  %2494 = vst.msk [vmem:[%s4983_s8 + $0x1d0] sm:$0xff] %vm229_vm1, %v2430_v24  ;;  %v2361_v56 = vmul.f32 %v3091_v21, %v2290_v30 }
 0x36a   :  { %v3090_v49 = vpop.eup %3089  ;;  %v2433_v12 = vadd.f32 %v3092_v7, %v2362_v18  ;;  %v2293_v62 = vmul.f32 %v3088_v26, %v5081_v44 }
 0x36b   :  { %v2432_v31 = vadd.f32 %v3092_v7, %v2361_v56  ;;  %v2292_v34 = vmul.f32 %v3090_v49, %v5082_v58 }
 0x36c   :  { %2497 = vst.msk [vmem:[%s4983_s8 + $0x1e8] sm:$0xff] %vm229_vm1, %v2433_v12  ;;  %v2364_v25 = vmul.f32 %v3091_v21, %v2293_v62 }
 0x36d   :  { %2496 = vst.msk [vmem:[%s4983_s8 + $0x1e0] sm:$0xff] %vm229_vm1, %v2432_v31  ;;  %v2363_v19 = vmul.f32 %v3091_v21, %v2292_v34 }
 0x36e   :  { %v2435_v52 = vadd.f32 %v3092_v7, %v2364_v25 }
 0x36f   :  { %v2434_v53 = vadd.f32 %v3092_v7, %v2363_v19 }
 0x370   :  { %2499 = vst.msk [vmem:[%s4983_s8 + $0x1f8] sm:$0xff] %vm229_vm1, %v2435_v52 }
 0x371   :  { %2498 = vst.msk [vmem:[%s4983_s8 + $0x1f0] sm:$0xff] %vm229_vm1, %v2434_v53 }

</bundles_post_ra>
